<compile_context>
chip_gen: v7x
topology: tpu7x:2x2x1
jax: 0.10.0
libtpu: 0.0.40
codegen_flags: <defaults>
</compile_context>

<pallas_src>
import functools

import jax
import jax.numpy as jnp
from jax import lax
from jax.experimental import pallas as pl
from jax.experimental.pallas import tpu as pltpu

_EPS = 1e-5
_LANE = 128                     # pad channel dims to a multiple of the lane width
_SUBLANE = 8                    # pad the (spatially padded) W dim to a multiple of 8
_VMEM_LIMIT = 48 * 1024 * 1024  # headroom below v7x's 64 MiB VMEM


def _round_up(x, m):
    return (x + m - 1) // m * m


# ------------------------- Pallas kernels -------------------------

def _conv_stats_kernel(xpad_ref, w_ref, y_ref, stats_ref, *, h, w):
    """3x3 'same' conv (no bias) on one image + per-channel partial BN stats.

    xpad_ref : (h+2, wp, cin_p) f32  spatially zero-padded NHWC tile (wp >= w+2)
    w_ref    : (3, 3, cin_p, cout_p) bf16
    y_ref    : (h, w, cout_p) f32    conv output (pre-BN)
    stats_ref: (8, cout_p) f32       row 0 = sum(y), row 1 = sum(y*y) over h*w rows
    """
    cin = w_ref.shape[2]
    cout = w_ref.shape[3]
    acc = jnp.zeros((h * w, cout), jnp.float32)
    # im2col stays in VMEM: 9 shifted slices, one MXU matmul each (bf16 in, f32 acc).
    for ky in range(3):
        for kx in range(3):
            patch = xpad_ref[ky:ky + h, kx:kx + w, :]              # (h, w, cin)
            patch = patch.reshape(h * w, cin).astype(jnp.bfloat16)
            acc = acc + jnp.dot(patch, w_ref[ky, kx],
                                preferred_element_type=jnp.float32)
    y_ref[...] = acc.reshape(h, w, cout)
    s = jnp.sum(acc, axis=0, keepdims=True)                         # (1, cout)
    sq = jnp.sum(acc * acc, axis=0, keepdims=True)
    stats_ref[...] = jnp.concatenate(
        [s, sq, jnp.zeros((6, cout), jnp.float32)], axis=0)


def _bn_relu_conv_stats_kernel(y1_ref, s_ref, t_ref, w_ref, y2_ref, stats_ref,
                               apad_ref, *, h, w):
    """Fused: BN1 affine + ReLU -> 3x3 conv2 (no bias) -> partial BN2 stats.

    y1_ref       : (h, w, c) f32   conv1 output
    s_ref, t_ref : (1, c) f32      folded BN1 scale / shift (global batch stats)
    w_ref        : (3, 3, c, c) bf16
    y2_ref       : (h, w, c) f32   conv2 output (pre-BN)
    stats_ref    : (8, c) f32      rows 0/1 = per-channel sum / sum-of-squares
    apad_ref     : (h+2, wp, c) f32 VMEM scratch (zero-padded activation)
    """
    c = w_ref.shape[3]
    a = jnp.maximum(y1_ref[...] * s_ref[...] + t_ref[...], 0.0)    # (h, w, c)
    # Zero-pad in VMEM (border = the conv's zero padding). Re-zero every grid
    # step so the kernel stays correct under "parallel"/megacore execution.
    apad_ref[...] = jnp.zeros_like(apad_ref)
    apad_ref[1:h + 1, 1:w + 1, :] = a
    acc = jnp.zeros((h * w, c), jnp.float32)
    for ky in range(3):
        for kx in range(3):
            patch = apad_ref[ky:ky + h, kx:kx + w, :]               # (h, w, c)
            patch = patch.reshape(h * w, c).astype(jnp.bfloat16)
            acc = acc + jnp.dot(patch, w_ref[ky, kx],
                                preferred_element_type=jnp.float32)
    y2_ref[...] = acc.reshape(h, w, c)
    s = jnp.sum(acc, axis=0, keepdims=True)
    sq = jnp.sum(acc * acc, axis=0, keepdims=True)
    stats_ref[...] = jnp.concatenate(
        [s, sq, jnp.zeros((6, c), jnp.float32)], axis=0)


def _bn_relu_pool_kernel(y2_ref, s_ref, t_ref, conn_ref, pool_ref, *, h, w):
    """Fused BN2 affine + ReLU (-> `connection`) and 2x2 / stride-2 maxpool."""
    conn = jnp.maximum(y2_ref[...] * s_ref[...] + t_ref[...], 0.0)  # (h, w, c)
    conn_ref[...] = conn
    c = conn.shape[-1]
    hh, wh = h // 2, w // 2
    # Row direction: free reshape (splits a leading dim) + max over window rows.
    rows = jnp.max(conn.reshape(hh, 2, w, c), axis=1)               # (hh, w, c)
    # Column direction: static 2-wide sublane slices, small unrolled loop.
    cols = [jnp.max(rows[:, 2 * j:2 * j + 2, :], axis=1, keepdims=True)
            for j in range(wh)]
    pool_ref[...] = jnp.concatenate(cols, axis=1)                   # (hh, wh, c)


# ------------------------- wrappers (glue) -------------------------

def _compiler_params():
    return pltpu.CompilerParams(
        dimension_semantics=("parallel",),      # image tiles are independent
        vmem_limit_bytes=_VMEM_LIMIT)


def _prep_weight(w_oihw, cin_p, cout_p):
    cout, cin, _, _ = w_oihw.shape
    w = jnp.transpose(w_oihw, (2, 3, 1, 0))                     # (3, 3, cin, cout)
    w = jnp.pad(w, ((0, 0), (0, 0), (0, cin_p - cin), (0, cout_p - cout)))
    return w.astype(jnp.bfloat16)


def _pad_vec(v, cp):
    return jnp.pad(v, (0, cp - v.shape[0]))


def _bn_scale_shift(stats, m_rows, gamma_p, beta_p):
    """Finalize global batch stats -> folded per-channel scale/shift (tiny)."""
    total = jnp.sum(stats[:, 0, :], axis=0)
    total_sq = jnp.sum(stats[:, 1, :], axis=0)
    mean = total / m_rows
    var = jnp.maximum(total_sq / m_rows - mean * mean, 0.0)      # biased variance
    scale = gamma_p * lax.rsqrt(var + _EPS)
    shift = beta_p - mean * scale
    return scale[None, :], shift[None, :]


def _conv1_pass(xpad, w1, h, w_sp):
    n, hp, wp, cin_p = xpad.shape
    cout_p = w1.shape[-1]
    return pl.pallas_call(
        functools.partial(_conv_stats_kernel, h=h, w=w_sp),
        grid=(n,),
        in_specs=[
            pl.BlockSpec((None, hp, wp, cin_p), lambda i: (i, 0, 0, 0)),
            pl.BlockSpec((3, 3, cin_p, cout_p), lambda i: (0, 0, 0, 0)),
        ],
        out_specs=(
            pl.BlockSpec((None, h, w_sp, cout_p), lambda i: (i, 0, 0, 0)),
            pl.BlockSpec((None, 8, cout_p), lambda i: (i, 0, 0)),
        ),
        out_shape=(
            jax.ShapeDtypeStruct((n, h, w_sp, cout_p), jnp.float32),
            jax.ShapeDtypeStruct((n, 8, cout_p), jnp.float32),
        ),
        compiler_params=_compiler_params(),
    )(xpad, w1)


def _conv2_pass(y1, scale1, shift1, w2, h, w_sp, wp):
    n = y1.shape[0]
    c = y1.shape[-1]
    return pl.pallas_call(
        functools.partial(_bn_relu_conv_stats_kernel, h=h, w=w_sp),
        grid=(n,),
        in_specs=[
            pl.BlockSpec((None, h, w_sp, c), lambda i: (i, 0, 0, 0)),
            pl.BlockSpec((1, c), lambda i: (0, 0)),
            pl.BlockSpec((1, c), lambda i: (0, 0)),
            pl.BlockSpec((3, 3, c, c), lambda i: (0, 0, 0, 0)),
        ],
        out_specs=(
            pl.BlockSpec((None, h, w_sp, c), lambda i: (i, 0, 0, 0)),
            pl.BlockSpec((None, 8, c), lambda i: (i, 0, 0)),
        ),
        out_shape=(
            jax.ShapeDtypeStruct((n, h, w_sp, c), jnp.float32),
            jax.ShapeDtypeStruct((n, 8, c), jnp.float32),
        ),
        scratch_shapes=[pltpu.VMEM((h + 2, wp, c), jnp.float32)],
        compiler_params=_compiler_params(),
    )(y1, scale1, shift1, w2)


def _pool_pass(y2, scale2, shift2, h, w_sp):
    n = y2.shape[0]
    c = y2.shape[-1]
    return pl.pallas_call(
        functools.partial(_bn_relu_pool_kernel, h=h, w=w_sp),
        grid=(n,),
        in_specs=[
            pl.BlockSpec((None, h, w_sp, c), lambda i: (i, 0, 0, 0)),
            pl.BlockSpec((1, c), lambda i: (0, 0)),
            pl.BlockSpec((1, c), lambda i: (0, 0)),
        ],
        out_specs=(
            pl.BlockSpec((None, h, w_sp, c), lambda i: (i, 0, 0, 0)),
            pl.BlockSpec((None, h // 2, w_sp // 2, c), lambda i: (i, 0, 0, 0)),
        ),
        out_shape=(
            jax.ShapeDtypeStruct((n, h, w_sp, c), jnp.float32),
            jax.ShapeDtypeStruct((n, h // 2, w_sp // 2, c), jnp.float32),
        ),
        compiler_params=_compiler_params(),
    )(y2, scale2, shift2)


@jax.jit
def upsample_forward(x_nchw, params):
    """Matches Upsample.forward: returns (maxpooled_out, connection), both NCHW."""
    n, cin, h, w = x_nchw.shape
    cout = params["w1"].shape[0]
    assert h % 2 == 0 and w % 2 == 0, "maxpool 2x2 requires even H, W"
    assert w % _SUBLANE == 0, "W must be a multiple of 8 for this tiling"
    # TODO(synk): for very large H, additionally tile H inside each image with a
    # +1-row halo (pl.Element offsets in the index_map) instead of one full
    # image per grid step.

    cin_p = _round_up(cin, _LANE)
    cout_p = _round_up(cout, _LANE)
    wp = _round_up(w + 2, _SUBLANE)

    x = jnp.transpose(x_nchw, (0, 2, 3, 1))                      # NCHW -> NHWC
    # Cheap +1 spatial halo pad (conv zero padding) + lane padding of channels.
    xpad = jnp.pad(x, ((0, 0), (1, 1), (1, wp - w - 1), (0, cin_p - cin)))

    w1 = _prep_weight(params["w1"], cin_p, cout_p)
    w2 = _prep_weight(params["w2"], cout_p, cout_p)
    g1 = _pad_vec(params["g1"], cout_p)
    be1 = _pad_vec(params["beta1"], cout_p)
    g2 = _pad_vec(params["g2"], cout_p)
    be2 = _pad_vec(params["beta2"], cout_p)
    # NOTE: conv biases (params["b1"], params["b2"]) are intentionally unused:
    # training-mode BatchNorm subtracts the batch mean, which cancels any
    # per-channel bias added before it.

    m_rows = float(n * h * w)

    # Stage 1: conv1 + partial BN1 stats.
    y1, stats1 = _conv1_pass(xpad, w1, h, w)
    scale1, shift1 = _bn_scale_shift(stats1, m_rows, g1, be1)
    # Stage 2: BN1 affine + ReLU fused into conv2, + partial BN2 stats.
    y2, stats2 = _conv2_pass(y1, scale1, shift1, w2, h, w, wp)
    scale2, shift2 = _bn_scale_shift(stats2, m_rows, g2, be2)
    # Stage 3: BN2 affine + ReLU (-> connection) fused with the 2x2 maxpool.
    conn_p, pool_p = _pool_pass(y2, scale2, shift2, h, w)

    connection = jnp.transpose(conn_p[..., :cout], (0, 3, 1, 2))  # NHWC -> NCHW
    pooled = jnp.transpose(pool_p[..., :cout], (0, 3, 1, 2))
    return pooled, connection


# ------------------------- pure-JAX reference -------------------------

def _reference_forward(x_nchw, params, *, bf16_matmul):
    """Reference Upsample.forward. If bf16_matmul, the conv operands are cast
    to bf16 (f32 accumulation) to mirror the TPU MXU path used by the kernels;
    otherwise it is the pure-f32 module."""

    def cast(a):
        return a.astype(jnp.bfloat16) if bf16_matmul else a

    def conv(x, w, b):
        y = lax.conv_general_dilated(
            cast(x), cast(w), window_strides=(1, 1), padding=((1, 1), (1, 1)),
            dimension_numbers=("NCHW", "OIHW", "NCHW"),
            preferred_element_type=jnp.float32,
            precision=lax.Precision.HIGHEST)
        return y + b.reshape(1, -1, 1, 1)

    def bn_relu(y, g, beta):
        mean = jnp.mean(y, axis=(0, 2, 3), keepdims=True)
        var = jnp.mean((y - mean) ** 2, axis=(0, 2, 3), keepdims=True)
        yhat = (y - mean) * lax.rsqrt(var + _EPS)
        return jnp.maximum(
            yhat * g.reshape(1, -1, 1, 1) + beta.reshape(1, -1, 1, 1), 0.0)

    out = bn_relu(conv(x_nchw, params["w1"], params["b1"]),
                  params["g1"], params["beta1"])
    out = bn_relu(conv(out, params["w2"], params["b2"]),
                  params["g2"], params["beta2"])
    connection = out
    pooled = lax.reduce_window(out, -jnp.inf, lax.max,
                               window_dimensions=(1, 1, 2, 2),
                               window_strides=(1, 1, 2, 2), padding="VALID")
    return pooled, connection


# ------------------------- main -------------------------

if __name__ == "__main__":
    N, C_IN, C_OUT, H, W = 2, 4, 8, 16, 16

    key = jax.random.PRNGKey(0)
    kx, kw1, kb1, kw2, kb2 = jax.random.split(key, 5)

    x = jax.random.normal(kx, (N, C_IN, H, W), dtype=jnp.float32)

    params = {
        # conv1: Conv2d(in_channels, out_channels, 3, padding=1)
        "w1": 0.1 * jax.random.normal(kw1, (C_OUT, C_IN, 3, 3), dtype=jnp.float32),
        "b1": 0.1 * jax.random.normal(kb1, (C_OUT,), dtype=jnp.float32),
        # conv2: Conv2d(out_channels, out_channels, 3, padding=1)
        "w2": 0.1 * jax.random.normal(kw2, (C_OUT, C_OUT, 3, 3), dtype=jnp.float32),
        "b2": 0.1 * jax.random.normal(kb2, (C_OUT,), dtype=jnp.float32),
        # BatchNorm2d default affine params (weight=1, bias=0)
        "g1": jnp.ones((C_OUT,), jnp.float32),
        "beta1": jnp.zeros((C_OUT,), jnp.float32),
        "g2": jnp.ones((C_OUT,), jnp.float32),
        "beta2": jnp.zeros((C_OUT,), jnp.float32),
    }

    pooled, connection = upsample_forward(x, params)
    pooled = jax.block_until_ready(pooled)
    connection = jax.block_until_ready(connection)

    assert pooled.shape == (N, C_OUT, H // 2, W // 2)
    assert connection.shape == (N, C_OUT, H, W)

    # Tight check vs. a reference that also feeds the MXU bf16 operands — the
    # only deliberate numerical deviation from the f32 module.
    pooled_q, conn_q = _reference_forward(x, params, bf16_matmul=True)
    assert bool(jnp.allclose(connection, conn_q, atol=1e-2, rtol=1e-2)), \
        "connection mismatch vs bf16-matmul reference"
    assert bool(jnp.allclose(pooled, pooled_q, atol=1e-2, rtol=1e-2)), \
        "pooled output mismatch vs bf16-matmul reference"

    # Loose sanity check vs. the pure-f32 module (deviation is only from the
    # bf16 MXU inputs).
    pooled_f, conn_f = _reference_forward(x, params, bf16_matmul=False)
    assert bool(jnp.allclose(connection, conn_f, atol=1e-1, rtol=1e-1)), \
        "connection mismatch vs f32 reference"
    assert bool(jnp.allclose(pooled, pooled_f, atol=1e-1, rtol=1e-1)), \
        "pooled output mismatch vs f32 reference"

    print("KERNEL_OK")
</pallas_src>

<mosaic_0001>
module attributes {stable_mosaic.version = 11 : i64} {
  func.func @_conv_stats_kernel(%arg0: i32, %arg1: memref<1x18x24x128xf32, #tpu.memory_space<vmem>>, %arg2: memref<3x3x128x128xbf16, #tpu.memory_space<vmem>>, %arg3: memref<1x16x16x128xf32, #tpu.memory_space<vmem>>, %arg4: memref<1x8x128xf32, #tpu.memory_space<vmem>>) attributes {dimension_semantics = [#tpu.dimension_semantics<parallel>], iteration_bounds = array<i64: 2>, scalar_prefetch = 0 : i64, scratch_operands = 0 : i64, tpu.core_type = #tpu.core_type<tc>, window_params = [{transform_indices = @transform_0, window_bounds = array<i64: 1, 18, 24, 128>}, {pipeline_mode = #tpu.pipeline_mode<synchronous>, transform_indices = @transform_1, window_bounds = array<i64: 3, 3, 128, 128>}, {transform_indices = @transform_2, window_bounds = array<i64: 1, 16, 16, 128>}, {transform_indices = @transform_3, window_bounds = array<i64: 1, 8, 128>}]} {
    %cst = arith.constant 0.000000e+00 : f32
    %0 = vector.broadcast %cst : f32 to vector<256x128xf32>
    %c0 = arith.constant 0 : index
    %c0_0 = arith.constant 0 : index
    %c0_1 = arith.constant 0 : index
    %c0_2 = arith.constant 0 : index
    %1 = vector.load %arg1[%c0, %c0_0, %c0_1, %c0_2] : memref<1x18x24x128xf32, #tpu.memory_space<vmem>>, vector<1x16x16x128xf32>
    %2 = vector.shape_cast %1 : vector<1x16x16x128xf32> to vector<16x16x128xf32>
    %3 = vector.shape_cast %2 : vector<16x16x128xf32> to vector<256x128xf32>
    %4 = arith.truncf %3 : vector<256x128xf32> to vector<256x128xbf16>
    %c0_3 = arith.constant 0 : index
    %c0_4 = arith.constant 0 : index
    %c0_5 = arith.constant 0 : index
    %c0_6 = arith.constant 0 : index
    %5 = vector.load %arg2[%c0_3, %c0_4, %c0_5, %c0_6] : memref<3x3x128x128xbf16, #tpu.memory_space<vmem>>, vector<1x1x128x128xbf16>
    %6 = vector.shape_cast %5 : vector<1x1x128x128xbf16> to vector<128x128xbf16>
    %cst_7 = arith.constant dense<0.000000e+00> : vector<256x128xf32>
    %7 = tpu.matmul %4, %6, %cst_7 {dimension_numbers = #tpu.dot_dimension_numbers<[1], [0], [0], [1], [0, 0, 1, 1], [], []>} : vector<256x128xbf16>, vector<128x128xbf16>, vector<256x128xf32> -> vector<256x128xf32>
    %8 = arith.addf %0, %7 : vector<256x128xf32>
    %c0_8 = arith.constant 0 : index
    %c0_9 = arith.constant 0 : index
    %c1 = arith.constant 1 : index
    %c0_10 = arith.constant 0 : index
    %9 = vector.load %arg1[%c0_8, %c0_9, %c1, %c0_10] : memref<1x18x24x128xf32, #tpu.memory_space<vmem>>, vector<1x16x16x128xf32>
    %10 = vector.shape_cast %9 : vector<1x16x16x128xf32> to vector<16x16x128xf32>
    %11 = vector.shape_cast %10 : vector<16x16x128xf32> to vector<256x128xf32>
    %12 = arith.truncf %11 : vector<256x128xf32> to vector<256x128xbf16>
    %c0_11 = arith.constant 0 : index
    %c1_12 = arith.constant 1 : index
    %c0_13 = arith.constant 0 : index
    %c0_14 = arith.constant 0 : index
    %13 = vector.load %arg2[%c0_11, %c1_12, %c0_13, %c0_14] : memref<3x3x128x128xbf16, #tpu.memory_space<vmem>>, vector<1x1x128x128xbf16>
    %14 = vector.shape_cast %13 : vector<1x1x128x128xbf16> to vector<128x128xbf16>
    %cst_15 = arith.constant dense<0.000000e+00> : vector<256x128xf32>
    %15 = tpu.matmul %12, %14, %cst_15 {dimension_numbers = #tpu.dot_dimension_numbers<[1], [0], [0], [1], [0, 0, 1, 1], [], []>} : vector<256x128xbf16>, vector<128x128xbf16>, vector<256x128xf32> -> vector<256x128xf32>
    %16 = arith.addf %8, %15 : vector<256x128xf32>
    %c0_16 = arith.constant 0 : index
    %c0_17 = arith.constant 0 : index
    %c2 = arith.constant 2 : index
    %c0_18 = arith.constant 0 : index
    %17 = vector.load %arg1[%c0_16, %c0_17, %c2, %c0_18] : memref<1x18x24x128xf32, #tpu.memory_space<vmem>>, vector<1x16x16x128xf32>
    %18 = vector.shape_cast %17 : vector<1x16x16x128xf32> to vector<16x16x128xf32>
    %19 = vector.shape_cast %18 : vector<16x16x128xf32> to vector<256x128xf32>
    %20 = arith.truncf %19 : vector<256x128xf32> to vector<256x128xbf16>
    %c0_19 = arith.constant 0 : index
    %c2_20 = arith.constant 2 : index
    %c0_21 = arith.constant 0 : index
    %c0_22 = arith.constant 0 : index
    %21 = vector.load %arg2[%c0_19, %c2_20, %c0_21, %c0_22] : memref<3x3x128x128xbf16, #tpu.memory_space<vmem>>, vector<1x1x128x128xbf16>
    %22 = vector.shape_cast %21 : vector<1x1x128x128xbf16> to vector<128x128xbf16>
    %cst_23 = arith.constant dense<0.000000e+00> : vector<256x128xf32>
    %23 = tpu.matmul %20, %22, %cst_23 {dimension_numbers = #tpu.dot_dimension_numbers<[1], [0], [0], [1], [0, 0, 1, 1], [], []>} : vector<256x128xbf16>, vector<128x128xbf16>, vector<256x128xf32> -> vector<256x128xf32>
    %24 = arith.addf %16, %23 : vector<256x128xf32>
    %c0_24 = arith.constant 0 : index
    %c1_25 = arith.constant 1 : index
    %c0_26 = arith.constant 0 : index
    %c0_27 = arith.constant 0 : index
    %25 = vector.load %arg1[%c0_24, %c1_25, %c0_26, %c0_27] : memref<1x18x24x128xf32, #tpu.memory_space<vmem>>, vector<1x16x16x128xf32>
    %26 = vector.shape_cast %25 : vector<1x16x16x128xf32> to vector<16x16x128xf32>
    %27 = vector.shape_cast %26 : vector<16x16x128xf32> to vector<256x128xf32>
    %28 = arith.truncf %27 : vector<256x128xf32> to vector<256x128xbf16>
    %c1_28 = arith.constant 1 : index
    %c0_29 = arith.constant 0 : index
    %c0_30 = arith.constant 0 : index
    %c0_31 = arith.constant 0 : index
    %29 = vector.load %arg2[%c1_28, %c0_29, %c0_30, %c0_31] : memref<3x3x128x128xbf16, #tpu.memory_space<vmem>>, vector<1x1x128x128xbf16>
    %30 = vector.shape_cast %29 : vector<1x1x128x128xbf16> to vector<128x128xbf16>
    %cst_32 = arith.constant dense<0.000000e+00> : vector<256x128xf32>
    %31 = tpu.matmul %28, %30, %cst_32 {dimension_numbers = #tpu.dot_dimension_numbers<[1], [0], [0], [1], [0, 0, 1, 1], [], []>} : vector<256x128xbf16>, vector<128x128xbf16>, vector<256x128xf32> -> vector<256x128xf32>
    %32 = arith.addf %24, %31 : vector<256x128xf32>
    %c0_33 = arith.constant 0 : index
    %c1_34 = arith.constant 1 : index
    %c1_35 = arith.constant 1 : index
    %c0_36 = arith.constant 0 : index
    %33 = vector.load %arg1[%c0_33, %c1_34, %c1_35, %c0_36] : memref<1x18x24x128xf32, #tpu.memory_space<vmem>>, vector<1x16x16x128xf32>
    %34 = vector.shape_cast %33 : vector<1x16x16x128xf32> to vector<16x16x128xf32>
    %35 = vector.shape_cast %34 : vector<16x16x128xf32> to vector<256x128xf32>
    %36 = arith.truncf %35 : vector<256x128xf32> to vector<256x128xbf16>
    %c1_37 = arith.constant 1 : index
    %c1_38 = arith.constant 1 : index
    %c0_39 = arith.constant 0 : index
    %c0_40 = arith.constant 0 : index
    %37 = vector.load %arg2[%c1_37, %c1_38, %c0_39, %c0_40] : memref<3x3x128x128xbf16, #tpu.memory_space<vmem>>, vector<1x1x128x128xbf16>
    %38 = vector.shape_cast %37 : vector<1x1x128x128xbf16> to vector<128x128xbf16>
    %cst_41 = arith.constant dense<0.000000e+00> : vector<256x128xf32>
    %39 = tpu.matmul %36, %38, %cst_41 {dimension_numbers = #tpu.dot_dimension_numbers<[1], [0], [0], [1], [0, 0, 1, 1], [], []>} : vector<256x128xbf16>, vector<128x128xbf16>, vector<256x128xf32> -> vector<256x128xf32>
    %40 = arith.addf %32, %39 : vector<256x128xf32>
    %c0_42 = arith.constant 0 : index
    %c1_43 = arith.constant 1 : index
    %c2_44 = arith.constant 2 : index
    %c0_45 = arith.constant 0 : index
    %41 = vector.load %arg1[%c0_42, %c1_43, %c2_44, %c0_45] : memref<1x18x24x128xf32, #tpu.memory_space<vmem>>, vector<1x16x16x128xf32>
    %42 = vector.shape_cast %41 : vector<1x16x16x128xf32> to vector<16x16x128xf32>
    %43 = vector.shape_cast %42 : vector<16x16x128xf32> to vector<256x128xf32>
    %44 = arith.truncf %43 : vector<256x128xf32> to vector<256x128xbf16>
    %c1_46 = arith.constant 1 : index
    %c2_47 = arith.constant 2 : index
    %c0_48 = arith.constant 0 : index
    %c0_49 = arith.constant 0 : index
    %45 = vector.load %arg2[%c1_46, %c2_47, %c0_48, %c0_49] : memref<3x3x128x128xbf16, #tpu.memory_space<vmem>>, vector<1x1x128x128xbf16>
    %46 = vector.shape_cast %45 : vector<1x1x128x128xbf16> to vector<128x128xbf16>
    %cst_50 = arith.constant dense<0.000000e+00> : vector<256x128xf32>
    %47 = tpu.matmul %44, %46, %cst_50 {dimension_numbers = #tpu.dot_dimension_numbers<[1], [0], [0], [1], [0, 0, 1, 1], [], []>} : vector<256x128xbf16>, vector<128x128xbf16>, vector<256x128xf32> -> vector<256x128xf32>
    %48 = arith.addf %40, %47 : vector<256x128xf32>
    %c0_51 = arith.constant 0 : index
    %c2_52 = arith.constant 2 : index
    %c0_53 = arith.constant 0 : index
    %c0_54 = arith.constant 0 : index
    %49 = vector.load %arg1[%c0_51, %c2_52, %c0_53, %c0_54] : memref<1x18x24x128xf32, #tpu.memory_space<vmem>>, vector<1x16x16x128xf32>
    %50 = vector.shape_cast %49 : vector<1x16x16x128xf32> to vector<16x16x128xf32>
    %51 = vector.shape_cast %50 : vector<16x16x128xf32> to vector<256x128xf32>
    %52 = arith.truncf %51 : vector<256x128xf32> to vector<256x128xbf16>
    %c2_55 = arith.constant 2 : index
    %c0_56 = arith.constant 0 : index
    %c0_57 = arith.constant 0 : index
    %c0_58 = arith.constant 0 : index
    %53 = vector.load %arg2[%c2_55, %c0_56, %c0_57, %c0_58] : memref<3x3x128x128xbf16, #tpu.memory_space<vmem>>, vector<1x1x128x128xbf16>
    %54 = vector.shape_cast %53 : vector<1x1x128x128xbf16> to vector<128x128xbf16>
    %cst_59 = arith.constant dense<0.000000e+00> : vector<256x128xf32>
    %55 = tpu.matmul %52, %54, %cst_59 {dimension_numbers = #tpu.dot_dimension_numbers<[1], [0], [0], [1], [0, 0, 1, 1], [], []>} : vector<256x128xbf16>, vector<128x128xbf16>, vector<256x128xf32> -> vector<256x128xf32>
    %56 = arith.addf %48, %55 : vector<256x128xf32>
    %c0_60 = arith.constant 0 : index
    %c2_61 = arith.constant 2 : index
    %c1_62 = arith.constant 1 : index
    %c0_63 = arith.constant 0 : index
    %57 = vector.load %arg1[%c0_60, %c2_61, %c1_62, %c0_63] : memref<1x18x24x128xf32, #tpu.memory_space<vmem>>, vector<1x16x16x128xf32>
    %58 = vector.shape_cast %57 : vector<1x16x16x128xf32> to vector<16x16x128xf32>
    %59 = vector.shape_cast %58 : vector<16x16x128xf32> to vector<256x128xf32>
    %60 = arith.truncf %59 : vector<256x128xf32> to vector<256x128xbf16>
    %c2_64 = arith.constant 2 : index
    %c1_65 = arith.constant 1 : index
    %c0_66 = arith.constant 0 : index
    %c0_67 = arith.constant 0 : index
    %61 = vector.load %arg2[%c2_64, %c1_65, %c0_66, %c0_67] : memref<3x3x128x128xbf16, #tpu.memory_space<vmem>>, vector<1x1x128x128xbf16>
    %62 = vector.shape_cast %61 : vector<1x1x128x128xbf16> to vector<128x128xbf16>
    %cst_68 = arith.constant dense<0.000000e+00> : vector<256x128xf32>
    %63 = tpu.matmul %60, %62, %cst_68 {dimension_numbers = #tpu.dot_dimension_numbers<[1], [0], [0], [1], [0, 0, 1, 1], [], []>} : vector<256x128xbf16>, vector<128x128xbf16>, vector<256x128xf32> -> vector<256x128xf32>
    %64 = arith.addf %56, %63 : vector<256x128xf32>
    %c0_69 = arith.constant 0 : index
    %c2_70 = arith.constant 2 : index
    %c2_71 = arith.constant 2 : index
    %c0_72 = arith.constant 0 : index
    %65 = vector.load %arg1[%c0_69, %c2_70, %c2_71, %c0_72] : memref<1x18x24x128xf32, #tpu.memory_space<vmem>>, vector<1x16x16x128xf32>
    %66 = vector.shape_cast %65 : vector<1x16x16x128xf32> to vector<16x16x128xf32>
    %67 = vector.shape_cast %66 : vector<16x16x128xf32> to vector<256x128xf32>
    %68 = arith.truncf %67 : vector<256x128xf32> to vector<256x128xbf16>
    %c2_73 = arith.constant 2 : index
    %c2_74 = arith.constant 2 : index
    %c0_75 = arith.constant 0 : index
    %c0_76 = arith.constant 0 : index
    %69 = vector.load %arg2[%c2_73, %c2_74, %c0_75, %c0_76] : memref<3x3x128x128xbf16, #tpu.memory_space<vmem>>, vector<1x1x128x128xbf16>
    %70 = vector.shape_cast %69 : vector<1x1x128x128xbf16> to vector<128x128xbf16>
    %cst_77 = arith.constant dense<0.000000e+00> : vector<256x128xf32>
    %71 = tpu.matmul %68, %70, %cst_77 {dimension_numbers = #tpu.dot_dimension_numbers<[1], [0], [0], [1], [0, 0, 1, 1], [], []>} : vector<256x128xbf16>, vector<128x128xbf16>, vector<256x128xf32> -> vector<256x128xf32>
    %72 = arith.addf %64, %71 : vector<256x128xf32>
    %73 = vector.shape_cast %72 : vector<256x128xf32> to vector<16x16x128xf32>
    %c0_78 = arith.constant 0 : index
    %c0_79 = arith.constant 0 : index
    %c0_80 = arith.constant 0 : index
    %c0_81 = arith.constant 0 : index
    %74 = vector.load %arg3[%c0_78, %c0_79, %c0_80, %c0_81] : memref<1x16x16x128xf32, #tpu.memory_space<vmem>>, vector<1x16x16x128xf32>
    %75 = vector.shape_cast %74 : vector<1x16x16x128xf32> to vector<16x16x128xf32>
    %76 = vector.shape_cast %73 : vector<16x16x128xf32> to vector<1x16x16x128xf32>
    tpu.vector_store %arg3[%c0_78, %c0_79, %c0_80, %c0_81], %76 {strides = array<i32>} : memref<1x16x16x128xf32, #tpu.memory_space<vmem>>, vector<1x16x16x128xf32>,
    %cst_82 = arith.constant dense<0.000000e+00> : vector<128xf32>
    %77 = vector.multi_reduction <add>, %72, %cst_82 [0] : vector<256x128xf32> to vector<128xf32>
    %78 = vector.shape_cast %77 : vector<128xf32> to vector<1x128xf32>
    %79 = arith.mulf %72, %72 : vector<256x128xf32>
    %cst_83 = arith.constant dense<0.000000e+00> : vector<128xf32>
    %80 = vector.multi_reduction <add>, %79, %cst_83 [0] : vector<256x128xf32> to vector<128xf32>
    %81 = vector.shape_cast %80 : vector<128xf32> to vector<1x128xf32>
    %cst_84 = arith.constant 0.000000e+00 : f32
    %82 = vector.broadcast %cst_84 : f32 to vector<6x128xf32>
    %83 = tpu.concatenate %78, %81, %82 in 0 : vector<1x128xf32>, vector<1x128xf32>, vector<6x128xf32> -> vector<8x128xf32>
    %c0_85 = arith.constant 0 : index
    %c0_86 = arith.constant 0 : index
    %c0_87 = arith.constant 0 : index
    %84 = vector.load %arg4[%c0_85, %c0_86, %c0_87] : memref<1x8x128xf32, #tpu.memory_space<vmem>>, vector<1x8x128xf32>
    %85 = vector.shape_cast %84 : vector<1x8x128xf32> to vector<8x128xf32>
    %86 = vector.shape_cast %83 : vector<8x128xf32> to vector<1x8x128xf32>
    tpu.vector_store %arg4[%c0_85, %c0_86, %c0_87], %86 {strides = array<i32>} : memref<1x8x128xf32, #tpu.memory_space<vmem>>, vector<1x8x128xf32>,
    return
  }
  func.func @transform_0(%arg0: i32) -> (i32, i32, i32, i32) {
    %c0_i32 = arith.constant 0 : i32
    %c0_i32_0 = arith.constant 0 : i32
    %c0_i32_1 = arith.constant 0 : i32
    %c0_i32_2 = arith.constant 0 : i32
    return %arg0, %c0_i32, %c0_i32_0, %c0_i32_1 : i32, i32, i32, i32
  }
  func.func @transform_1(%arg0: i32) -> (i32, i32, i32, i32) {
    %c0_i32 = arith.constant 0 : i32
    %c0_i32_0 = arith.constant 0 : i32
    %c0_i32_1 = arith.constant 0 : i32
    %c0_i32_2 = arith.constant 0 : i32
    %c0_i32_3 = arith.constant 0 : i32
    return %c0_i32, %c0_i32_0, %c0_i32_1, %c0_i32_2 : i32, i32, i32, i32
  }
  func.func @transform_2(%arg0: i32) -> (i32, i32, i32, i32) {
    %c0_i32 = arith.constant 0 : i32
    %c0_i32_0 = arith.constant 0 : i32
    %c0_i32_1 = arith.constant 0 : i32
    %c0_i32_2 = arith.constant 0 : i32
    return %arg0, %c0_i32, %c0_i32_0, %c0_i32_1 : i32, i32, i32, i32
  }
  func.func @transform_3(%arg0: i32) -> (i32, i32, i32) {
    %c0_i32 = arith.constant 0 : i32
    %c0_i32_0 = arith.constant 0 : i32
    %c0_i32_1 = arith.constant 0 : i32
    return %arg0, %c0_i32, %c0_i32_0 : i32, i32, i32
  }
}

module attributes {stable_mosaic.version = 11 : i64} {
  func.func @_bn_relu_conv_stats_kernel(%arg0: i32, %arg1: memref<1x16x16x128xf32, #tpu.memory_space<vmem>>, %arg2: memref<1x128xf32, #tpu.memory_space<vmem>>, %arg3: memref<1x128xf32, #tpu.memory_space<vmem>>, %arg4: memref<3x3x128x128xbf16, #tpu.memory_space<vmem>>, %arg5: memref<1x16x16x128xf32, #tpu.memory_space<vmem>>, %arg6: memref<1x8x128xf32, #tpu.memory_space<vmem>>, %arg7: memref<18x24x128xf32, #tpu.memory_space<vmem>>) attributes {dimension_semantics = [#tpu.dimension_semantics<parallel>], iteration_bounds = array<i64: 2>, scalar_prefetch = 0 : i64, scratch_operands = 1 : i64, tpu.core_type = #tpu.core_type<tc>, window_params = [{transform_indices = @transform_0, window_bounds = array<i64: 1, 16, 16, 128>}, {pipeline_mode = #tpu.pipeline_mode<synchronous>, transform_indices = @transform_1, window_bounds = array<i64: 1, 128>}, {pipeline_mode = #tpu.pipeline_mode<synchronous>, transform_indices = @transform_2, window_bounds = array<i64: 1, 128>}, {pipeline_mode = #tpu.pipeline_mode<synchronous>, transform_indices = @transform_3, window_bounds = array<i64: 3, 3, 128, 128>}, {transform_indices = @transform_4, window_bounds = array<i64: 1, 16, 16, 128>}, {transform_indices = @transform_5, window_bounds = array<i64: 1, 8, 128>}]} {
    %c0 = arith.constant 0 : index
    %c0_0 = arith.constant 0 : index
    %c0_1 = arith.constant 0 : index
    %c0_2 = arith.constant 0 : index
    %0 = vector.load %arg1[%c0, %c0_0, %c0_1, %c0_2] : memref<1x16x16x128xf32, #tpu.memory_space<vmem>>, vector<1x16x16x128xf32>
    %1 = vector.shape_cast %0 : vector<1x16x16x128xf32> to vector<16x16x128xf32>
    %c0_3 = arith.constant 0 : index
    %c0_4 = arith.constant 0 : index
    %2 = vector.load %arg2[%c0_3, %c0_4] : memref<1x128xf32, #tpu.memory_space<vmem>>, vector<1x128xf32>
    %3 = vector.shape_cast %2 : vector<1x128xf32> to vector<1x1x128xf32>
    %4 = vector.broadcast %3 : vector<1x1x128xf32> to vector<16x16x128xf32>
    %5 = arith.mulf %1, %4 : vector<16x16x128xf32>
    %c0_5 = arith.constant 0 : index
    %c0_6 = arith.constant 0 : index
    %6 = vector.load %arg3[%c0_5, %c0_6] : memref<1x128xf32, #tpu.memory_space<vmem>>, vector<1x128xf32>
    %7 = vector.shape_cast %6 : vector<1x128xf32> to vector<1x1x128xf32>
    %8 = vector.broadcast %7 : vector<1x1x128xf32> to vector<16x16x128xf32>
    %9 = arith.addf %5, %8 : vector<16x16x128xf32>
    %cst = arith.constant 0.000000e+00 : f32
    %10 = vector.broadcast %cst : f32 to vector<16x16x128xf32>
    %11 = arith.maximumf %9, %10 : vector<16x16x128xf32>
    %cst_7 = arith.constant 0.000000e+00 : f32
    %12 = vector.broadcast %cst_7 : f32 to vector<18x24x128xf32>
    %c0_8 = arith.constant 0 : index
    %c0_9 = arith.constant 0 : index
    %c0_10 = arith.constant 0 : index
    %13 = vector.load %arg7[%c0_8, %c0_9, %c0_10] : memref<18x24x128xf32, #tpu.memory_space<vmem>>, vector<18x24x128xf32>
    tpu.vector_store %arg7[%c0_8, %c0_9, %c0_10], %12 {strides = array<i32>} : memref<18x24x128xf32, #tpu.memory_space<vmem>>, vector<18x24x128xf32>,
    %c1 = arith.constant 1 : index
    %c1_11 = arith.constant 1 : index
    %c0_12 = arith.constant 0 : index
    %14 = vector.load %arg7[%c1, %c1_11, %c0_12] : memref<18x24x128xf32, #tpu.memory_space<vmem>>, vector<16x16x128xf32>
    tpu.vector_store %arg7[%c1, %c1_11, %c0_12], %11 {strides = array<i32>} : memref<18x24x128xf32, #tpu.memory_space<vmem>>, vector<16x16x128xf32>,
    %cst_13 = arith.constant 0.000000e+00 : f32
    %15 = vector.broadcast %cst_13 : f32 to vector<256x128xf32>
    %c0_14 = arith.constant 0 : index
    %c0_15 = arith.constant 0 : index
    %c0_16 = arith.constant 0 : index
    %16 = vector.load %arg7[%c0_14, %c0_15, %c0_16] : memref<18x24x128xf32, #tpu.memory_space<vmem>>, vector<16x16x128xf32>
    %17 = vector.shape_cast %16 : vector<16x16x128xf32> to vector<256x128xf32>
    %18 = arith.truncf %17 : vector<256x128xf32> to vector<256x128xbf16>
    %c0_17 = arith.constant 0 : index
    %c0_18 = arith.constant 0 : index
    %c0_19 = arith.constant 0 : index
    %c0_20 = arith.constant 0 : index
    %19 = vector.load %arg4[%c0_17, %c0_18, %c0_19, %c0_20] : memref<3x3x128x128xbf16, #tpu.memory_space<vmem>>, vector<1x1x128x128xbf16>
    %20 = vector.shape_cast %19 : vector<1x1x128x128xbf16> to vector<128x128xbf16>
    %cst_21 = arith.constant dense<0.000000e+00> : vector<256x128xf32>
    %21 = tpu.matmul %18, %20, %cst_21 {dimension_numbers = #tpu.dot_dimension_numbers<[1], [0], [0], [1], [0, 0, 1, 1], [], []>} : vector<256x128xbf16>, vector<128x128xbf16>, vector<256x128xf32> -> vector<256x128xf32>
    %22 = arith.addf %15, %21 : vector<256x128xf32>
    %c0_22 = arith.constant 0 : index
    %c1_23 = arith.constant 1 : index
    %c0_24 = arith.constant 0 : index
    %23 = vector.load %arg7[%c0_22, %c1_23, %c0_24] : memref<18x24x128xf32, #tpu.memory_space<vmem>>, vector<16x16x128xf32>
    %24 = vector.shape_cast %23 : vector<16x16x128xf32> to vector<256x128xf32>
    %25 = arith.truncf %24 : vector<256x128xf32> to vector<256x128xbf16>
    %c0_25 = arith.constant 0 : index
    %c1_26 = arith.constant 1 : index
    %c0_27 = arith.constant 0 : index
    %c0_28 = arith.constant 0 : index
    %26 = vector.load %arg4[%c0_25, %c1_26, %c0_27, %c0_28] : memref<3x3x128x128xbf16, #tpu.memory_space<vmem>>, vector<1x1x128x128xbf16>
    %27 = vector.shape_cast %26 : vector<1x1x128x128xbf16> to vector<128x128xbf16>
    %cst_29 = arith.constant dense<0.000000e+00> : vector<256x128xf32>
    %28 = tpu.matmul %25, %27, %cst_29 {dimension_numbers = #tpu.dot_dimension_numbers<[1], [0], [0], [1], [0, 0, 1, 1], [], []>} : vector<256x128xbf16>, vector<128x128xbf16>, vector<256x128xf32> -> vector<256x128xf32>
    %29 = arith.addf %22, %28 : vector<256x128xf32>
    %c0_30 = arith.constant 0 : index
    %c2 = arith.constant 2 : index
    %c0_31 = arith.constant 0 : index
    %30 = vector.load %arg7[%c0_30, %c2, %c0_31] : memref<18x24x128xf32, #tpu.memory_space<vmem>>, vector<16x16x128xf32>
    %31 = vector.shape_cast %30 : vector<16x16x128xf32> to vector<256x128xf32>
    %32 = arith.truncf %31 : vector<256x128xf32> to vector<256x128xbf16>
    %c0_32 = arith.constant 0 : index
    %c2_33 = arith.constant 2 : index
    %c0_34 = arith.constant 0 : index
    %c0_35 = arith.constant 0 : index
    %33 = vector.load %arg4[%c0_32, %c2_33, %c0_34, %c0_35] : memref<3x3x128x128xbf16, #tpu.memory_space<vmem>>, vector<1x1x128x128xbf16>
    %34 = vector.shape_cast %33 : vector<1x1x128x128xbf16> to vector<128x128xbf16>
    %cst_36 = arith.constant dense<0.000000e+00> : vector<256x128xf32>
    %35 = tpu.matmul %32, %34, %cst_36 {dimension_numbers = #tpu.dot_dimension_numbers<[1], [0], [0], [1], [0, 0, 1, 1], [], []>} : vector<256x128xbf16>, vector<128x128xbf16>, vector<256x128xf32> -> vector<256x128xf32>
    %36 = arith.addf %29, %35 : vector<256x128xf32>
    %c1_37 = arith.constant 1 : index
    %c0_38 = arith.constant 0 : index
    %c0_39 = arith.constant 0 : index
    %37 = vector.load %arg7[%c1_37, %c0_38, %c0_39] : memref<18x24x128xf32, #tpu.memory_space<vmem>>, vector<16x16x128xf32>
    %38 = vector.shape_cast %37 : vector<16x16x128xf32> to vector<256x128xf32>
    %39 = arith.truncf %38 : vector<256x128xf32> to vector<256x128xbf16>
    %c1_40 = arith.constant 1 : index
    %c0_41 = arith.constant 0 : index
    %c0_42 = arith.constant 0 : index
    %c0_43 = arith.constant 0 : index
    %40 = vector.load %arg4[%c1_40, %c0_41, %c0_42, %c0_43] : memref<3x3x128x128xbf16, #tpu.memory_space<vmem>>, vector<1x1x128x128xbf16>
    %41 = vector.shape_cast %40 : vector<1x1x128x128xbf16> to vector<128x128xbf16>
    %cst_44 = arith.constant dense<0.000000e+00> : vector<256x128xf32>
    %42 = tpu.matmul %39, %41, %cst_44 {dimension_numbers = #tpu.dot_dimension_numbers<[1], [0], [0], [1], [0, 0, 1, 1], [], []>} : vector<256x128xbf16>, vector<128x128xbf16>, vector<256x128xf32> -> vector<256x128xf32>
    %43 = arith.addf %36, %42 : vector<256x128xf32>
    %c1_45 = arith.constant 1 : index
    %c1_46 = arith.constant 1 : index
    %c0_47 = arith.constant 0 : index
    %44 = vector.load %arg7[%c1_45, %c1_46, %c0_47] : memref<18x24x128xf32, #tpu.memory_space<vmem>>, vector<16x16x128xf32>
    %45 = vector.shape_cast %44 : vector<16x16x128xf32> to vector<256x128xf32>
    %46 = arith.truncf %45 : vector<256x128xf32> to vector<256x128xbf16>
    %c1_48 = arith.constant 1 : index
    %c1_49 = arith.constant 1 : index
    %c0_50 = arith.constant 0 : index
    %c0_51 = arith.constant 0 : index
    %47 = vector.load %arg4[%c1_48, %c1_49, %c0_50, %c0_51] : memref<3x3x128x128xbf16, #tpu.memory_space<vmem>>, vector<1x1x128x128xbf16>
    %48 = vector.shape_cast %47 : vector<1x1x128x128xbf16> to vector<128x128xbf16>
    %cst_52 = arith.constant dense<0.000000e+00> : vector<256x128xf32>
    %49 = tpu.matmul %46, %48, %cst_52 {dimension_numbers = #tpu.dot_dimension_numbers<[1], [0], [0], [1], [0, 0, 1, 1], [], []>} : vector<256x128xbf16>, vector<128x128xbf16>, vector<256x128xf32> -> vector<256x128xf32>
    %50 = arith.addf %43, %49 : vector<256x128xf32>
    %c1_53 = arith.constant 1 : index
    %c2_54 = arith.constant 2 : index
    %c0_55 = arith.constant 0 : index
    %51 = vector.load %arg7[%c1_53, %c2_54, %c0_55] : memref<18x24x128xf32, #tpu.memory_space<vmem>>, vector<16x16x128xf32>
    %52 = vector.shape_cast %51 : vector<16x16x128xf32> to vector<256x128xf32>
    %53 = arith.truncf %52 : vector<256x128xf32> to vector<256x128xbf16>
    %c1_56 = arith.constant 1 : index
    %c2_57 = arith.constant 2 : index
    %c0_58 = arith.constant 0 : index
    %c0_59 = arith.constant 0 : index
    %54 = vector.load %arg4[%c1_56, %c2_57, %c0_58, %c0_59] : memref<3x3x128x128xbf16, #tpu.memory_space<vmem>>, vector<1x1x128x128xbf16>
    %55 = vector.shape_cast %54 : vector<1x1x128x128xbf16> to vector<128x128xbf16>
    %cst_60 = arith.constant dense<0.000000e+00> : vector<256x128xf32>
    %56 = tpu.matmul %53, %55, %cst_60 {dimension_numbers = #tpu.dot_dimension_numbers<[1], [0], [0], [1], [0, 0, 1, 1], [], []>} : vector<256x128xbf16>, vector<128x128xbf16>, vector<256x128xf32> -> vector<256x128xf32>
    %57 = arith.addf %50, %56 : vector<256x128xf32>
    %c2_61 = arith.constant 2 : index
    %c0_62 = arith.constant 0 : index
    %c0_63 = arith.constant 0 : index
    %58 = vector.load %arg7[%c2_61, %c0_62, %c0_63] : memref<18x24x128xf32, #tpu.memory_space<vmem>>, vector<16x16x128xf32>
    %59 = vector.shape_cast %58 : vector<16x16x128xf32> to vector<256x128xf32>
    %60 = arith.truncf %59 : vector<256x128xf32> to vector<256x128xbf16>
    %c2_64 = arith.constant 2 : index
    %c0_65 = arith.constant 0 : index
    %c0_66 = arith.constant 0 : index
    %c0_67 = arith.constant 0 : index
    %61 = vector.load %arg4[%c2_64, %c0_65, %c0_66, %c0_67] : memref<3x3x128x128xbf16, #tpu.memory_space<vmem>>, vector<1x1x128x128xbf16>
    %62 = vector.shape_cast %61 : vector<1x1x128x128xbf16> to vector<128x128xbf16>
    %cst_68 = arith.constant dense<0.000000e+00> : vector<256x128xf32>
    %63 = tpu.matmul %60, %62, %cst_68 {dimension_numbers = #tpu.dot_dimension_numbers<[1], [0], [0], [1], [0, 0, 1, 1], [], []>} : vector<256x128xbf16>, vector<128x128xbf16>, vector<256x128xf32> -> vector<256x128xf32>
    %64 = arith.addf %57, %63 : vector<256x128xf32>
    %c2_69 = arith.constant 2 : index
    %c1_70 = arith.constant 1 : index
    %c0_71 = arith.constant 0 : index
    %65 = vector.load %arg7[%c2_69, %c1_70, %c0_71] : memref<18x24x128xf32, #tpu.memory_space<vmem>>, vector<16x16x128xf32>
    %66 = vector.shape_cast %65 : vector<16x16x128xf32> to vector<256x128xf32>
    %67 = arith.truncf %66 : vector<256x128xf32> to vector<256x128xbf16>
    %c2_72 = arith.constant 2 : index
    %c1_73 = arith.constant 1 : index
    %c0_74 = arith.constant 0 : index
    %c0_75 = arith.constant 0 : index
    %68 = vector.load %arg4[%c2_72, %c1_73, %c0_74, %c0_75] : memref<3x3x128x128xbf16, #tpu.memory_space<vmem>>, vector<1x1x128x128xbf16>
    %69 = vector.shape_cast %68 : vector<1x1x128x128xbf16> to vector<128x128xbf16>
    %cst_76 = arith.constant dense<0.000000e+00> : vector<256x128xf32>
    %70 = tpu.matmul %67, %69, %cst_76 {dimension_numbers = #tpu.dot_dimension_numbers<[1], [0], [0], [1], [0, 0, 1, 1], [], []>} : vector<256x128xbf16>, vector<128x128xbf16>, vector<256x128xf32> -> vector<256x128xf32>
    %71 = arith.addf %64, %70 : vector<256x128xf32>
    %c2_77 = arith.constant 2 : index
    %c2_78 = arith.constant 2 : index
    %c0_79 = arith.constant 0 : index
    %72 = vector.load %arg7[%c2_77, %c2_78, %c0_79] : memref<18x24x128xf32, #tpu.memory_space<vmem>>, vector<16x16x128xf32>
    %73 = vector.shape_cast %72 : vector<16x16x128xf32> to vector<256x128xf32>
    %74 = arith.truncf %73 : vector<256x128xf32> to vector<256x128xbf16>
    %c2_80 = arith.constant 2 : index
    %c2_81 = arith.constant 2 : index
    %c0_82 = arith.constant 0 : index
    %c0_83 = arith.constant 0 : index
    %75 = vector.load %arg4[%c2_80, %c2_81, %c0_82, %c0_83] : memref<3x3x128x128xbf16, #tpu.memory_space<vmem>>, vector<1x1x128x128xbf16>
    %76 = vector.shape_cast %75 : vector<1x1x128x128xbf16> to vector<128x128xbf16>
    %cst_84 = arith.constant dense<0.000000e+00> : vector<256x128xf32>
    %77 = tpu.matmul %74, %76, %cst_84 {dimension_numbers = #tpu.dot_dimension_numbers<[1], [0], [0], [1], [0, 0, 1, 1], [], []>} : vector<256x128xbf16>, vector<128x128xbf16>, vector<256x128xf32> -> vector<256x128xf32>
    %78 = arith.addf %71, %77 : vector<256x128xf32>
    %79 = vector.shape_cast %78 : vector<256x128xf32> to vector<16x16x128xf32>
    %c0_85 = arith.constant 0 : index
    %c0_86 = arith.constant 0 : index
    %c0_87 = arith.constant 0 : index
    %c0_88 = arith.constant 0 : index
    %80 = vector.load %arg5[%c0_85, %c0_86, %c0_87, %c0_88] : memref<1x16x16x128xf32, #tpu.memory_space<vmem>>, vector<1x16x16x128xf32>
    %81 = vector.shape_cast %80 : vector<1x16x16x128xf32> to vector<16x16x128xf32>
    %82 = vector.shape_cast %79 : vector<16x16x128xf32> to vector<1x16x16x128xf32>
    tpu.vector_store %arg5[%c0_85, %c0_86, %c0_87, %c0_88], %82 {strides = array<i32>} : memref<1x16x16x128xf32, #tpu.memory_space<vmem>>, vector<1x16x16x128xf32>,
    %cst_89 = arith.constant dense<0.000000e+00> : vector<128xf32>
    %83 = vector.multi_reduction <add>, %78, %cst_89 [0] : vector<256x128xf32> to vector<128xf32>
    %84 = vector.shape_cast %83 : vector<128xf32> to vector<1x128xf32>
    %85 = arith.mulf %78, %78 : vector<256x128xf32>
    %cst_90 = arith.constant dense<0.000000e+00> : vector<128xf32>
    %86 = vector.multi_reduction <add>, %85, %cst_90 [0] : vector<256x128xf32> to vector<128xf32>
    %87 = vector.shape_cast %86 : vector<128xf32> to vector<1x128xf32>
    %cst_91 = arith.constant 0.000000e+00 : f32
    %88 = vector.broadcast %cst_91 : f32 to vector<6x128xf32>
    %89 = tpu.concatenate %84, %87, %88 in 0 : vector<1x128xf32>, vector<1x128xf32>, vector<6x128xf32> -> vector<8x128xf32>
    %c0_92 = arith.constant 0 : index
    %c0_93 = arith.constant 0 : index
    %c0_94 = arith.constant 0 : index
    %90 = vector.load %arg6[%c0_92, %c0_93, %c0_94] : memref<1x8x128xf32, #tpu.memory_space<vmem>>, vector<1x8x128xf32>
    %91 = vector.shape_cast %90 : vector<1x8x128xf32> to vector<8x128xf32>
    %92 = vector.shape_cast %89 : vector<8x128xf32> to vector<1x8x128xf32>
    tpu.vector_store %arg6[%c0_92, %c0_93, %c0_94], %92 {strides = array<i32>} : memref<1x8x128xf32, #tpu.memory_space<vmem>>, vector<1x8x128xf32>,
    return
  }
  func.func @transform_0(%arg0: i32) -> (i32, i32, i32, i32) {
    %c0_i32 = arith.constant 0 : i32
    %c0_i32_0 = arith.constant 0 : i32
    %c0_i32_1 = arith.constant 0 : i32
    %c0_i32_2 = arith.constant 0 : i32
    return %arg0, %c0_i32, %c0_i32_0, %c0_i32_1 : i32, i32, i32, i32
  }
  func.func @transform_1(%arg0: i32) -> (i32, i32) {
    %c0_i32 = arith.constant 0 : i32
    %c0_i32_0 = arith.constant 0 : i32
    %c0_i32_1 = arith.constant 0 : i32
    return %c0_i32, %c0_i32_0 : i32, i32
  }
  func.func @transform_2(%arg0: i32) -> (i32, i32) {
    %c0_i32 = arith.constant 0 : i32
    %c0_i32_0 = arith.constant 0 : i32
    %c0_i32_1 = arith.constant 0 : i32
    return %c0_i32, %c0_i32_0 : i32, i32
  }
  func.func @transform_3(%arg0: i32) -> (i32, i32, i32, i32) {
    %c0_i32 = arith.constant 0 : i32
    %c0_i32_0 = arith.constant 0 : i32
    %c0_i32_1 = arith.constant 0 : i32
    %c0_i32_2 = arith.constant 0 : i32
    %c0_i32_3 = arith.constant 0 : i32
    return %c0_i32, %c0_i32_0, %c0_i32_1, %c0_i32_2 : i32, i32, i32, i32
  }
  func.func @transform_4(%arg0: i32) -> (i32, i32, i32, i32) {
    %c0_i32 = arith.constant 0 : i32
    %c0_i32_0 = arith.constant 0 : i32
    %c0_i32_1 = arith.constant 0 : i32
    %c0_i32_2 = arith.constant 0 : i32
    return %arg0, %c0_i32, %c0_i32_0, %c0_i32_1 : i32, i32, i32, i32
  }
  func.func @transform_5(%arg0: i32) -> (i32, i32, i32) {
    %c0_i32 = arith.constant 0 : i32
    %c0_i32_0 = arith.constant 0 : i32
    %c0_i32_1 = arith.constant 0 : i32
    return %arg0, %c0_i32, %c0_i32_0 : i32, i32, i32
  }
}

module attributes {stable_mosaic.version = 11 : i64} {
  func.func @_bn_relu_pool_kernel(%arg0: i32, %arg1: memref<1x16x16x128xf32, #tpu.memory_space<vmem>>, %arg2: memref<1x128xf32, #tpu.memory_space<vmem>>, %arg3: memref<1x128xf32, #tpu.memory_space<vmem>>, %arg4: memref<1x16x16x128xf32, #tpu.memory_space<vmem>>, %arg5: memref<1x8x8x128xf32, #tpu.memory_space<vmem>>) attributes {dimension_semantics = [#tpu.dimension_semantics<parallel>], iteration_bounds = array<i64: 2>, scalar_prefetch = 0 : i64, scratch_operands = 0 : i64, tpu.core_type = #tpu.core_type<tc>, window_params = [{transform_indices = @transform_0, window_bounds = array<i64: 1, 16, 16, 128>}, {pipeline_mode = #tpu.pipeline_mode<synchronous>, transform_indices = @transform_1, window_bounds = array<i64: 1, 128>}, {pipeline_mode = #tpu.pipeline_mode<synchronous>, transform_indices = @transform_2, window_bounds = array<i64: 1, 128>}, {transform_indices = @transform_3, window_bounds = array<i64: 1, 16, 16, 128>}, {transform_indices = @transform_4, window_bounds = array<i64: 1, 8, 8, 128>}]} {
    %c0 = arith.constant 0 : index
    %c0_0 = arith.constant 0 : index
    %c0_1 = arith.constant 0 : index
    %c0_2 = arith.constant 0 : index
    %0 = vector.load %arg1[%c0, %c0_0, %c0_1, %c0_2] : memref<1x16x16x128xf32, #tpu.memory_space<vmem>>, vector<1x16x16x128xf32>
    %1 = vector.shape_cast %0 : vector<1x16x16x128xf32> to vector<16x16x128xf32>
    %c0_3 = arith.constant 0 : index
    %c0_4 = arith.constant 0 : index
    %2 = vector.load %arg2[%c0_3, %c0_4] : memref<1x128xf32, #tpu.memory_space<vmem>>, vector<1x128xf32>
    %3 = vector.shape_cast %2 : vector<1x128xf32> to vector<1x1x128xf32>
    %4 = vector.broadcast %3 : vector<1x1x128xf32> to vector<16x16x128xf32>
    %5 = arith.mulf %1, %4 : vector<16x16x128xf32>
    %c0_5 = arith.constant 0 : index
    %c0_6 = arith.constant 0 : index
    %6 = vector.load %arg3[%c0_5, %c0_6] : memref<1x128xf32, #tpu.memory_space<vmem>>, vector<1x128xf32>
    %7 = vector.shape_cast %6 : vector<1x128xf32> to vector<1x1x128xf32>
    %8 = vector.broadcast %7 : vector<1x1x128xf32> to vector<16x16x128xf32>
    %9 = arith.addf %5, %8 : vector<16x16x128xf32>
    %cst = arith.constant 0.000000e+00 : f32
    %10 = vector.broadcast %cst : f32 to vector<16x16x128xf32>
    %11 = arith.maximumf %9, %10 : vector<16x16x128xf32>
    %c0_7 = arith.constant 0 : index
    %c0_8 = arith.constant 0 : index
    %c0_9 = arith.constant 0 : index
    %c0_10 = arith.constant 0 : index
    %12 = vector.load %arg4[%c0_7, %c0_8, %c0_9, %c0_10] : memref<1x16x16x128xf32, #tpu.memory_space<vmem>>, vector<1x16x16x128xf32>
    %13 = vector.shape_cast %12 : vector<1x16x16x128xf32> to vector<16x16x128xf32>
    %14 = vector.shape_cast %11 : vector<16x16x128xf32> to vector<1x16x16x128xf32>
    tpu.vector_store %arg4[%c0_7, %c0_8, %c0_9, %c0_10], %14 {strides = array<i32>} : memref<1x16x16x128xf32, #tpu.memory_space<vmem>>, vector<1x16x16x128xf32>,
    %15 = vector.shape_cast %11 : vector<16x16x128xf32> to vector<8x2x16x128xf32>
    %cst_11 = arith.constant dense<0xFF800000> : vector<8x16x128xf32>
    %16 = vector.multi_reduction <maximumf>, %15, %cst_11 [1] : vector<8x2x16x128xf32> to vector<8x16x128xf32>
    %17 = vector.extract_strided_slice %16 {offsets = [0, 0, 0], sizes = [8, 2, 128], strides = [1, 1, 1]} : vector<8x16x128xf32> to vector<8x2x128xf32>
    %cst_12 = arith.constant dense<0xFF800000> : vector<8x128xf32>
    %18 = vector.multi_reduction <maximumf>, %17, %cst_12 [1] : vector<8x2x128xf32> to vector<8x128xf32>
    %19 = vector.shape_cast %18 : vector<8x128xf32> to vector<8x1x128xf32>
    %20 = vector.extract_strided_slice %16 {offsets = [0, 2, 0], sizes = [8, 2, 128], strides = [1, 1, 1]} : vector<8x16x128xf32> to vector<8x2x128xf32>
    %cst_13 = arith.constant dense<0xFF800000> : vector<8x128xf32>
    %21 = vector.multi_reduction <maximumf>, %20, %cst_13 [1] : vector<8x2x128xf32> to vector<8x128xf32>
    %22 = vector.shape_cast %21 : vector<8x128xf32> to vector<8x1x128xf32>
    %23 = vector.extract_strided_slice %16 {offsets = [0, 4, 0], sizes = [8, 2, 128], strides = [1, 1, 1]} : vector<8x16x128xf32> to vector<8x2x128xf32>
    %cst_14 = arith.constant dense<0xFF800000> : vector<8x128xf32>
    %24 = vector.multi_reduction <maximumf>, %23, %cst_14 [1] : vector<8x2x128xf32> to vector<8x128xf32>
    %25 = vector.shape_cast %24 : vector<8x128xf32> to vector<8x1x128xf32>
    %26 = vector.extract_strided_slice %16 {offsets = [0, 6, 0], sizes = [8, 2, 128], strides = [1, 1, 1]} : vector<8x16x128xf32> to vector<8x2x128xf32>
    %cst_15 = arith.constant dense<0xFF800000> : vector<8x128xf32>
    %27 = vector.multi_reduction <maximumf>, %26, %cst_15 [1] : vector<8x2x128xf32> to vector<8x128xf32>
    %28 = vector.shape_cast %27 : vector<8x128xf32> to vector<8x1x128xf32>
    %29 = vector.extract_strided_slice %16 {offsets = [0, 8, 0], sizes = [8, 2, 128], strides = [1, 1, 1]} : vector<8x16x128xf32> to vector<8x2x128xf32>
    %cst_16 = arith.constant dense<0xFF800000> : vector<8x128xf32>
    %30 = vector.multi_reduction <maximumf>, %29, %cst_16 [1] : vector<8x2x128xf32> to vector<8x128xf32>
    %31 = vector.shape_cast %30 : vector<8x128xf32> to vector<8x1x128xf32>
    %32 = vector.extract_strided_slice %16 {offsets = [0, 10, 0], sizes = [8, 2, 128], strides = [1, 1, 1]} : vector<8x16x128xf32> to vector<8x2x128xf32>
    %cst_17 = arith.constant dense<0xFF800000> : vector<8x128xf32>
    %33 = vector.multi_reduction <maximumf>, %32, %cst_17 [1] : vector<8x2x128xf32> to vector<8x128xf32>
    %34 = vector.shape_cast %33 : vector<8x128xf32> to vector<8x1x128xf32>
    %35 = vector.extract_strided_slice %16 {offsets = [0, 12, 0], sizes = [8, 2, 128], strides = [1, 1, 1]} : vector<8x16x128xf32> to vector<8x2x128xf32>
    %cst_18 = arith.constant dense<0xFF800000> : vector<8x128xf32>
    %36 = vector.multi_reduction <maximumf>, %35, %cst_18 [1] : vector<8x2x128xf32> to vector<8x128xf32>
    %37 = vector.shape_cast %36 : vector<8x128xf32> to vector<8x1x128xf32>
    %38 = vector.extract_strided_slice %16 {offsets = [0, 14, 0], sizes = [8, 2, 128], strides = [1, 1, 1]} : vector<8x16x128xf32> to vector<8x2x128xf32>
    %cst_19 = arith.constant dense<0xFF800000> : vector<8x128xf32>
    %39 = vector.multi_reduction <maximumf>, %38, %cst_19 [1] : vector<8x2x128xf32> to vector<8x128xf32>
    %40 = vector.shape_cast %39 : vector<8x128xf32> to vector<8x1x128xf32>
    %41 = tpu.concatenate %19, %22, %25, %28, %31, %34, %37, %40 in 1 : vector<8x1x128xf32>, vector<8x1x128xf32>, vector<8x1x128xf32>, vector<8x1x128xf32>, vector<8x1x128xf32>, vector<8x1x128xf32>, vector<8x1x128xf32>, vector<8x1x128xf32> -> vector<8x8x128xf32>
    %c0_20 = arith.constant 0 : index
    %c0_21 = arith.constant 0 : index
    %c0_22 = arith.constant 0 : index
    %c0_23 = arith.constant 0 : index
    %42 = vector.load %arg5[%c0_20, %c0_21, %c0_22, %c0_23] : memref<1x8x8x128xf32, #tpu.memory_space<vmem>>, vector<1x8x8x128xf32>
    %43 = vector.shape_cast %42 : vector<1x8x8x128xf32> to vector<8x8x128xf32>
    %44 = vector.shape_cast %41 : vector<8x8x128xf32> to vector<1x8x8x128xf32>
    tpu.vector_store %arg5[%c0_20, %c0_21, %c0_22, %c0_23], %44 {strides = array<i32>} : memref<1x8x8x128xf32, #tpu.memory_space<vmem>>, vector<1x8x8x128xf32>,
    return
  }
  func.func @transform_0(%arg0: i32) -> (i32, i32, i32, i32) {
    %c0_i32 = arith.constant 0 : i32
    %c0_i32_0 = arith.constant 0 : i32
    %c0_i32_1 = arith.constant 0 : i32
    %c0_i32_2 = arith.constant 0 : i32
    return %arg0, %c0_i32, %c0_i32_0, %c0_i32_1 : i32, i32, i32, i32
  }
  func.func @transform_1(%arg0: i32) -> (i32, i32) {
    %c0_i32 = arith.constant 0 : i32
    %c0_i32_0 = arith.constant 0 : i32
    %c0_i32_1 = arith.constant 0 : i32
    return %c0_i32, %c0_i32_0 : i32, i32
  }
  func.func @transform_2(%arg0: i32) -> (i32, i32) {
    %c0_i32 = arith.constant 0 : i32
    %c0_i32_0 = arith.constant 0 : i32
    %c0_i32_1 = arith.constant 0 : i32
    return %c0_i32, %c0_i32_0 : i32, i32
  }
  func.func @transform_3(%arg0: i32) -> (i32, i32, i32, i32) {
    %c0_i32 = arith.constant 0 : i32
    %c0_i32_0 = arith.constant 0 : i32
    %c0_i32_1 = arith.constant 0 : i32
    %c0_i32_2 = arith.constant 0 : i32
    return %arg0, %c0_i32, %c0_i32_0, %c0_i32_1 : i32, i32, i32, i32
  }
  func.func @transform_4(%arg0: i32) -> (i32, i32, i32, i32) {
    %c0_i32 = arith.constant 0 : i32
    %c0_i32_0 = arith.constant 0 : i32
    %c0_i32_1 = arith.constant 0 : i32
    %c0_i32_2 = arith.constant 0 : i32
    return %arg0, %c0_i32, %c0_i32_0, %c0_i32_1 : i32, i32, i32, i32
  }
}

</mosaic_0001>

<bundles_post_ra>
// kernel: upsample_forward.5
= control target key start
LH: loop header
LB: loop body
LE: loop exit
PB: predicated region body
PF: predicated region fallthrough
CT: control target
= control target key end

     0   :  { %s1070_s15 = smov 0   ;;  %s1720_s0 = inlined_call_operand.vmem [shape: f32[2,16,16,128], index: 0, kind: input, shape index: {}]   ;;  %s1721_s1 = inlined_call_operand.vmem [shape: f32[1,128], index: 1, kind: input, shape index: {}]   ;;  %s1722_s2 = inlined_call_operand.vmem [shape: f32[1,128], index: 2, kind: input, shape index: {}]   ;;  %s1723_s3 = inlined_call_operand.vmem [shape: f32[2,16,16,128], index: 3, kind: output, shape index: {0}]   ;;  %s1724_s4 = inlined_call_operand.vmem [shape: f32[2,8,8,128], index: 4, kind: output, shape index: {1}]  }
   0x1 LB: > { %s1011_s16 = sadd.s32 4294967295, %s1043_s15   ;;  %p1015_p0 = scmp.ge.s32.totalorder %s1043_s15, 1  ;;  %s1043_s15 = sphi %s1070_s15, %s15_s15  }
   0x2   : > { %p165_p1 = scmp.lt.s32.totalorder %s1043_s15, 3 }
   0x4   : > { %p166_p2 = pnand %p1015_p0, %p165_p1 }
   0x6   : > { %169 = sbr.rel (%p166_p2) target bundleno = 182 (0xb6), region = 32 }
   0xd   : > { %p196_p3 = scmp.lt.s32.totalorder %s1011_s16, 1  ;;  %v1084_v0 = vld [vmem:[%s1721_s1] ss:$0 sm:$0xff]  ;;  %vm401_vm0 = vcmask 1041408   ;;  %vm458_vm1 = vcmask 1043458   ;;  %vm515_vm2 = vcmask 1045508  }
   0xe   : > { %v1094_v1 = vld [vmem:[%s1722_s2] ss:$0 sm:$0xff]  ;;  %vm572_vm3 = vcmask 1047558   ;;  %vm853_vm4 = vcmask 1040384   ;;  %vm870_vm5 = vcmask 1042432   ;;  %vm879_vm6 = vcmask 1043456  }
   0xf   : > { %s1808_s16 = smov (!%p196_p3, %s1011_s16), 1  ;;  %vm888_vm7 = vcmask 1044480   ;;  %vm897_vm8 = vcmask 1045504   ;;  %vm906_vm9 = vcmask 1046528  }
  0x10   : > { %s1026_s17 = sshll.u32 %s1808_s16, 8  ;;  %s1028_s28 = sshll.u32 %s1808_s16, 6 }
  0x11   : > { %s1089_s22 = scalar_lea.vmem %s1720_s0, %s1026_s17  ;;  %s1117_s27 = scalar_lea.vmem %s1723_s3, %s1026_s17 }
  0x12   : > { %v211_v2 = vld [vmem:[%s1089_s22] sm:$0xff]  ;;  %v212_v3 = vld [vmem:[%s1089_s22 + $0x8] sm:$0xff]  ;;  %v213_v4 = vld [vmem:[%s1089_s22 + $0x10] sm:$0xff]  ;;  %s1563_s5 = scalar_lea.vmem %s1724_s4, %s1028_s28 }
  0x13   : > { %v250_v5 = vmul.f32 %v1084_v0, %v211_v2  ;;  %v251_v6 = vmul.f32 %v1084_v0, %v212_v3  ;;  %v252_v7 = vmul.f32 %v1084_v0, %v213_v4  ;;  %v214_v8 = vld [vmem:[%s1089_s22 + $0x18] sm:$0xff]  ;;  %v215_v9 = vld [vmem:[%s1089_s22 + $0x20] sm:$0xff]  ;;  %v216_v10 = vld [vmem:[%s1089_s22 + $0x28] sm:$0xff] }
  0x14   : > { %v253_v11 = vmul.f32 %v1084_v0, %v214_v8  ;;  %v254_v12 = vmul.f32 %v1084_v0, %v215_v9  ;;  %v255_v13 = vmul.f32 %v1084_v0, %v216_v10  ;;  %v217_v14 = vld [vmem:[%s1089_s22 + $0x30] sm:$0xff]  ;;  %v218_v15 = vld [vmem:[%s1089_s22 + $0x38] sm:$0xff]  ;;  %v219_v24 = vld [vmem:[%s1089_s22 + $0x40] sm:$0xff] }
  0x15   : > { %v289_v16 = vadd.f32 %v1094_v1, %v250_v5  ;;  %v290_v17 = vadd.f32 %v1094_v1, %v251_v6  ;;  %v291_v18 = vadd.f32 %v1094_v1, %v252_v7  ;;  %v256_v19 = vmul.f32 %v1084_v0, %v217_v14  ;;  %v220_v25 = vld [vmem:[%s1089_s22 + $0x48] sm:$0xff]  ;;  %v221_v30 = vld [vmem:[%s1089_s22 + $0x50] sm:$0xff]  ;;  %v222_v31 = vld [vmem:[%s1089_s22 + $0x58] sm:$0xff] }
  0x16   : > { %v292_v20 = vadd.f32 %v1094_v1, %v253_v11  ;;  %v293_v21 = vadd.f32 %v1094_v1, %v254_v12  ;;  %v1122_v22 = vadd.f32 %v1094_v1, %v255_v13  ;;  %v257_v23 = vmul.f32 %v1084_v0, %v218_v15 }
  0x17   : > { %v321_v26 = vmax.f32 %v289_v16, 0.0  ;;  %v322_v27 = vmax.f32 %v290_v17, 0.0  ;;  %v323_v28 = vmax.f32 %v291_v18, 0.0  ;;  %v295_v29 = vadd.f32 %v1094_v1, %v256_v19 }
  0x18   : > { %v324_v32 = vmax.f32 %v292_v20, 0.0  ;;  %v325_v33 = vmax.f32 %v293_v21, 0.0  ;;  %v326_v34 = vmax.f32 %v1122_v22, 0.0  ;;  %v296_v35 = vadd.f32 %v1094_v1, %v257_v23 }
  0x19   : > { %353 = vst [vmem:[%s1117_s27] sm:$0xff] %v321_v26  ;;  %354 = vst [vmem:[%s1117_s27 + $0x8] sm:$0xff] %v322_v27  ;;  %v385_v36 = vmax.f32 %v321_v26, %v323_v28  ;;  %v327_v37 = vmax.f32 %v295_v29, 0.0  ;;  %v1136_v38 = vmul.f32 %v1084_v0, %v219_v24  ;;  %v1139_v39 = vmul.f32 %v1084_v0, %v220_v25 }
  0x1a   : > { %355 = vst [vmem:[%s1117_s27 + $0x10] sm:$0xff] %v323_v28  ;;  %356 = vst [vmem:[%s1117_s27 + $0x18] sm:$0xff] %v324_v32  ;;  %v1142_v40 = vmax.f32 %v322_v27, %v324_v32  ;;  %v328_v41 = vmax.f32 %v296_v35, 0.0  ;;  %v1147_v42 = vmul.f32 %v1084_v0, %v221_v30  ;;  %v1150_v43 = vmul.f32 %v1084_v0, %v222_v31 }
  0x1b   : > { %357 = vst [vmem:[%s1117_s27 + $0x20] sm:$0xff] %v325_v33  ;;  %358 = vst [vmem:[%s1117_s27 + $0x28] sm:$0xff] %v326_v34  ;;  %v402_v44 = vsel %vm401_vm0, %v385_v36, -inf  ;;  %v459_v45 = vsel %vm458_vm1, %v385_v36, -inf  ;;  %v516_v46 = vsel %vm515_vm2, %v385_v36, -inf  ;;  %v573_v47 = vsel %vm572_vm3, %v385_v36, -inf }
  0x1c   : > { %359 = vst [vmem:[%s1117_s27 + $0x30] sm:$0xff] %v327_v37  ;;  %v403_v48 = vrot.slane %v402_v44, 4  ;;  %v460_v49 = vrot.slane %v459_v45, 4  ;;  %v517_v50 = vrot.slane %v516_v46, 4  ;;  %v574_v51 = vrot.slane %v573_v47, 4  ;;  %360 = vst [vmem:[%s1117_s27 + $0x38] sm:$0xff] %v328_v41 }
  0x1d   : > { %v629_v52 = vsel %vm401_vm0, %v1142_v40, -inf  ;;  %v685_v53 = vsel %vm458_vm1, %v1142_v40, -inf  ;;  %v1164_v54 = vsel %vm515_vm2, %v1142_v40, -inf  ;;  %v387_v55 = vmax.f32 %v325_v33, %v327_v37 }
  0x1e   : > { %v404_v56 = vmax.f32 %v402_v44, %v403_v48  ;;  %v461_v57 = vmax.f32 %v459_v45, %v460_v49  ;;  %v518_v58 = vmax.f32 %v516_v46, %v517_v50  ;;  %v575_v59 = vmax.f32 %v573_v47, %v574_v51  ;;  %v223_v51 = vld [vmem:[%s1089_s22 + $0x60] sm:$0xff] }
  0x1f   : > { %v630_v60 = vrot.slane %v629_v52, 4  ;;  %v686_v61 = vrot.slane %v685_v53, 4  ;;  %v409_v63 = vsel %vm401_vm0, %v387_v55, -inf  ;;  %v466_v9 = vsel %vm458_vm1, %v387_v55, -inf }
  0x20   : > { %v405_v2 = vrot.slane %v404_v56, 2  ;;  %v462_v3 = vrot.slane %v461_v57, 2  ;;  %v519_v4 = vrot.slane %v518_v58, 2  ;;  %v576_v5 = vrot.slane %v575_v59, 2 }
  0x21   : > { %v1168_v6 = vmax.f32 %v629_v52, %v630_v60  ;;  %v1170_v7 = vmax.f32 %v685_v53, %v686_v61  ;;  %v410_v8 = vrot.slane %v409_v63, 4  ;;  %v467_v16 = vrot.slane %v466_v9, 4 }
  0x22   : > { %v406_v10 = vmax.f32 %v404_v56, %v405_v2  ;;  %v463_v11 = vmax.f32 %v461_v57, %v462_v3  ;;  %v1173_v12 = vmax.f32 %v518_v58, %v519_v4  ;;  %v1175_v13 = vmax.f32 %v575_v59, %v576_v5  ;;  %v224_v57 = vld [vmem:[%s1089_s22 + $0x68] sm:$0xff]  ;;  %v225_v58 = vld [vmem:[%s1089_s22 + $0x70] sm:$0xff]  ;;  %v227_v2 = vld [vmem:[%s1089_s22 + $0x80] sm:$0xff] }
  0x23   : > { %v411_v15 = vmax.f32 %v409_v63, %v410_v8  ;;  %v523_v17 = vsel %vm515_vm2, %v387_v55, -inf  ;;  %v468_v23 = vmax.f32 %v466_v9, %v467_v16  ;;  %v580_v24 = vsel %vm572_vm3, %v387_v55, -inf  ;;  %v228_v9 = vld [vmem:[%s1089_s22 + $0x88] sm:$0xff] }
  0x24   : > { %v407_v18 = vrot.slane %v406_v10, 1  ;;  %v464_v19 = vrot.slane %v463_v11, 1  ;;  %v524_v21 = vrot.slane %v523_v17, 4  ;;  %v1181_v25 = vmax.f32 %v326_v34, %v328_v41 }
  0x25   : > { %v412_v22 = vrot.slane %v411_v15, 2  ;;  %v581_v29 = vrot.slane %v580_v24, 4  ;;  %v469_v31 = vrot.slane %v468_v23, 2  ;;  %v297_v46 = vadd.f32 %v1094_v1, %v1136_v38  ;;  %v226_v38 = vld [vmem:[%s1089_s22 + $0x78] sm:$0xff] }
  0x26   : > { %v1183_v26 = vmax.f32 %v406_v10, %v407_v18  ;;  %v1185_v27 = vmax.f32 %v463_v11, %v464_v19  ;;  %v525_v28 = vmax.f32 %v523_v17, %v524_v21  ;;  %v636_v32 = vsel %vm401_vm0, %v1181_v25, -inf }
  0x27   : > { %v413_v30 = vmax.f32 %v411_v15, %v412_v22  ;;  %v692_v33 = vsel %vm458_vm1, %v1181_v25, -inf  ;;  %v582_v36 = vmax.f32 %v580_v24, %v581_v29  ;;  %v637_v34 = vrot.slane %v636_v32, 4 }
  0x28   : > { %v526_v35 = vrot.slane %v525_v28, 2  ;;  %v693_v37 = vrot.slane %v692_v33, 4  ;;  %v470_v44 = vmax.f32 %v468_v23, %v469_v31  ;;  %v1193_v45 = vsel %vm515_vm2, %v1181_v25, -inf }
  0x29   : > { %v414_v41 = vrot.slane %v413_v30, 1  ;;  %v583_v48 = vrot.slane %v582_v36, 2  ;;  %v1199_v49 = vmax.f32 %v636_v32, %v637_v34  ;;  %v329_v56 = vmax.f32 %v297_v46, 0.0 }
  0x2a   : > { %v1197_v47 = vmax.f32 %v525_v28, %v526_v35  ;;  %v1201_v50 = vmax.f32 %v692_v33, %v693_v37  ;;  %v471_v53 = vrot.slane %v470_v44, 1  ;;  %v298_v63 = vadd.f32 %v1094_v1, %v1139_v39 }
  0x2b   : > { %v1204_v52 = vmax.f32 %v413_v30, %v414_v41  ;;  %v1211_v60 = vmax.f32 %v582_v36, %v583_v48  ;;  %361 = vst [vmem:[%s1117_s27 + $0x40] sm:$0xff] %v329_v56  ;;  %v299_v4 = vadd.f32 %v1094_v1, %v1147_v42  ;;  %v300_v5 = vadd.f32 %v1094_v1, %v1150_v43 }
  0x2c   : > { %v1217_v3 = vmax.f32 %v470_v44, %v471_v53  ;;  %v262_v8 = vmul.f32 %v1084_v0, %v223_v51  ;;  %v330_v10 = vmax.f32 %v298_v63, 0.0  ;;  %v263_v11 = vmul.f32 %v1084_v0, %v224_v57 }
  0x2d   : > { %v264_v39 = vmul.f32 %v1084_v0, %v225_v58  ;;  %v265_v15 = vmul.f32 %v1084_v0, %v226_v38  ;;  %v331_v16 = vmax.f32 %v299_v4, 0.0  ;;  %v332_v17 = vmax.f32 %v300_v5, 0.0 }
  0x2e   : > { %v301_v18 = vadd.f32 %v1094_v1, %v262_v8  ;;  %v266_v42 = vmul.f32 %v1084_v0, %v227_v2  ;;  %362 = vst [vmem:[%s1117_s27 + $0x48] sm:$0xff] %v330_v10  ;;  %v302_v43 = vadd.f32 %v1094_v1, %v263_v11  ;;  %v267_v22 = vmul.f32 %v1084_v0, %v228_v9 }
  0x2f   : > { %v303_v19 = vadd.f32 %v1094_v1, %v264_v39  ;;  %v304_v21 = vadd.f32 %v1094_v1, %v265_v15  ;;  %363 = vst [vmem:[%s1117_s27 + $0x50] sm:$0xff] %v331_v16  ;;  %v389_v23 = vmax.f32 %v329_v56, %v331_v16  ;;  %364 = vst [vmem:[%s1117_s27 + $0x58] sm:$0xff] %v332_v17 }
  0x30   : > { %v1238_v24 = vmax.f32 %v330_v10, %v332_v17  ;;  %v333_v28 = vmax.f32 %v301_v18, 0.0  ;;  %v1241_v29 = vadd.f32 %v1094_v1, %v266_v42  ;;  %v334_v30 = vmax.f32 %v302_v43, 0.0 }
  0x31   : > { %v335_v31 = vmax.f32 %v303_v19, 0.0  ;;  %v336_v32 = vmax.f32 %v304_v21, 0.0  ;;  %v1244_v33 = vadd.f32 %v1094_v1, %v267_v22  ;;  %v416_v35 = vsel %vm401_vm0, %v389_v23, -inf }
  0x32   : > { %v473_v36 = vsel %vm458_vm1, %v389_v23, -inf  ;;  %v530_v34 = vsel %vm515_vm2, %v389_v23, -inf  ;;  %v587_v37 = vsel %vm572_vm3, %v389_v23, -inf  ;;  %365 = vst [vmem:[%s1117_s27 + $0x60] sm:$0xff] %v333_v28  ;;  %v417_v41 = vrot.slane %v416_v35, 4  ;;  %366 = vst [vmem:[%s1117_s27 + $0x68] sm:$0xff] %v334_v30 }
  0x33   : > { %v474_v44 = vrot.slane %v473_v36, 4  ;;  %v531_v46 = vrot.slane %v530_v34, 4  ;;  %v588_v48 = vrot.slane %v587_v37, 4  ;;  %367 = vst [vmem:[%s1117_s27 + $0x70] sm:$0xff] %v335_v31  ;;  %368 = vst [vmem:[%s1117_s27 + $0x78] sm:$0xff] %v336_v32  ;;  %v643_v51 = vsel %vm401_vm0, %v1238_v24, -inf }
  0x34   : > { %v699_v53 = vsel %vm458_vm1, %v1238_v24, -inf  ;;  %v1260_v56 = vsel %vm515_vm2, %v1238_v24, -inf  ;;  %v391_v57 = vmax.f32 %v333_v28, %v335_v31  ;;  %v418_v58 = vmax.f32 %v416_v35, %v417_v41 }
  0x35   : > { %v475_v38 = vmax.f32 %v473_v36, %v474_v44  ;;  %v532_v63 = vmax.f32 %v530_v34, %v531_v46  ;;  %v589_v2 = vmax.f32 %v587_v37, %v588_v48  ;;  %v644_v4 = vrot.slane %v643_v51, 4 }
  0x36   : > { %v700_v5 = vrot.slane %v699_v53, 4  ;;  %v423_v9 = vsel %vm401_vm0, %v391_v57, -inf  ;;  %v419_v10 = vrot.slane %v418_v58, 2  ;;  %v480_v42 = vsel %vm458_vm1, %v391_v57, -inf }
  0x37   : > { %v476_v11 = vrot.slane %v475_v38, 2  ;;  %v533_v39 = vrot.slane %v532_v63, 2  ;;  %v590_v15 = vrot.slane %v589_v2, 2  ;;  %v1264_v16 = vmax.f32 %v643_v51, %v644_v4 }
  0x38   : > { %v1266_v17 = vmax.f32 %v699_v53, %v700_v5  ;;  %v424_v18 = vrot.slane %v423_v9, 4  ;;  %v420_v43 = vmax.f32 %v418_v58, %v419_v10  ;;  %v481_v31 = vrot.slane %v480_v42, 4 }
  0x39   : > { %v477_v19 = vmax.f32 %v475_v38, %v476_v11  ;;  %v1269_v21 = vmax.f32 %v532_v63, %v533_v39  ;;  %v1271_v22 = vmax.f32 %v589_v2, %v590_v15  ;;  %v537_v35 = vsel %vm515_vm2, %v391_v57, -inf }
  0x3a   : > { %v425_v28 = vmax.f32 %v423_v9, %v424_v18  ;;  %v421_v36 = vrot.slane %v420_v43, 1  ;;  %v538_v41 = vrot.slane %v537_v35, 4  ;;  %v482_v46 = vmax.f32 %v480_v42, %v481_v31  ;;  %v229_v42 = vld [vmem:[%s1089_s22 + $0x90] sm:$0xff] }
  0x3b   : > { %v478_v34 = vrot.slane %v477_v19, 1  ;;  %v594_v48 = vsel %vm572_vm3, %v391_v57, -inf  ;;  %v1277_v51 = vmax.f32 %v334_v30, %v336_v32  ;;  %v337_v18 = vmax.f32 %v1241_v29, 0.0 }
  0x3c   : > { %v426_v44 = vrot.slane %v425_v28, 2  ;;  %v1279_v53 = vmax.f32 %v420_v43, %v421_v36  ;;  %v539_v38 = vmax.f32 %v537_v35, %v538_v41  ;;  %v595_v63 = vrot.slane %v594_v48, 4  ;;  %v230_v35 = vld [vmem:[%s1089_s22 + $0x98] sm:$0xff]  ;;  %v231_v36 = vld [vmem:[%s1089_s22 + $0xa0] sm:$0xff] }
  0x3d   : > { %1745 = vst [vmem:[#allocation2_spill] sm:$0xff] %v1277_v51  ;;  %v1281_v58 = vmax.f32 %v477_v19, %v478_v34  ;;  %v483_v4 = vrot.slane %v482_v46, 2  ;;  %v650_v5 = vsel %vm401_vm0, %v1277_v51, -inf  ;;  %v706_v9 = vsel %vm458_vm1, %v1277_v51, -inf  ;;  %v232_v34 = vld [vmem:[%s1089_s22 + $0xa8] sm:$0xff]  ;;  %369 = vst [vmem:[%s1117_s27 + $0x80] sm:$0xff] %v337_v18 }
  0x3e   : > { %v427_v2 = vmax.f32 %v425_v28, %v426_v44  ;;  %v540_v30 = vrot.slane %v539_v38, 2  ;;  %v596_v32 = vmax.f32 %v594_v48, %v595_v63  ;;  %v651_v57 = vrot.slane %v650_v5, 4  ;;  %v233_v48 = vld [vmem:[%s1089_s22 + $0xb0] sm:$0xff]  ;;  %v235_v63 = vld [vmem:[%s1089_s22 + $0xc0] sm:$0xff] }
  0x3f   : > { %v707_v10 = vrot.slane %v706_v9, 4  ;;  %v484_v39 = vmax.f32 %v482_v46, %v483_v4  ;;  %v1289_v15 = vsel %vm515_vm2, %v1277_v51, -inf  ;;  %v338_v29 = vmax.f32 %v1244_v33, 0.0 }
  0x40   : > { %v428_v11 = vrot.slane %v427_v2, 1  ;;  %1746 = vst [vmem:[#allocation3_spill] sm:$0xff] %v1289_v15  ;;  %v1293_v43 = vmax.f32 %v539_v38, %v540_v30  ;;  %v597_v19 = vrot.slane %v596_v32, 2  ;;  %v1295_v28 = vmax.f32 %v650_v5, %v651_v57  ;;  %v234_v38 = vld [vmem:[%s1089_s22 + $0xb8] sm:$0xff]  ;;  %v236_v57 = vld [vmem:[%s1089_s22 + $0xc8] sm:$0xff] }
  0x41   : > { %v1297_v31 = vmax.f32 %v706_v9, %v707_v10  ;;  %v485_v44 = vrot.slane %v484_v39, 1  ;;  %v268_v30 = vmul.f32 %v1084_v0, %v229_v42  ;;  %370 = vst [vmem:[%s1117_s27 + $0x88] sm:$0xff] %v338_v29  ;;  %v269_v10 = vmul.f32 %v1084_v0, %v230_v35 }
  0x42   : > { %v1302_v41 = vmax.f32 %v427_v2, %v428_v11  ;;  %v1311_v5 = vmax.f32 %v596_v32, %v597_v19  ;;  %v270_v33 = vmul.f32 %v1084_v0, %v231_v36  ;;  %v271_v11 = vmul.f32 %v1084_v0, %v232_v34 }
  0x43   : > { %1747 = vst [vmem:[#allocation4_spill] sm:$0xff] %v1297_v31  ;;  %v1316_v2 = vmax.f32 %v484_v39, %v485_v44  ;;  %v307_v46 = vadd.f32 %v1094_v1, %v268_v30  ;;  %v272_v32 = vmul.f32 %v1084_v0, %v233_v48  ;;  %v273_v19 = vmul.f32 %v1084_v0, %v234_v38 }
  0x44   : > { %1748 = vst [vmem:[#allocation5_spill] sm:$0xff] %v1302_v41  ;;  %v274_v42 = vmul.f32 %v1084_v0, %v235_v63  ;;  %v308_v39 = vadd.f32 %v1094_v1, %v269_v10  ;;  %v309_v44 = vadd.f32 %v1094_v1, %v270_v33  ;;  %v1329_v35 = vadd.f32 %v1094_v1, %v271_v11  ;;  %v237_v63 = vld [vmem:[%s1089_s22 + $0xd0] sm:$0xff]  ;;  %v238_v10 = vld [vmem:[%s1089_s22 + $0xd8] sm:$0xff] }
  0x45   : > { %1749 = vst [vmem:[#allocation6_spill] sm:$0xff] %v1316_v2  ;;  %v275_v36 = vmul.f32 %v1084_v0, %v236_v57  ;;  %v339_v34 = vmax.f32 %v307_v46, 0.0  ;;  %v311_v30 = vadd.f32 %v1094_v1, %v272_v32  ;;  %v1334_v48 = vadd.f32 %v1094_v1, %v273_v19 }
  0x46   : > { %v1337_v38 = vadd.f32 %v1094_v1, %v274_v42  ;;  %v340_v33 = vmax.f32 %v308_v39, 0.0  ;;  %v341_v9 = vmax.f32 %v309_v44, 0.0  ;;  %v342_v11 = vmax.f32 %v1329_v35, 0.0 }
  0x47   : > { %v1343_v57 = vadd.f32 %v1094_v1, %v275_v36  ;;  %371 = vst [vmem:[%s1117_s27 + $0x90] sm:$0xff] %v339_v34  ;;  %v393_v46 = vmax.f32 %v337_v18, %v339_v34  ;;  %v343_v32 = vmax.f32 %v311_v30, 0.0  ;;  %v344_v19 = vmax.f32 %v1334_v48, 0.0 }
  0x48   : > { %v1726_v42 = vmax.f32 %v1337_v38, 0.0  ;;  %372 = vst [vmem:[%s1117_s27 + $0x98] sm:$0xff] %v340_v33  ;;  %v1349_v4 = vmax.f32 %v338_v29, %v340_v33  ;;  %373 = vst [vmem:[%s1117_s27 + $0xa0] sm:$0xff] %v341_v9  ;;  %v1355_v44 = vmul.f32 %v1084_v0, %v237_v63  ;;  %v1358_v18 = vmul.f32 %v1084_v0, %v238_v10 }
  0x49   : > { %374 = vst [vmem:[%s1117_s27 + $0xa8] sm:$0xff] %v342_v11  ;;  %v1725_v39 = vmax.f32 %v1343_v57, 0.0  ;;  %v430_v35 = vsel %vm401_vm0, %v393_v46, -inf  ;;  %v487_v36 = vsel %vm458_vm1, %v393_v46, -inf  ;;  %v544_v34 = vsel %vm515_vm2, %v393_v46, -inf  ;;  %375 = vst [vmem:[%s1117_s27 + $0xb0] sm:$0xff] %v343_v32 }
  0x4a   : > { %1750 = vst [vmem:[#allocation7_spill] sm:$0xff] %v1349_v4  ;;  %v601_v29 = vsel %vm572_vm3, %v393_v46, -inf  ;;  %376 = vst [vmem:[%s1117_s27 + $0xb8] sm:$0xff] %v344_v19  ;;  %v431_v30 = vrot.slane %v430_v35, 4  ;;  %v488_v48 = vrot.slane %v487_v36, 4  ;;  %v545_v63 = vrot.slane %v544_v34, 4 }
  0x4b   : > { %377 = vst [vmem:[%s1117_s27 + $0xc0] sm:$0xff] %v1726_v42  ;;  %v602_v33 = vrot.slane %v601_v29, 4  ;;  %378 = vst [vmem:[%s1117_s27 + $0xc8] sm:$0xff] %v1725_v39  ;;  %v657_v10 = vsel %vm401_vm0, %v1349_v4, -inf  ;;  %v713_v8 = vsel %vm458_vm1, %v1349_v4, -inf  ;;  %v1378_v46 = vsel %vm515_vm2, %v1349_v4, -inf }
  0x4c   : > { %v395_v23 = vmax.f32 %v341_v9, %v343_v32  ;;  %v432_v37 = vmax.f32 %v430_v35, %v431_v30  ;;  %v489_v55 = vmax.f32 %v487_v36, %v488_v48  ;;  %v546_v61 = vmax.f32 %v544_v34, %v545_v63 }
  0x4d   : > { %v603_v59 = vmax.f32 %v601_v29, %v602_v33  ;;  %v658_v62 = vrot.slane %v657_v10, 4  ;;  %v714_v14 = vrot.slane %v713_v8, 4 }
  0x4e   : > { %v437_v39 = vsel %vm401_vm0, %v395_v23, -inf  ;;  %v433_v42 = vrot.slane %v432_v37, 2  ;;  %v490_v41 = vrot.slane %v489_v55, 2  ;;  %v547_v2 = vrot.slane %v546_v61, 2 }
  0x4f   : > { %v604_v51 = vrot.slane %v603_v59, 2  ;;  %v1382_v15 = vmax.f32 %v657_v10, %v658_v62  ;;  %v1384_v31 = vmax.f32 %v713_v8, %v714_v14  ;;  %v438_v4 = vrot.slane %v437_v39, 4  ;;  %v241_v14 = vld [vmem:[%s1089_s22 + $0xf0] sm:$0xff] }
  0x50   : > { %v494_v9 = vsel %vm458_vm1, %v395_v23, -inf  ;;  %v434_v32 = vmax.f32 %v432_v37, %v433_v42  ;;  %v491_v35 = vmax.f32 %v489_v55, %v490_v41  ;;  %v1387_v36 = vmax.f32 %v546_v61, %v547_v2 }
  0x51   : > { %v1389_v34 = vmax.f32 %v603_v59, %v604_v51  ;;  %v439_v30 = vmax.f32 %v437_v39, %v438_v4  ;;  %v495_v48 = vrot.slane %v494_v9, 4  ;;  %v551_v63 = vsel %vm515_vm2, %v395_v23, -inf }
  0x52   : > { %v435_v33 = vrot.slane %v434_v32, 1  ;;  %v492_v62 = vrot.slane %v491_v35, 1  ;;  %v552_v8 = vrot.slane %v551_v63, 4  ;;  %v608_v37 = vsel %vm572_vm3, %v395_v23, -inf }
  0x53   : > { %v440_v10 = vrot.slane %v439_v30, 2  ;;  %v496_v20 = vmax.f32 %v494_v9, %v495_v48  ;;  %v1395_v55 = vmax.f32 %v342_v11, %v344_v19  ;;  %v609_v41 = vrot.slane %v608_v37, 4 }
  0x54   : > { %v1397_v61 = vmax.f32 %v434_v32, %v435_v33  ;;  %v1399_v59 = vmax.f32 %v491_v35, %v492_v62  ;;  %v553_v51 = vmax.f32 %v551_v63, %v552_v8  ;;  %v315_v48 = vadd.f32 %v1094_v1, %v1355_v44 }
  0x55   : > { %1751 = vst [vmem:[#allocation8_spill] sm:$0xff] %v1395_v55  ;;  %v441_v4 = vmax.f32 %v439_v30, %v440_v10  ;;  %v497_v2 = vrot.slane %v496_v20, 2  ;;  %v664_v42 = vsel %vm401_vm0, %v1395_v55, -inf  ;;  %v720_v39 = vsel %vm458_vm1, %v1395_v55, -inf  ;;  %v239_v10 = vld [vmem:[%s1089_s22 + $0xe0] sm:$0xff] }
  0x56   : > { %v554_v9 = vrot.slane %v553_v51, 2  ;;  %v610_v23 = vmax.f32 %v608_v37, %v609_v41  ;;  %v665_v11 = vrot.slane %v664_v42, 4  ;;  %v721_v19 = vrot.slane %v720_v39, 4  ;;  %v240_v37 = vld [vmem:[%s1089_s22 + $0xe8] sm:$0xff] }
  0x57   : > { %v442_v32 = vrot.slane %v441_v4, 1  ;;  %v498_v35 = vmax.f32 %v496_v20, %v497_v2  ;;  %v1407_v30 = vsel %vm515_vm2, %v1395_v55, -inf  ;;  %v347_v29 = vmax.f32 %v315_v48, 0.0  ;;  %v242_v55 = vld [vmem:[%s1089_s22 + $0xf8] sm:$0xff] }
  0x58   : > { %1752 = vst [vmem:[#allocation9_spill] sm:$0xff] %v1407_v30  ;;  %v1411_v63 = vmax.f32 %v553_v51, %v554_v9  ;;  %v611_v33 = vrot.slane %v610_v23, 2  ;;  %v1413_v62 = vmax.f32 %v664_v42, %v665_v11  ;;  %v1415_v8 = vmax.f32 %v720_v39, %v721_v19 }
  0x59   : > { %v1419_v41 = vmax.f32 %v441_v4, %v442_v32  ;;  %v499_v20 = vrot.slane %v498_v35, 1  ;;  %v316_v42 = vadd.f32 %v1094_v1, %v1358_v18  ;;  %379 = vst [vmem:[%s1117_s27 + $0xd0] sm:$0xff] %v347_v29  ;;  %v1759_v4 = vmax.f32 %v1337_v38, 0.0 }
  0x5a   : > { %1753 = vst [vmem:[#allocation10_spill] sm:$0xff] %v1411_v63  ;;  %1754 = vst [vmem:[#allocation11_spill] sm:$0xff] %v1413_v62  ;;  %v1425_v51 = vmax.f32 %v610_v23, %v611_v33  ;;  %v278_v19 = vmul.f32 %v1084_v0, %v239_v10  ;;  %v279_v32 = vmul.f32 %v1084_v0, %v240_v37  ;;  %v1760_v2 = vrot.slane %v1173_v12, 1 }
  0x5b   : > { %1755 = vst [vmem:[#allocation12_spill] sm:$0xff] %v1415_v8  ;;  %1756 = vst [vmem:[#allocation13_spill] sm:$0xff] %v1419_v41  ;;  %v1430_v39 = vmax.f32 %v498_v35, %v499_v20  ;;  %v397_v11 = vmax.f32 %v1759_v4, %v347_v29  ;;  %v348_v48 = vmax.f32 %v316_v42, 0.0  ;;  %v280_v23 = vmul.f32 %v1084_v0, %v241_v14 }
  0x5c   : > { %1757 = vst [vmem:[#allocation14_spill] sm:$0xff] %v1425_v51  ;;  %v281_v33 = vmul.f32 %v1084_v0, %v242_v55  ;;  %v1442_v18 = vmax.f32 %v1173_v12, %v1760_v2  ;;  %v1761_v0 = vmax.f32 %v1343_v57, 0.0  ;;  %v317_v12 = vadd.f32 %v1094_v1, %v278_v19 }
  0x5d   : > { %1758 = vst [vmem:[#allocation15_spill] sm:$0xff] %v1430_v39  ;;  %v444_v35 = vsel %vm401_vm0, %v397_v11, -inf  ;;  %v501_v38 = vsel %vm458_vm1, %v397_v11, -inf  ;;  %v558_v29 = vsel %vm515_vm2, %v397_v11, -inf  ;;  %v615_v10 = vsel %vm572_vm3, %v397_v11, -inf  ;;  %380 = vst [vmem:[%s1117_s27 + $0xd8] sm:$0xff] %v348_v48 }
  0x5e   : > { %v445_v20 = vrot.slane %v444_v35, 4  ;;  %v502_v37 = vrot.slane %v501_v38, 4  ;;  %v559_v42 = vrot.slane %v558_v29, 4  ;;  %v616_v4 = vrot.slane %v615_v10, 4 }
  0x5f   : > { %v1451_v14 = vmax.f32 %v1761_v0, %v348_v48  ;;  %v318_v55 = vadd.f32 %v1094_v1, %v279_v32  ;;  %v319_v2 = vadd.f32 %v1094_v1, %v280_v23  ;;  %v349_v19 = vmax.f32 %v317_v12, 0.0 }
  0x60   : > { %v446_v9 = vmax.f32 %v444_v35, %v445_v20  ;;  %v503_v44 = vmax.f32 %v501_v38, %v502_v37  ;;  %v560_v41 = vmax.f32 %v558_v29, %v559_v42  ;;  %v617_v11 = vmax.f32 %v615_v10, %v616_v4 }
  0x61   : > { %1762 = vst [vmem:[#allocation16_spill] sm:$0xff] %v1451_v14  ;;  %v671_v39 = vsel %vm401_vm0, %v1451_v14, -inf  ;;  %v727_v30 = vsel %vm458_vm1, %v1451_v14, -inf  ;;  %v1462_v57 = vsel %vm515_vm2, %v1451_v14, -inf  ;;  %381 = vst [vmem:[%s1117_s27 + $0xe0] sm:$0xff] %v349_v19  ;;  %v350_v10 = vmax.f32 %v318_v55, 0.0 }
  0x62   : > { %1763 = vst [vmem:[#allocation17_spill] sm:$0xff] %v1462_v57  ;;  %v447_v32 = vrot.slane %v446_v9, 2  ;;  %v504_v48 = vrot.slane %v503_v44, 2  ;;  %v561_v23 = vrot.slane %v560_v41, 2  ;;  %v618_v0 = vrot.slane %v617_v11, 2 }
  0x63   : > { %v672_v35 = vrot.slane %v671_v39, 4  ;;  %v728_v38 = vrot.slane %v727_v30, 4  ;;  %382 = vst [vmem:[%s1117_s27 + $0xe8] sm:$0xff] %v350_v10  ;;  %v351_v8 = vmax.f32 %v319_v2, 0.0  ;;  %v320_v62 = vadd.f32 %v1094_v1, %v281_v33 }
  0x64   : > { %v448_v20 = vmax.f32 %v446_v9, %v447_v32  ;;  %v505_v37 = vmax.f32 %v503_v44, %v504_v48  ;;  %v1466_v42 = vmax.f32 %v560_v41, %v561_v23  ;;  %v1468_v4 = vmax.f32 %v617_v11, %v618_v0 }
  0x65   : > { %v1470_v14 = vmax.f32 %v671_v39, %v672_v35  ;;  %v1472_v12 = vmax.f32 %v727_v30, %v728_v38  ;;  %v578_v9 = vrot.slane %v1175_v13, 1  ;;  %383 = vst [vmem:[%s1117_s27 + $0xf0] sm:$0xff] %v351_v8  ;;  %v399_v44 = vmax.f32 %v349_v19, %v351_v8 }
  0x66   : > { %v449_v51 = vrot.slane %v448_v20, 1  ;;  %v506_v63 = vrot.slane %v505_v37, 1  ;;  %v352_v55 = vmax.f32 %v320_v62, 0.0  ;;  %v1764_v39 = vrot.slane %v1168_v6, 2 }
  0x67   : > { %v579_v1 = vmax.f32 %v1175_v13, %v578_v9  ;;  %v688_v33 = vrot.slane %v1170_v7, 2  ;;  %v451_v32 = vsel %vm401_vm0, %v399_v44, -inf  ;;  %v508_v48 = vsel %vm458_vm1, %v399_v44, -inf }
  0x68   : > { %v633_v30 = vmax.f32 %v1168_v6, %v1764_v39  ;;  %v1483_v11 = vmax.f32 %v448_v20, %v449_v51  ;;  %v1485_v2 = vmax.f32 %v505_v37, %v506_v63  ;;  %v565_v8 = vsel %vm515_vm2, %v399_v44, -inf  ;;  %384 = vst [vmem:[%s1117_s27 + $0xf8] sm:$0xff] %v352_v55 }
  0x69   : > { %v622_v62 = vsel %vm572_vm3, %v399_v44, -inf  ;;  %v452_v19 = vrot.slane %v451_v32, 4  ;;  %v509_v6 = vrot.slane %v508_v48, 4  ;;  %v566_v51 = vrot.slane %v565_v8, 4 }
  0x6a   : > { %1765 = vst [vmem:[#allocation18_spill] sm:$0xff] %v1483_v11  ;;  %1766 = vst [vmem:[#allocation19_spill] sm:$0xff] %v1485_v2  ;;  %v623_v23 = vrot.slane %v622_v62, 4  ;;  %v1494_v63 = vmax.f32 %v350_v10, %v352_v55  ;;  %v634_v13 = vrot.slane %v633_v30, 1  ;;  %v689_v0 = vmax.f32 %v1170_v7, %v688_v33 }
  0x6b   : > { %v1768_v35 = vrot.slane %v1164_v54, 4  ;;  %v453_v20 = vmax.f32 %v451_v32, %v452_v19  ;;  %v510_v37 = vmax.f32 %v508_v48, %v509_v6  ;;  %v567_v9 = vmax.f32 %v565_v8, %v566_v51 }
  0x6c   : > { %1767 = vst [vmem:[#allocation20_spill] sm:$0xff] %v1494_v63  ;;  %v624_v44 = vmax.f32 %v622_v62, %v623_v23  ;;  %v678_v39 = vsel %vm401_vm0, %v1494_v63, -inf  ;;  %v734_v10 = vsel %vm458_vm1, %v1494_v63, -inf  ;;  %v1506_v55 = vsel %vm515_vm2, %v1494_v63, -inf }
  0x6d   : > { %v743_v38 = vmax.f32 %v1164_v54, %v1768_v35  ;;  %v635_v7 = vmax.f32 %v633_v30, %v634_v13  ;;  %v454_v33 = vrot.slane %v453_v20, 2  ;;  %v511_v41 = vrot.slane %v510_v37, 2 }
  0x6e   : > { %v568_v54 = vrot.slane %v567_v9, 2  ;;  %v625_v35 = vrot.slane %v624_v44, 2  ;;  %v679_v32 = vrot.slane %v678_v39, 4  ;;  %v735_v48 = vrot.slane %v734_v10, 4 }
  0x6f   : > { %v690_v62 = vrot.slane %v689_v0, 1  ;;  %v455_v19 = vmax.f32 %v453_v20, %v454_v33  ;;  %v512_v6 = vmax.f32 %v510_v37, %v511_v41  ;;  %v744_v13 = vrot.slane %v743_v38, 2 }
  0x70   : > { %v1509_v51 = vmax.f32 %v567_v9, %v568_v54  ;;  %v1511_v23 = vmax.f32 %v624_v44, %v625_v35  ;;  %v1513_v29 = vmax.f32 %v678_v39, %v679_v32  ;;  %v1515_v63 = vmax.f32 %v734_v10, %v735_v48 }
  0x71   : > { %v691_v30 = vmax.f32 %v689_v0, %v690_v62  ;;  %v456_v11 = vrot.slane %v455_v19, 1  ;;  %v513_v2 = vrot.slane %v512_v6, 1  ;;  %v797_v8 = vsel %vm572_vm3, %v1142_v40, -inf }
  0x72   : > { %v570_v57 = vrot.slane %v1509_v51, 1  ;;  %v681_v20 = vrot.slane %v1513_v29, 2  ;;  %v745_v41 = vmax.f32 %v743_v38, %v744_v13  ;;  %v798_v37 = vrot.slane %v797_v8, 4 }
  0x73   : > { %v854_v9 = vsel %vm853_vm4, %v1183_v26, %v1185_v27  ;;  %v1524_v44 = vmax.f32 %v455_v19, %v456_v11  ;;  %v1526_v39 = vmax.f32 %v512_v6, %v513_v2  ;;  %v1769_v10 = vrot.slane %v1197_v47, 1 }
  0x74   : > { %v862_v0 = vsel %vm401_vm0, %v854_v9, %v1442_v18  ;;  %v746_v33 = vrot.slane %v745_v41, 1  ;;  %v799_v54 = vmax.f32 %v797_v8, %v798_v37  ;;  %v585_v35 = vrot.slane %v1211_v60, 1 }
  0x75   : > { %v529_v40 = vmax.f32 %v1197_v47, %v1769_v10  ;;  %v871_v38 = vsel %vm870_vm5, %v862_v0, %v579_v1  ;;  %v1770_v27 = vrot.slane %v1199_v49, 2  ;;  %v695_v18 = vrot.slane %v1201_v50, 2 }
  0x76   : > { %v880_v26 = vsel %vm879_vm6, %v871_v38, %v635_v7  ;;  %v1771_v2 = vrot.slane %v1193_v45, 4  ;;  %v747_v47 = vmax.f32 %v745_v41, %v746_v33  ;;  %v800_v48 = vrot.slane %v799_v54, 2 }
  0x77   : > { %v640_v11 = vmax.f32 %v1199_v49, %v1770_v27  ;;  %v889_v8 = vsel %vm888_vm7, %v880_v26, %v691_v30  ;;  %v586_v1 = vmax.f32 %v1211_v60, %v585_v35  ;;  %v696_v7 = vmax.f32 %v1201_v50, %v695_v18 }
  0x78   : > { %v750_v32 = vmax.f32 %v1193_v45, %v1771_v2  ;;  %v804_v6 = vsel %vm572_vm3, %v1181_v25, -inf  ;;  %v801_v49 = vmax.f32 %v799_v54, %v800_v48  ;;  %v898_v13 = vsel %vm897_vm8, %v889_v8, %v747_v47 }
  0x79   : > { %v641_v62 = vrot.slane %v640_v11, 1  ;;  %v805_v37 = vrot.slane %v804_v6, 4  ;;  %v855_v45 = vsel %vm853_vm4, %v1204_v52, %v1217_v3  ;;  %v697_v30 = vrot.slane %v696_v7, 1 }
  0x7a   : > { %v751_v19 = vrot.slane %v750_v32, 2  ;;  %v863_v60 = vsel %vm401_vm0, %v855_v45, %v529_v40  ;;  %v802_v0 = vrot.slane %v801_v49, 1  ;;  %v1772_v25 = vrot.slane %v1269_v21, 1 }
  0x7b   : > { %v642_v41 = vmax.f32 %v640_v11, %v641_v62  ;;  %v806_v50 = vmax.f32 %v804_v6, %v805_v37  ;;  %v872_v10 = vsel %vm870_vm5, %v863_v60, %v586_v1  ;;  %v698_v54 = vmax.f32 %v696_v7, %v697_v30 }
  0x7c   : > { %v752_v9 = vmax.f32 %v750_v32, %v751_v19  ;;  %v536_v33 = vmax.f32 %v1269_v21, %v1772_v25  ;;  %v592_v52 = vrot.slane %v1271_v22, 1  ;;  %v803_v3 = vmax.f32 %v801_v49, %v802_v0 }
  0x7d   : > { %v881_v35 = vsel %vm879_vm6, %v872_v10, %v642_v41  ;;  %v807_v40 = vrot.slane %v806_v50, 2  ;;  %v1773_v26 = vrot.slane %v1264_v16, 2  ;;  %v702_v21 = vrot.slane %v1266_v17, 2 }
  0x7e   : > { %v753_v38 = vrot.slane %v752_v9, 1  ;;  %v890_v18 = vsel %vm888_vm7, %v881_v35, %v698_v54  ;;  %v593_v2 = vmax.f32 %v1271_v22, %v592_v52  ;;  %v1774_v32 = vrot.slane %v1260_v56, 4 }
  0x7f   : > { %v647_v27 = vmax.f32 %v1264_v16, %v1773_v26  ;;  %v907_v48 = vsel %vm906_vm9, %v898_v13, %v803_v3  ;;  %v808_v8 = vmax.f32 %v806_v50, %v807_v40  ;;  %v703_v62 = vmax.f32 %v1266_v17, %v702_v21  ;;  %v1778_v40 = vld [vmem:[#allocation3_spill] sm:$0xff]  ;;  %v1780_v21 = vld [vmem:[#allocation2_spill] sm:$0xff] }
  0x80   : > { %v754_v11 = vmax.f32 %v752_v9, %v753_v38  ;;  %v757_v47 = vmax.f32 %v1260_v56, %v1774_v32  ;;  %915 = vst [vmem:[%s1563_s5] sm:$0xff] %v907_v48  ;;  %v811_v19 = vsel %vm572_vm3, %v1238_v24, -inf  ;;  %v856_v22 = vsel %vm853_vm4, %v1279_v53, %v1281_v58  ;;  %v1777_v38 = vld [vmem:[#allocation4_spill] sm:$0xff]  ;;  %v1782_v32 = vld [vmem:[#allocation5_spill] sm:$0xff] }
  0x81   : > { %v648_v1 = vrot.slane %v647_v27, 1  ;;  %v809_v6 = vrot.slane %v808_v8, 1  ;;  %v704_v56 = vrot.slane %v703_v62, 1  ;;  %v812_v37 = vrot.slane %v811_v19, 4 }
  0x82   : > { %v899_v16 = vsel %vm897_vm8, %v890_v18, %v754_v11  ;;  %v758_v7 = vrot.slane %v757_v47, 2  ;;  %v864_v45 = vsel %vm401_vm0, %v856_v22, %v536_v33  ;;  %v1775_v17 = vrot.slane %v1293_v43, 1 }
  0x83   : > { %v649_v49 = vmax.f32 %v647_v27, %v648_v1  ;;  %v599_v30 = vrot.slane %v1311_v5, 1  ;;  %v810_v9 = vmax.f32 %v808_v8, %v809_v6  ;;  %v705_v24 = vmax.f32 %v703_v62, %v704_v56 }
  0x84   : > { %v759_v13 = vmax.f32 %v757_v47, %v758_v7  ;;  %v543_v41 = vmax.f32 %v1293_v43, %v1775_v17  ;;  %v813_v60 = vmax.f32 %v811_v19, %v812_v37  ;;  %v873_v0 = vsel %vm870_vm5, %v864_v45, %v593_v2  ;;  %v1781_v2 = vld [vmem:[#allocation6_spill] sm:$0xff] }
  0x85   : > { %v882_v58 = vsel %vm879_vm6, %v873_v0, %v649_v49  ;;  %v600_v50 = vmax.f32 %v1311_v5, %v599_v30  ;;  %v1776_v10 = vrot.slane %v1295_v28, 2  ;;  %v908_v33 = vsel %vm906_vm9, %v899_v16, %v810_v9 }
  0x86   : > { %v760_v53 = vrot.slane %v759_v13, 1  ;;  %v814_v54 = vrot.slane %v813_v60, 2  ;;  %v891_v43 = vsel %vm888_vm7, %v882_v58, %v705_v24  ;;  %v709_v35 = vrot.slane %v1777_v38, 2  ;;  %916 = vst [vmem:[%s1563_s5 + $0x8] sm:$0xff] %v908_v33 }
  0x87   : > { %v654_v25 = vmax.f32 %v1295_v28, %v1776_v10  ;;  %v1779_v26 = vrot.slane %v1778_v40, 4  ;;  %v818_v5 = vsel %vm572_vm3, %v1780_v21, -inf  ;;  %v857_v47 = vsel %vm853_vm4, %v1782_v32, %v1781_v2 }
  0x88   : > { %v761_v52 = vmax.f32 %v759_v13, %v760_v53  ;;  %v815_v11 = vmax.f32 %v813_v60, %v814_v54  ;;  %v710_v28 = vmax.f32 %v1777_v38, %v709_v35  ;;  %v819_v18 = vrot.slane %v818_v5, 4 }
  0x89   : > { %v655_v3 = vrot.slane %v654_v25, 1  ;;  %v764_v27 = vmax.f32 %v1778_v40, %v1779_v26  ;;  %v865_v62 = vsel %vm401_vm0, %v857_v47, %v543_v41  ;;  %v1783_v56 = vrot.slane %v1387_v36, 1 }
  0x8a   : > { %v900_v48 = vsel %vm897_vm8, %v891_v43, %v761_v52  ;;  %v816_v16 = vrot.slane %v815_v11, 1  ;;  %v711_v7 = vrot.slane %v710_v28, 1  ;;  %v820_v19 = vmax.f32 %v818_v5, %v819_v18  ;;  %v1786_v43 = vld [vmem:[#allocation7_spill] sm:$0xff] }
  0x8b   : > { %v656_v8 = vmax.f32 %v654_v25, %v655_v3  ;;  %v765_v1 = vrot.slane %v764_v27, 2  ;;  %v874_v22 = vsel %vm870_vm5, %v865_v62, %v600_v50  ;;  %v550_v37 = vmax.f32 %v1387_v36, %v1783_v56  ;;  %v1793_v56 = vld [vmem:[#allocation9_spill] sm:$0xff] }
  0x8c   : > { %v606_v13 = vrot.slane %v1389_v34, 1  ;;  %v817_v45 = vmax.f32 %v815_v11, %v816_v16  ;;  %v712_v17 = vmax.f32 %v710_v28, %v711_v7  ;;  %v821_v30 = vrot.slane %v820_v19, 2  ;;  %v1787_v11 = vld [vmem:[#allocation10_spill] sm:$0xff]  ;;  %v1792_v7 = vld [vmem:[#allocation12_spill] sm:$0xff] }
  0x8d   : > { %v766_v6 = vmax.f32 %v764_v27, %v765_v1  ;;  %v883_v49 = vsel %vm879_vm6, %v874_v22, %v656_v8  ;;  %v1784_v41 = vrot.slane %v1382_v15, 2  ;;  %v716_v0 = vrot.slane %v1384_v31, 2  ;;  %v1790_v1 = vld [vmem:[#allocation11_spill] sm:$0xff] }
  0x8e   : > { %v607_v60 = vmax.f32 %v1389_v34, %v606_v13  ;;  %v1785_v53 = vrot.slane %v1378_v46, 4  ;;  %v909_v36 = vsel %vm906_vm9, %v900_v48, %v817_v45  ;;  %v822_v50 = vmax.f32 %v820_v19, %v821_v30 }
  0x8f   : > { %v661_v9 = vmax.f32 %v1382_v15, %v1784_v41  ;;  %v767_v24 = vrot.slane %v766_v6, 1  ;;  %v892_v10 = vsel %vm888_vm7, %v883_v49, %v712_v17  ;;  %917 = vst [vmem:[%s1563_s5 + $0x10] sm:$0xff] %v909_v36  ;;  %v717_v54 = vmax.f32 %v1384_v31, %v716_v0  ;;  %v1795_v41 = vld [vmem:[#allocation8_spill] sm:$0xff] }
  0x90   : > { %v771_v58 = vmax.f32 %v1378_v46, %v1785_v53  ;;  %v825_v34 = vsel %vm572_vm3, %v1786_v43, -inf  ;;  %v823_v38 = vrot.slane %v822_v50, 1  ;;  %v858_v46 = vsel %vm853_vm4, %v1397_v61, %v1399_v59  ;;  %v1789_v61 = vld [vmem:[#allocation14_spill] sm:$0xff]  ;;  %v1796_v53 = vld [vmem:[#allocation15_spill] sm:$0xff] }
  0x91   : > { %v662_v25 = vrot.slane %v661_v9, 1  ;;  %v768_v33 = vmax.f32 %v766_v6, %v767_v24  ;;  %v826_v52 = vrot.slane %v825_v34, 4  ;;  %v718_v40 = vrot.slane %v717_v54, 1 }
  0x92   : > { %v772_v15 = vrot.slane %v771_v58, 2  ;;  %v866_v27 = vsel %vm401_vm0, %v858_v46, %v550_v37  ;;  %v824_v21 = vmax.f32 %v822_v50, %v823_v38  ;;  %v1788_v28 = vrot.slane %v1787_v11, 1 }
  0x93   : > { %v663_v35 = vmax.f32 %v661_v9, %v662_v25  ;;  %v901_v3 = vsel %vm897_vm8, %v892_v10, %v768_v33  ;;  %v827_v31 = vmax.f32 %v825_v34, %v826_v52  ;;  %v875_v5 = vsel %vm870_vm5, %v866_v27, %v607_v60 }
  0x94   : > { %v773_v26 = vmax.f32 %v771_v58, %v772_v15  ;;  %v557_v18 = vmax.f32 %v1787_v11, %v1788_v28  ;;  %v719_v2 = vmax.f32 %v717_v54, %v718_v40  ;;  %v613_v59 = vrot.slane %v1789_v61, 1  ;;  %v1797_v58 = vld [vmem:[#allocation13_spill] sm:$0xff] }
  0x95   : > { %v884_v47 = vsel %vm879_vm6, %v875_v5, %v663_v35  ;;  %v910_v48 = vsel %vm906_vm9, %v901_v3, %v824_v21  ;;  %v828_v8 = vrot.slane %v827_v31, 2  ;;  %v1791_v62 = vrot.slane %v1790_v1, 2  ;;  %v1800_v28 = vld [vmem:[#allocation17_spill] sm:$0xff] }
  0x96   : > { %v774_v32 = vrot.slane %v773_v26, 1  ;;  %v723_v19 = vrot.slane %v1792_v7, 2  ;;  %918 = vst [vmem:[%s1563_s5 + $0x18] sm:$0xff] %v910_v48  ;;  %v893_v6 = vsel %vm888_vm7, %v884_v47, %v719_v2  ;;  %v614_v49 = vmax.f32 %v1789_v61, %v613_v59 }
  0x97   : > { %v668_v16 = vmax.f32 %v1790_v1, %v1791_v62  ;;  %v1794_v37 = vrot.slane %v1793_v56, 4  ;;  %v829_v45 = vmax.f32 %v827_v31, %v828_v8  ;;  %v832_v9 = vsel %vm572_vm3, %v1795_v41, -inf  ;;  %v1803_v1 = vld [vmem:[#allocation19_spill] sm:$0xff]  ;;  %v1804_v62 = vld [vmem:[#allocation18_spill] sm:$0xff] }
  0x98   : > { %v775_v22 = vmax.f32 %v773_v26, %v774_v32  ;;  %v724_v30 = vmax.f32 %v1792_v7, %v723_v19  ;;  %v833_v0 = vrot.slane %v832_v9, 4  ;;  %v859_v36 = vsel %vm853_vm4, %v1797_v58, %v1796_v53 }
  0x99   : > { %v778_v13 = vmax.f32 %v1793_v56, %v1794_v37  ;;  %v669_v17 = vrot.slane %v668_v16, 1  ;;  %v830_v50 = vrot.slane %v829_v45, 1  ;;  %v867_v33 = vsel %vm401_vm0, %v859_v36, %v557_v18 }
  0x9a   : > { %v902_v24 = vsel %vm897_vm8, %v893_v6, %v775_v22  ;;  %v725_v25 = vrot.slane %v724_v30, 1  ;;  %v834_v15 = vmax.f32 %v832_v9, %v833_v0  ;;  %v876_v43 = vsel %vm870_vm5, %v867_v33, %v614_v49 }
  0x9b   : > { %v779_v60 = vrot.slane %v778_v13, 2  ;;  %v670_v10 = vmax.f32 %v668_v16, %v669_v17  ;;  %v1798_v34 = vrot.slane %v1466_v42, 1  ;;  %v831_v35 = vmax.f32 %v829_v45, %v830_v50 }
  0x9c   : > { %v726_v52 = vmax.f32 %v724_v30, %v725_v25  ;;  %v620_v3 = vrot.slane %v1468_v4, 1  ;;  %v835_v26 = vrot.slane %v834_v15, 2  ;;  %v1799_v27 = vrot.slane %v1470_v14, 2 }
  0x9d   : > { %v780_v54 = vmax.f32 %v778_v13, %v779_v60  ;;  %v564_v38 = vmax.f32 %v1466_v42, %v1798_v34  ;;  %v885_v46 = vsel %vm879_vm6, %v876_v43, %v670_v10  ;;  %v730_v31 = vrot.slane %v1472_v12, 2 }
  0x9e   : > { %v675_v21 = vmax.f32 %v1470_v14, %v1799_v27  ;;  %v911_v5 = vsel %vm906_vm9, %v902_v24, %v831_v35  ;;  %v894_v11 = vsel %vm888_vm7, %v885_v46, %v726_v52  ;;  %v621_v42 = vmax.f32 %v1468_v4, %v620_v3  ;;  %v1802_v14 = vld [vmem:[#allocation16_spill] sm:$0xff] }
  0x9f   : > { %v781_v40 = vrot.slane %v780_v54, 1  ;;  %v1801_v18 = vrot.slane %v1800_v28, 4  ;;  %919 = vst [vmem:[%s1563_s5 + $0x20] sm:$0xff] %v911_v5  ;;  %v836_v47 = vmax.f32 %v834_v15, %v835_v26  ;;  %v731_v59 = vmax.f32 %v1472_v12, %v730_v31 }
  0xa0   : > { %v676_v61 = vrot.slane %v675_v21, 1  ;;  %v839_v8 = vsel %vm572_vm3, %v1802_v14, -inf  ;;  %v860_v16 = vsel %vm853_vm4, %v1804_v62, %v1803_v1  ;;  %v571_v4 = vmax.f32 %v1509_v51, %v570_v57 }
  0xa1   : > { %v785_v2 = vmax.f32 %v1800_v28, %v1801_v18  ;;  %v782_v32 = vmax.f32 %v780_v54, %v781_v40  ;;  %v837_v7 = vrot.slane %v836_v47, 1  ;;  %v732_v6 = vrot.slane %v731_v59, 1 }
  0xa2   : > { %v677_v22 = vmax.f32 %v675_v21, %v676_v61  ;;  %v840_v12 = vrot.slane %v839_v8, 4  ;;  %v868_v56 = vsel %vm401_vm0, %v860_v16, %v564_v38  ;;  %v627_v37 = vrot.slane %v1511_v23, 1 }
  0xa3   : > { %v786_v48 = vrot.slane %v785_v2, 2  ;;  %v903_v19 = vsel %vm897_vm8, %v894_v11, %v782_v32  ;;  %v838_v13 = vmax.f32 %v836_v47, %v837_v7  ;;  %v733_v45 = vmax.f32 %v731_v59, %v732_v6 }
  0xa4   : > { %v877_v17 = vsel %vm870_vm5, %v868_v56, %v621_v42  ;;  %v682_v57 = vmax.f32 %v1513_v29, %v681_v20  ;;  %v841_v30 = vmax.f32 %v839_v8, %v840_v12  ;;  %v628_v9 = vmax.f32 %v1511_v23, %v627_v37  ;;  %v1806_v20 = vld [vmem:[#allocation20_spill] sm:$0xff] }
  0xa5   : > { %v787_v49 = vmax.f32 %v785_v2, %v786_v48  ;;  %v886_v41 = vsel %vm879_vm6, %v877_v17, %v677_v22  ;;  %v912_v24 = vsel %vm906_vm9, %v903_v19, %v838_v13  ;;  %v737_v53 = vrot.slane %v1515_v63, 2 }
  0xa6   : > { %v895_v60 = vsel %vm888_vm7, %v886_v41, %v733_v45  ;;  %v683_v0 = vrot.slane %v682_v57, 1  ;;  %920 = vst [vmem:[%s1563_s5 + $0x28] sm:$0xff] %v912_v24  ;;  %v842_v36 = vrot.slane %v841_v30, 2  ;;  %v1805_v50 = vrot.slane %v1506_v55, 4 }
  0xa7   : > { %v788_v51 = vrot.slane %v787_v49, 1  ;;  %v846_v10 = vsel %vm572_vm3, %v1806_v20, -inf  ;;  %v738_v23 = vmax.f32 %v1515_v63, %v737_v53  ;;  %v861_v54 = vsel %vm853_vm4, %v1524_v44, %v1526_v39 }
  0xa8   : > { %v792_v29 = vmax.f32 %v1506_v55, %v1805_v50  ;;  %v684_v25 = vmax.f32 %v682_v57, %v683_v0  ;;  %v847_v33 = vrot.slane %v846_v10, 4  ;;  %v843_v15 = vmax.f32 %v841_v30, %v842_v36 }
  0xa9   : > { %v789_v58 = vmax.f32 %v787_v49, %v788_v51  ;;  %v869_v38 = vsel %vm401_vm0, %v861_v54, %v571_v4  ;;  %v739_v35 = vrot.slane %v738_v23, 1 }
  0xaa   : > { %v793_v34 = vrot.slane %v792_v29, 2  ;;  %v848_v55 = vmax.f32 %v846_v10, %v847_v33  ;;  %v878_v52 = vsel %vm870_vm5, %v869_v38, %v628_v9  ;;  %v844_v46 = vrot.slane %v843_v15, 1 }
  0xab   : > { %v904_v43 = vsel %vm897_vm8, %v895_v60, %v789_v58  ;;  %v887_v63 = vsel %vm879_vm6, %v878_v52, %v684_v25  ;;  %v740_v40 = vmax.f32 %v738_v23, %v739_v35 }
  0xac   : > { %v794_v3 = vmax.f32 %v792_v29, %v793_v34  ;;  %v849_v26 = vrot.slane %v848_v55, 2  ;;  %v845_v27 = vmax.f32 %v843_v15, %v844_v46 }
  0xad   : > { %v896_v21 = vsel %vm888_vm7, %v887_v63, %v740_v40 }
  0xae   : > { %v795_v44 = vrot.slane %v794_v3, 1  ;;  %v850_v39 = vmax.f32 %v848_v55, %v849_v26  ;;  %v913_v31 = vsel %vm906_vm9, %v904_v43, %v845_v27 }
  0xaf   : > { %921 = vst [vmem:[%s1563_s5 + $0x30] sm:$0xff] %v913_v31 }
  0xb0   : > { %v796_v5 = vmax.f32 %v794_v3, %v795_v44  ;;  %v851_v11 = vrot.slane %v850_v39, 1 }
  0xb2   : > { %v905_v42 = vsel %vm897_vm8, %v896_v21, %v796_v5  ;;  %v852_v28 = vmax.f32 %v850_v39, %v851_v11 }
  0xb4   : > { %v914_v18 = vsel %vm906_vm9, %v905_v42, %v852_v28 }
  0xb5   : > { %922 = vst [vmem:[%s1563_s5 + $0x38] sm:$0xff] %v914_v18 }
  0xb6 PF: > { %s15_s15 = sadd.s32 1, %s1043_s15  }
  0xb7   : > { %p12_p4 = scmp.ge.s32.totalorder %s15_s15, 4  }
  0xb9   :  { %14 = sbr.rel (!%p12_p4) target bundleno = 1 (0x1), region = 74 }

// kernel: upsample_forward.3
= control target key start
LH: loop header
LB: loop body
LE: loop exit
PB: predicated region body
PF: predicated region fallthrough
CT: control target
= control target key end

     0   :  { %s4544_s12 = smov 0   ;;  %s5211_s0 = inlined_call_operand.vmem [shape: f32[2,18,24,128], index: 0, kind: input, shape index: {}]   ;;  %s5212_s1 = inlined_call_operand.vmem [shape: bf16[3,3,128,128], index: 1, kind: input, shape index: {}]   ;;  %s5213_s2 = inlined_call_operand.vmem [shape: f32[2,16,16,128], index: 2, kind: output, shape index: {0}]   ;;  %s5214_s3 = inlined_call_operand.vmem [shape: f32[2,8,128], index: 3, kind: output, shape index: {1}]  }
   0x1 LB: > { %s3103_s13 = sadd.s32 4294967295, %s4522_s12   ;;  %p3107_p0 = scmp.ge.s32.totalorder %s4522_s12, 1  ;;  %s4522_s12 = sphi %s4544_s12, %s14_s12  }
   0x2   : > { %p140_p1 = scmp.lt.s32.totalorder %s4522_s12, 3 }
   0x4   : > { %p141_p2 = pnand %p3107_p0, %p140_p1 }
   0x5   : > { %v4436_v0 = vld [vmem:[%s5212_s1 + $0x40] sm:$0xff] (!%p141_p2)   ;;  %p168_p3 = scmp.lt.s32.totalorder (!%p141_p2), %s3103_s13, 1  ;;  %v4438_v2 = vld [vmem:[%s5212_s1 + $0x48] sm:$0xff] (!%p141_p2)   ;;  %v4440_v4 = vld [vmem:[%s5212_s1 + $0x50] sm:$0xff] (!%p141_p2)   ;;  %vm3012_vm0 = vcmask (!%p141_p2), 1040384   ;;  %vm3014_vm1 = vcmask (!%p141_p2), 1041408  }
   0x6   : > { %144 = sbr.rel (%p141_p2) target bundleno = 559 (0x22f), region = 28  ;;  %v4437_v1 = vld [vmem:[%s5212_s1 + $0x100] sm:$0xff] (!%p141_p2)   ;;  %3723 = vmatprep.subr.bf16.mxu1 (!%p141_p2), %v4436_v0  ;;  %v4439_v3 = vld [vmem:[%s5212_s1 + $0x108] sm:$0xff] (!%p141_p2)   ;;  %v4441_v5 = vld [vmem:[%s5212_s1 + $0x110] sm:$0xff] (!%p141_p2)  }
   0x7   : > { %3915 = vmatprep.subr.bf16.mxu0 (!%p141_p2), %v4437_v1  ;;  %3724 = vmatpush3.bf16.msra.mxu1 (!%p141_p2), %v4436_v0  ;;  %v4442_v6 = vld [vmem:[%s5212_s1 + $0x58] sm:$0xff] (!%p141_p2)   ;;  %v4444_v8 = vld [vmem:[%s5212_s1 + $0x60] sm:$0xff] (!%p141_p2)   ;;  %v4446_v10 = vld [vmem:[%s5212_s1 + $0x68] sm:$0xff] (!%p141_p2)  }
   0x8   : > { %3916 = vmatpush3.bf16.msra.mxu0 (!%p141_p2), %v4437_v1  ;;  %3725 = vmatprep.subr.bf16.mxu1 (!%p141_p2), %v4438_v2  ;;  %v4443_v7 = vld [vmem:[%s5212_s1 + $0x118] sm:$0xff] (!%p141_p2)   ;;  %v4445_v9 = vld [vmem:[%s5212_s1 + $0x120] sm:$0xff] (!%p141_p2)   ;;  %v4447_v11 = vld [vmem:[%s5212_s1 + $0x128] sm:$0xff] (!%p141_p2)  }
   0x9   : > { %3917 = vmatprep.subr.bf16.mxu0 (!%p141_p2), %v4439_v3  ;;  %v4448_v18 = vld [vmem:[%s5212_s1 + $0x70] sm:$0xff] (!%p141_p2)   ;;  %v4450_v20 = vld [vmem:[%s5212_s1 + $0x78] sm:$0xff] (!%p141_p2)   ;;  %v4452_v22 = vld [vmem:[%s5212_s1] sm:$0xff] (!%p141_p2)  }
   0xa   : > { %v4449_v19 = vld [vmem:[%s5212_s1 + $0x130] sm:$0xff] (!%p141_p2)   ;;  %v4451_v21 = vld [vmem:[%s5212_s1 + $0x138] sm:$0xff] (!%p141_p2)   ;;  %v4453_v25 = vld [vmem:[%s5212_s1 + $0x140] sm:$0xff] (!%p141_p2)  }
   0xb   : > { %3726 = vmatpush3.bf16.msra.mxu1 (!%p141_p2), %v4438_v2  ;;  %v4454_v29 = vld [vmem:[%s5212_s1 + $0x148] sm:$0xff] (!%p141_p2)   ;;  %v4456_v34 = vld [vmem:[%s5212_s1 + $0x150] sm:$0xff] (!%p141_p2)   ;;  %v4457_v40 = vld [vmem:[%s5212_s1 + $0x158] sm:$0xff] (!%p141_p2)  }
   0xc   : > { %3918 = vmatpush3.bf16.msra.mxu0 (!%p141_p2), %v4439_v3  ;;  %3727 = vmatprep.subr.bf16.mxu1 (!%p141_p2), %v4440_v4  ;;  %v4455_v31 = vld [vmem:[%s5212_s1 + $0x8] sm:$0xff] (!%p141_p2)   ;;  %v4458_v36 = vld [vmem:[%s5212_s1 + $0x10] sm:$0xff] (!%p141_p2)   ;;  %v4461_v41 = vld [vmem:[%s5212_s1 + $0x18] sm:$0xff] (!%p141_p2)  }
   0xd   : > { %s5216_s13 = smov (!%p168_p3, %s3103_s13), 1  ;;  %3919 = vmatprep.subr.bf16.mxu0 %v4441_v5  ;;  %v4459_v44 = vld [vmem:[%s5212_s1 + $0x160] sm:$0xff]   ;;  %v4460_v50 = vld [vmem:[%s5212_s1 + $0x168] sm:$0xff]   ;;  %v4462_v54 = vld [vmem:[%s5212_s1 + $0x170] sm:$0xff]  }
   0xe   : > { %s4427_s30 = smul.u32 432, %s5216_s13  ;;  %v4464_v47 = vld [vmem:[%s5212_s1 + $0x20] sm:$0xff]   ;;  %v4466_v51 = vld [vmem:[%s5212_s1 + $0x28] sm:$0xff]   ;;  %v4468_v57 = vld [vmem:[%s5212_s1 + $0x30] sm:$0xff]   ;;  %s3111_s9 = sshll.u32 %s5216_s13, 3 }
   0xf   : > { %3728 = vmatpush3.bf16.msra.mxu1 %v4440_v4  ;;  %v4463_v60 = vld [vmem:[%s5212_s1 + $0x178] sm:$0xff]   ;;  %v4465_v4 = vld [vmem:[%s5212_s1 + $0x180] sm:$0xff]   ;;  %s181_s15 = scalar_lea.vmem %s5214_s3, %s3111_s9 }
  0x10   : > { %3920 = vmatpush3.bf16.msra.mxu0 %v4441_v5  ;;  %3729 = vmatprep.subr.bf16.mxu1 %v4442_v6  ;;  %s4588_s10 = scalar_lea.vmem %s5211_s0, %s4427_s30  ;;  %v4470_v0 = vld [vmem:[%s5212_s1 + $0x38] sm:$0xff]  }
  0x11   : > { %3921 = vmatprep.subr.bf16.mxu0 %v4443_v7  ;;  %v247_v12 = vld [vmem:[%s4588_s10 + $0x1] sm:$0xff]  ;;  %v248_v13 = vld [vmem:[%s4588_s10 + $0x9] sm:$0xff]  ;;  %v3224_v14 = vld [vmem:[%s4588_s10 + $0x19] sm:$0xff] }
  0x12   : > { %v279_v15 = vpack.c.bf16 %v248_v13, %v247_v12  ;;  %v3225_v16 = vld [vmem:[%s4588_s10 + $0x21] sm:$0xff]  ;;  %v3226_v23 = vld [vmem:[%s4588_s10 + $0x31] sm:$0xff]  ;;  %v3227_v24 = vld [vmem:[%s4588_s10 + $0x39] sm:$0xff] }
  0x13   : > { %3730 = vmatpush3.bf16.msra.mxu1 %v4442_v6  ;;  %v1375_v17 = vpack.c.bf16 %v3225_v16, %v3224_v14  ;;  %v3228_v26 = vld [vmem:[%s4588_s10 + $0x49] sm:$0xff]  ;;  %v3229_v27 = vld [vmem:[%s4588_s10 + $0x51] sm:$0xff]  ;;  %v1376_v28 = vpack.c.bf16 %v3227_v24, %v3226_v23  ;;  %v3230_v32 = vld [vmem:[%s4588_s10 + $0x61] sm:$0xff] }
  0x14   : > { %3922 = vmatpush3.bf16.msra.mxu0 %v4443_v7  ;;  %3731 = vmatprep.subr.bf16.mxu1 %v4444_v8  ;;  %v1377_v30 = vpack.c.bf16 %v3229_v27, %v3228_v26  ;;  %v3231_v33 = vld [vmem:[%s4588_s10 + $0x69] sm:$0xff]  ;;  %v3232_v35 = vld [vmem:[%s4588_s10 + $0x79] sm:$0xff]  ;;  %v3233_v37 = vld [vmem:[%s4588_s10 + $0x81] sm:$0xff] }
  0x15   : > { %3923 = vmatprep.subr.bf16.mxu0 %v4445_v9  ;;  %3739 = vmatprep.mubr.bf16.mxu1 %v279_v15  ;;  %v1378_v38 = vpack.c.bf16 %v3231_v33, %v3230_v32  ;;  %v1379_v39 = vpack.c.bf16 %v3233_v37, %v3232_v35  ;;  %v3234_v42 = vld [vmem:[%s4588_s10 + $0x91] sm:$0xff]  ;;  %v3235_v43 = vld [vmem:[%s4588_s10 + $0x99] sm:$0xff]  ;;  %v3236_v45 = vld [vmem:[%s4588_s10 + $0xa9] sm:$0xff] }
  0x16   : > { %3931 = vmatprep.mubr.bf16.mxu0 %v1375_v17  ;;  %v3237_v46 = vld [vmem:[%s4588_s10 + $0xb1] sm:$0xff]  ;;  %v1380_v48 = vpack.c.bf16 %v3235_v43, %v3234_v42  ;;  %v3238_v52 = vld [vmem:[%s4588_s10 + $0xc1] sm:$0xff]  ;;  %v3239_v53 = vld [vmem:[%s4588_s10 + $0xc9] sm:$0xff] }
  0x17   : > { %3732 = vmatpush3.bf16.msra.mxu1 %v4444_v8  ;;  %v4654_v49 = vpack.c.bf16 %v3237_v46, %v3236_v45  ;;  %v3280_v55 = vld [vmem:[%s4588_s10 + $0x1a] sm:$0xff]  ;;  %v3281_v56 = vld [vmem:[%s4588_s10 + $0x22] sm:$0xff]  ;;  %v1382_v58 = vpack.c.bf16 %v3239_v53, %v3238_v52  ;;  %v3282_v63 = vld [vmem:[%s4588_s10 + $0x32] sm:$0xff] }
  0x18   : > { %3924 = vmatpush3.bf16.msra.mxu0 %v4445_v9  ;;  %3733 = vmatprep.subr.bf16.mxu1 %v4446_v10  ;;  %v4673_v59 = vpack.c.bf16 %v3281_v56, %v3280_v55  ;;  %v265_v61 = vld [vmem:[%s4588_s10 + $0xd9] sm:$0xff]  ;;  %v266_v62 = vld [vmem:[%s4588_s10 + $0xe1] sm:$0xff]  ;;  %v267_v2 = vld [vmem:[%s4588_s10 + $0xf1] sm:$0xff] }
  0x19   : > { %3925 = vmatprep.subr.bf16.mxu0 %v4447_v11  ;;  %v3283_v1 = vld [vmem:[%s4588_s10 + $0x3a] sm:$0xff]  ;;  %v3284_v5 = vld [vmem:[%s4588_s10 + $0x4a] sm:$0xff]  ;;  %v3285_v6 = vld [vmem:[%s4588_s10 + $0x52] sm:$0xff]  ;;  %v4694_v7 = vpack.c.bf16 %v266_v62, %v265_v61 }
  0x1a   : > { %v268_v3 = vld [vmem:[%s4588_s10 + $0xf9] sm:$0xff]  ;;  %v4701_v9 = vpack.c.bf16 %v3283_v1, %v3282_v63  ;;  %v4467_v12 = vld [vmem:[%s5212_s1 + $0x188] sm:$0xff]   ;;  %v270_v14 = vld [vmem:[%s4588_s10 + $0x111] sm:$0xff] }
  0x1b   : > { %3734 = vmatpush3.bf16.msra.mxu1 %v4446_v10  ;;  %v4699_v8 = vld [vmem:[%s5212_s1 + $0x80] sm:$0xff]   ;;  %v4703_v10 = vpack.c.bf16 %v268_v3, %v267_v2  ;;  %v269_v13 = vld [vmem:[%s4588_s10 + $0x109] sm:$0xff]  ;;  %v4471_v27 = vld [vmem:[%s5212_s1 + $0x198] sm:$0xff]  }
  0x1c   : > { %3926 = vmatpush3.bf16.msra.mxu0 %v4447_v11  ;;  %3735 = vmatprep.subr.bf16.mxu1 %v4448_v18  ;;  %v4705_v11 = vpack.c.bf16 %v3285_v6, %v3284_v5  ;;  %v3286_v15 = vld [vmem:[%s4588_s10 + $0x62] sm:$0xff]  ;;  %v3287_v16 = vld [vmem:[%s4588_s10 + $0x6a] sm:$0xff]  ;;  %v273_v26 = vld [vmem:[%s4588_s10 + $0x139] sm:$0xff] }
  0x1d   : > { %3927 = vmatprep.subr.bf16.mxu0 %v4449_v19  ;;  %v4728_v23 = vpack.c.bf16 %v3287_v16, %v3286_v15  ;;  %v276_v32 = vld [vmem:[%s4588_s10 + $0x159] sm:$0xff]  ;;  %v3292_v33 = vld [vmem:[%s4588_s10 + $0xaa] sm:$0xff]  ;;  %v3294_v43 = vld [vmem:[%s4588_s10 + $0xc2] sm:$0xff] }
  0x1e   : > { %v4473_v35 = vld [vmem:[%s5212_s1 + $0x1a0] sm:$0xff]   ;;  %v4475_v42 = vld [vmem:[%s5212_s1 + $0x1a8] sm:$0xff]   ;;  %v185_v55 = vld [vmem:[%s4588_s10 + $0x18] sm:$0xff] }
  0x1f   : > { %3736 = vmatpush3.bf16.msra.mxu1 %v4448_v18  ;;  %v272_v18 = vld [vmem:[%s4588_s10 + $0x129] sm:$0xff]  ;;  %v183_v45 = vld [vmem:[%s4588_s10] sm:$0xff]  ;;  %v188_v62 = vld [vmem:[%s4588_s10 + $0x38] sm:$0xff] }
  0x20   : > { %3928 = vmatpush3.bf16.msra.mxu0 %v4449_v19  ;;  %3737 = vmatprep.subr.bf16.mxu1 %v4450_v20  ;;  %v3288_v19 = vld [vmem:[%s4588_s10 + $0x7a] sm:$0xff]  ;;  %v184_v46 = vld [vmem:[%s4588_s10 + $0x8] sm:$0xff]  ;;  %v187_v61 = vld [vmem:[%s4588_s10 + $0x30] sm:$0xff] }
  0x21   : > { %3929 = vmatprep.subr.bf16.mxu0 %v4451_v21  ;;  %v215_v53 = vpack.c.bf16 %v184_v46, %v183_v45  ;;  %v186_v56 = vld [vmem:[%s4588_s10 + $0x20] sm:$0xff]  ;;  %v3300_v63 = vld [vmem:[%s4588_s10 + $0x10a] sm:$0xff] }
  0x22   : > { %v4801_v1 = vld [vmem:[%s5212_s1 + $0x1c0] sm:$0xff]   ;;  %v4803_v2 = vpack.c.bf16 %v186_v56, %v185_v55  ;;  %v189_v6 = vld [vmem:[%s4588_s10 + $0x48] sm:$0xff] }
  0x23   : > { %3738 = vmatpush3.bf16.msra.mxu1 %v4450_v20  ;;  %v3289_v20 = vld [vmem:[%s4588_s10 + $0x82] sm:$0xff]  ;;  %v3303_v15 = vld [vmem:[%s4588_s10 + $0x12a] sm:$0xff] }
  0x24   : > { %3930 = vmatpush3.bf16.msra.mxu0 %v4451_v21  ;;  %3771 = vmatprep.subr.bf16.mxu1 %v4452_v22  ;;  %v4469_v21 = vld [vmem:[%s5212_s1 + $0x190] sm:$0xff]   ;;  %v191_v16 = vld [vmem:[%s4588_s10 + $0x60] sm:$0xff]  ;;  %v4482_v46 = vld [vmem:[%s5212_s1 + $0xa8] sm:$0xff]  }
  0x25   : > { %3963 = vmatprep.subr.bf16.mxu0 %v4453_v25  ;;  %v199_v55 = vld [vmem:[%s4588_s10 + $0xc0] sm:$0xff]  ;;  %v200_v56 = vld [vmem:[%s4588_s10 + $0xc8] sm:$0xff] }
  0x26   : > { %3740 = vmatmul.mubr.bf16.vlgmr.msra.gmra.mrb[0].mxu1 %v1375_v17  ;;  %v271_v17 = vld [vmem:[%s4588_s10 + $0x121] sm:$0xff] }
  0x27   : > { %3932 = vmatmul.mubr.bf16.vlgmr.msra.gmra.mrb[0].mxu0 %v1376_v28  ;;  %3772 = vmatpush3.bf16.msra.mxu1 %v4452_v22  ;;  %v4726_v22 = vpack.c.bf16 %v270_v14, %v269_v13  ;;  %v4730_v24 = vpack.c.bf16 %v272_v18, %v271_v17  ;;  %v4474_v13 = vld [vmem:[%s5212_s1 + $0x88] sm:$0xff]   ;;  %v3304_v18 = vld [vmem:[%s4588_s10 + $0x13a] sm:$0xff] }
  0x28   : > { %3964 = vmatpush3.bf16.msra.mxu0 %v4453_v25  ;;  %3743 = vmatprep.mubr.bf16.mxu1 %v1376_v28  ;;  %v4732_v25 = vpack.c.bf16 %v3289_v20, %v3288_v19  ;;  %v274_v28 = vld [vmem:[%s4588_s10 + $0x141] sm:$0xff]  ;;  %v4476_v19 = vld [vmem:[%s5212_s1 + $0x90] sm:$0xff]  }
  0x29   : > { %3965 = vmatprep.subr.bf16.mxu0 %v4454_v29  ;;  %3935 = vmatprep.mubr.bf16.mxu0 %v1377_v30  ;;  %v3302_v14 = vld [vmem:[%s4588_s10 + $0x122] sm:$0xff] }
  0x2a   : > { %3773 = vmatprep.subr.bf16.mxu1 %v4455_v31  ;;  %v192_v17 = vld [vmem:[%s4588_s10 + $0x68] sm:$0xff] }
  0x2b   : > { %3774 = vmatpush3.bf16.msra.mxu1 %v4455_v31  ;;  %v275_v31 = vld [vmem:[%s4588_s10 + $0x151] sm:$0xff]  ;;  %v3305_v20 = vld [vmem:[%s4588_s10 + $0x142] sm:$0xff] }
  0x2c   : > { %3966 = vmatpush3.bf16.msra.mxu0 %v4454_v29  ;;  %3775 = vmatprep.subr.bf16.mxu1 %v4458_v36  ;;  %v3290_v29 = vld [vmem:[%s4588_s10 + $0x92] sm:$0xff] }
  0x2d   : > { %3967 = vmatprep.subr.bf16.mxu0 %v4456_v34 }
  0x2e   : > { %3744 = vmatmul.mubr.bf16.gmra.mrb[4].mxu1 %v1377_v30  ;;  %v3291_v30 = vld [vmem:[%s4588_s10 + $0x9a] sm:$0xff] }
  0x2f   : > { %3936 = vmatmul.mubr.bf16.gmra.mrb[4].mxu0 %v1378_v38  ;;  %3747 = vmatprep.mubr.bf16.mxu1 %v1378_v38  ;;  %v4754_v37 = vpack.c.bf16 %v3291_v30, %v3290_v29  ;;  %v4756_v38 = vpack.c.bf16 %v276_v32, %v275_v31  ;;  %v194_v29 = vld [vmem:[%s4588_s10 + $0x80] sm:$0xff]  ;;  %v4478_v30 = vld [vmem:[%s5212_s1 + $0x98] sm:$0xff]  }
  0x30   : > { %3968 = vmatpush3.bf16.msra.mxu0 %v4456_v34  ;;  %3939 = vmatprep.mubr.bf16.mxu0 %v1379_v39  ;;  %v3293_v34 = vld [vmem:[%s4588_s10 + $0xb2] sm:$0xff]  ;;  %v3307_v32 = vld [vmem:[%s4588_s10 + $0x15a] sm:$0xff] }
  0x31   : > { %3969 = vmatprep.subr.bf16.mxu0 %v4457_v40  ;;  %3776 = vmatpush3.bf16.msra.mxu1 %v4458_v36  ;;  %v4752_v36 = vpack.c.bf16 %v274_v28, %v273_v26  ;;  %v4835_v26 = vpack.c.bf16 %v192_v17, %v191_v16  ;;  %v193_v28 = vld [vmem:[%s4588_s10 + $0x78] sm:$0xff]  ;;  %v4483_v16 = vld [vmem:[%s5212_s1 + $0x1c8] sm:$0xff]  }
  0x32   : > { %3777 = vmatprep.subr.bf16.mxu1 %v4461_v41  ;;  %v3306_v31 = vld [vmem:[%s4588_s10 + $0x152] sm:$0xff]  ;;  %v205_v17 = vld [vmem:[%s4588_s10 + $0x108] sm:$0xff] }
  0x34   : > { %3970 = vmatpush3.bf16.msra.mxu0 %v4457_v40  ;;  %v277_v40 = vld [vmem:[%s4588_s10 + $0x169] sm:$0xff] }
  0x35   : > { %3971 = vmatprep.subr.bf16.mxu0 %v4459_v44  ;;  %3778 = vmatpush3.bf16.msra.mxu1 %v4461_v41  ;;  %v278_v41 = vld [vmem:[%s4588_s10 + $0x171] sm:$0xff] }
  0x36   : > { %3748 = vmatmul.mubr.bf16.gmra.mrb[8].mxu1 %v1379_v39  ;;  %3779 = vmatprep.subr.bf16.mxu1 %v4464_v47  ;;  %v4758_v39 = vpack.c.bf16 %v3293_v34, %v3292_v33  ;;  %v195_v33 = vld [vmem:[%s4588_s10 + $0x90] sm:$0xff]  ;;  %v196_v34 = vld [vmem:[%s4588_s10 + $0x98] sm:$0xff] }
  0x37   : > { %3940 = vmatmul.mubr.bf16.gmra.mrb[8].mxu0 %v1380_v48  ;;  %3751 = vmatprep.mubr.bf16.mxu1 %v1380_v48  ;;  %v3297_v48 = vld [vmem:[%s4588_s10 + $0xe2] sm:$0xff] }
  0x38   : > { %3972 = vmatpush3.bf16.msra.mxu0 %v4459_v44  ;;  %3943 = vmatprep.mubr.bf16.mxu0 %v4654_v49  ;;  %v3295_v44 = vld [vmem:[%s4588_s10 + $0xca] sm:$0xff] }
  0x39   : > { %3973 = vmatprep.subr.bf16.mxu0 %v4460_v50  ;;  %3780 = vmatpush3.bf16.msra.mxu1 %v4464_v47  ;;  %v3296_v47 = vld [vmem:[%s4588_s10 + $0xda] sm:$0xff]  ;;  %v4780_v52 = vpack.c.bf16 %v3295_v44, %v3294_v43  ;;  %v4859_v43 = vpack.c.bf16 %v3307_v32, %v3306_v31  ;;  %v4861_v44 = vpack.c.bf16 %v196_v34, %v195_v33  ;;  %v211_v33 = vld [vmem:[%s4588_s10 + $0x150] sm:$0xff] }
  0x3a   : > { %3781 = vmatprep.subr.bf16.mxu1 %v4466_v51  ;;  %v209_v31 = vld [vmem:[%s4588_s10 + $0x138] sm:$0xff]  ;;  %v210_v32 = vld [vmem:[%s4588_s10 + $0x140] sm:$0xff] }
  0x3b   : > { %v212_v34 = vld [vmem:[%s4588_s10 + $0x158] sm:$0xff] }
  0x3c   : > { %3974 = vmatpush3.bf16.msra.mxu0 %v4460_v50  ;;  %v4477_v50 = vld [vmem:[%s5212_s1 + $0x1b0] sm:$0xff]  }
  0x3d   : > { %3975 = vmatprep.subr.bf16.mxu0 %v4462_v54  ;;  %3782 = vmatpush3.bf16.msra.mxu1 %v4466_v51  ;;  %v4778_v51 = vpack.c.bf16 %v278_v41, %v277_v40  ;;  %v3309_v40 = vld [vmem:[%s4588_s10 + $0x172] sm:$0xff]  ;;  %v4480_v41 = vld [vmem:[%s5212_s1 + $0xa0] sm:$0xff]  }
  0x3e   : > { %3752 = vmatmul.mubr.bf16.gmra.mrb[12].mxu1 %v4654_v49  ;;  %3783 = vmatprep.subr.bf16.mxu1 %v4468_v57 }
  0x3f   : > { %3944 = vmatmul.mubr.bf16.gmra.mrb[12].mxu0 %v1382_v58  ;;  %3755 = vmatprep.mubr.bf16.mxu1 %v1382_v58  ;;  %v3298_v58 = vld [vmem:[%s4588_s10 + $0xf2] sm:$0xff] }
  0x40   : > { %3976 = vmatpush3.bf16.msra.mxu0 %v4462_v54  ;;  %3979 = vmatprep.mubr.bf16.mxu0 %v4673_v59  ;;  %v4782_v54 = vpack.c.bf16 %v3297_v48, %v3296_v47  ;;  %v197_v47 = vld [vmem:[%s4588_s10 + $0xa8] sm:$0xff]  ;;  %v198_v48 = vld [vmem:[%s4588_s10 + $0xb0] sm:$0xff] }
  0x41   : > { %3977 = vmatprep.subr.bf16.mxu0 %v4463_v60  ;;  %3784 = vmatpush3.bf16.msra.mxu1 %v4468_v57  ;;  %v4479_v57 = vld [vmem:[%s5212_s1 + $0x1b8] sm:$0xff]  }
  0x42   : > { %3785 = vmatprep.subr.bf16.mxu1 %v4470_v0 }
  0x44   : > { %3978 = vmatpush3.bf16.msra.mxu0 %v4463_v60  ;;  %v3299_v60 = vld [vmem:[%s4588_s10 + $0xfa] sm:$0xff] }
  0x45   : > { %4011 = vmatprep.subr.bf16.mxu0 %v4465_v4  ;;  %3786 = vmatpush3.bf16.msra.mxu1 %v4470_v0  ;;  %v3301_v0 = vld [vmem:[%s4588_s10 + $0x112] sm:$0xff]  ;;  %v4805_v3 = vpack.c.bf16 %v3299_v60, %v3298_v58  ;;  %v4881_v58 = vpack.c.bf16 %v198_v48, %v197_v47  ;;  %v213_v47 = vld [vmem:[%s4588_s10 + $0x168] sm:$0xff] }
  0x46   : > { %3756 = vmatmul.mubr.bf16.gmra.mrb[16].mxu1 %v4694_v7  ;;  %3819 = vmatprep.subr.bf16.mxu1 %v4699_v8  ;;  %v4809_v5 = vpack.c.bf16 %v3301_v0, %v3300_v63  ;;  %v201_v63 = vld [vmem:[%s4588_s10 + $0xd8] sm:$0xff]  ;;  %v202_v0 = vld [vmem:[%s4588_s10 + $0xe0] sm:$0xff]  ;;  %v214_v48 = vld [vmem:[%s4588_s10 + $0x170] sm:$0xff] }
  0x47   : > { %3980 = vmatmul.mubr.bf16.vlgmr.msra.gmra.mrb[0].mxu0 %v4701_v9  ;;  %3759 = vmatprep.mubr.bf16.mxu1 %v4703_v10 }
  0x48   : > { %4012 = vmatpush3.bf16.msra.mxu0 %v4465_v4  ;;  %3983 = vmatprep.mubr.bf16.mxu0 %v4705_v11  ;;  %v4807_v4 = vpack.c.bf16 %v188_v62, %v187_v61  ;;  %v4883_v61 = vpack.c.bf16 %v200_v56, %v199_v55  ;;  %v4486_v62 = vld [vmem:[%s5212_s1 + $0xb8] sm:$0xff]   ;;  %v4493_v55 = vld [vmem:[%s5212_s1 + $0x1f0] sm:$0xff]   ;;  %v4956_v56 = vpack.c.bf16 %v214_v48, %v213_v47 }
  0x49   : > { %4013 = vmatprep.subr.bf16.mxu0 %v4467_v12  ;;  %v3400_v47 = vld [vmem:[%s4588_s10 + $0x91] sm:$0xff]  ;;  %v3401_v48 = vld [vmem:[%s4588_s10 + $0x99] sm:$0xff] }
  0x4c   : > { %4014 = vmatpush3.bf16.msra.mxu0 %v4467_v12  ;;  %v190_v12 = vld [vmem:[%s4588_s10 + $0x50] sm:$0xff] }
  0x4d   : > { %4015 = vmatprep.subr.bf16.mxu0 %v4469_v21 }
  0x4e   : > { %3760 = vmatmul.mubr.bf16.gmra.mrb[20].mxu1 %v4726_v22 }
  0x4f   : > { %3984 = vmatmul.mubr.bf16.gmra.mrb[4].mxu0 %v4728_v23  ;;  %3763 = vmatprep.mubr.bf16.mxu1 %v4730_v24 }
  0x50   : > { %3987 = vmatprep.mubr.bf16.mxu0 %v4732_v25  ;;  %4016 = vmatpush3.bf16.msra.mxu0 %v4469_v21  ;;  %v4831_v21 = vpack.c.bf16 %v190_v12, %v189_v6  ;;  %v203_v6 = vld [vmem:[%s4588_s10 + $0xf0] sm:$0xff]  ;;  %v204_v12 = vld [vmem:[%s4588_s10 + $0xf8] sm:$0xff] }
  0x51   : > { %4017 = vmatprep.subr.bf16.mxu0 %v4471_v27 }
  0x54   : > { %4018 = vmatpush3.bf16.msra.mxu0 %v4471_v27  ;;  %v4837_v27 = vpack.c.bf16 %v3305_v20, %v3304_v18  ;;  %v206_v18 = vld [vmem:[%s4588_s10 + $0x110] sm:$0xff]  ;;  %v208_v20 = vld [vmem:[%s4588_s10 + $0x128] sm:$0xff] }
  0x55   : > { %4019 = vmatprep.subr.bf16.mxu0 %v4473_v35 }
  0x56   : > { %3764 = vmatmul.mubr.bf16.gmra.mrb[24].mxu1 %v4752_v36 }
  0x57   : > { %3988 = vmatmul.mubr.bf16.gmra.mrb[8].mxu0 %v4754_v37  ;;  %3767 = vmatprep.mubr.bf16.mxu1 %v4756_v38 }
  0x58   : > { %3991 = vmatprep.mubr.bf16.mxu0 %v4758_v39  ;;  %4020 = vmatpush3.bf16.msra.mxu0 %v4473_v35  ;;  %v3308_v35 = vld [vmem:[%s4588_s10 + $0x16a] sm:$0xff] }
  0x59   : > { %4021 = vmatprep.subr.bf16.mxu0 %v4475_v42  ;;  %v4863_v45 = vpack.c.bf16 %v3309_v40, %v3308_v35  ;;  %v4489_v35 = vld [vmem:[%s5212_s1 + $0x1e0] sm:$0xff]   ;;  %v4938_v40 = vpack.c.bf16 %v210_v32, %v209_v31  ;;  %v3397_v32 = vld [vmem:[%s4588_s10 + $0x69] sm:$0xff] }
  0x5a   : > { %v3396_v31 = vld [vmem:[%s4588_s10 + $0x61] sm:$0xff] }
  0x5c   : > { %4022 = vmatpush3.bf16.msra.mxu0 %v4475_v42  ;;  %v4857_v42 = vpack.c.bf16 %v194_v29, %v193_v28  ;;  %v4485_v28 = vld [vmem:[%s5212_s1 + $0x1d0] sm:$0xff]   ;;  %v4920_v29 = vpack.c.bf16 %v206_v18, %v205_v17  ;;  %v3393_v18 = vld [vmem:[%s4588_s10 + $0x39] sm:$0xff] }
  0x5d   : > { %4023 = vmatprep.subr.bf16.mxu0 %v4477_v50  ;;  %v3392_v17 = vld [vmem:[%s4588_s10 + $0x31] sm:$0xff] }
  0x5e   : > { %3768 = vmatmul.mubr.bf16.gmra.mrb[28].mxu1 %v4778_v51 }
  0x5f   : > { %3992 = vmatmul.mubr.bf16.gmra.mrb[12].mxu0 %v4780_v52  ;;  %3787 = vmatprep.mubr.bf16.mxu1 %v215_v53  ;;  %v3311_v53 = vld [vmem:[%s4588_s10 + $0x18a] sm:$0xff] }
  0x60   : > { %3995 = vmatprep.mubr.bf16.mxu0 %v4782_v54  ;;  %4024 = vmatpush3.bf16.msra.mxu0 %v4477_v50  ;;  %v3310_v50 = vld [vmem:[%s4588_s10 + $0x182] sm:$0xff] }
  0x61   : > { %4025 = vmatprep.subr.bf16.mxu0 %v4479_v57  ;;  %v1696_v60 = vpack.c.bf16 %v3311_v53, %v3310_v50  ;;  %v730_v50 = vld [vmem:[%s4588_s10 + $0x2] sm:$0xff]  ;;  %v731_v53 = vld [vmem:[%s4588_s10 + $0xa] sm:$0xff] }
  0x64   : > { %4026 = vmatpush3.bf16.msra.mxu0 %v4479_v57  ;;  %v4484_v57 = vld [vmem:[%s5212_s1 + $0xb0] sm:$0xff]  }
  0x65   : > { %4059 = vmatprep.subr.bf16.mxu0 %v4801_v1 }
  0x66   : > { %3788 = vmatmul.mubr.bf16.vlgmr.msra.gmra.mrb[0].mxu1 %v4803_v2 }
  0x67   : > { %3996 = vmatmul.mubr.bf16.gmra.mrb[16].mxu0 %v4805_v3  ;;  %3820 = vmatpush3.bf16.msra.mxu1 %v4699_v8  ;;  %v4833_v8 = vpack.c.bf16 %v3303_v15, %v3302_v14  ;;  %v4900_v14 = vpack.c.bf16 %v202_v0, %v201_v63  ;;  %v4902_v15 = vpack.c.bf16 %v204_v12, %v203_v6  ;;  %v4490_v63 = vld [vmem:[%s5212_s1 + $0xc8] sm:$0xff]   ;;  %v4492_v0 = vld [vmem:[%s5212_s1 + $0xd0] sm:$0xff]   ;;  %v4496_v12 = vld [vmem:[%s5212_s1 + $0xe0] sm:$0xff]  }
  0x68   : > { %3791 = vmatprep.mubr.bf16.mxu1 %v4807_v4  ;;  %3999 = vmatprep.mubr.bf16.mxu0 %v4809_v5  ;;  %v3365_v6 = vld [vmem:[%s4588_s10 + $0x188] sm:$0xff] }
  0x69   : > { %3821 = vmatprep.subr.bf16.mxu1 %v4474_v13 }
  0x6b   : > { %3822 = vmatpush3.bf16.msra.mxu1 %v4474_v13  ;;  %v4898_v13 = vld [vmem:[%s5212_s1 + $0xc0] sm:$0xff]  }
  0x6c   : > { %3823 = vmatprep.subr.bf16.mxu1 %v4476_v19 }
  0x6e   : > { %3792 = vmatmul.mubr.bf16.gmra.mrb[4].mxu1 %v4831_v21 }
  0x6f   : > { %4000 = vmatmul.mubr.bf16.gmra.mrb[20].mxu0 %v4833_v8  ;;  %3795 = vmatprep.mubr.bf16.mxu1 %v4835_v26 }
  0x70   : > { %4003 = vmatprep.mubr.bf16.mxu0 %v4837_v27  ;;  %3824 = vmatpush3.bf16.msra.mxu1 %v4476_v19  ;;  %v207_v19 = vld [vmem:[%s4588_s10 + $0x120] sm:$0xff] }
  0x71   : > { %3825 = vmatprep.subr.bf16.mxu1 %v4478_v30 }
  0x74   : > { %3826 = vmatpush3.bf16.msra.mxu1 %v4478_v30  ;;  %v4922_v30 = vpack.c.bf16 %v208_v20, %v207_v19  ;;  %v2294_v20 = vpack.c.bf16 %v3393_v18, %v3392_v17  ;;  %v3460_v17 = vld [vmem:[%s4588_s10 + $0xc2] sm:$0xff]  ;;  %v3461_v18 = vld [vmem:[%s4588_s10 + $0xca] sm:$0xff] }
  0x75   : > { %3827 = vmatprep.subr.bf16.mxu1 %v4480_v41 }
  0x76   : > { %3796 = vmatmul.mubr.bf16.gmra.mrb[8].mxu1 %v4857_v42 }
  0x77   : > { %4004 = vmatmul.mubr.bf16.gmra.mrb[24].mxu0 %v4859_v43  ;;  %3799 = vmatprep.mubr.bf16.mxu1 %v4861_v44 }
  0x78   : > { %4007 = vmatprep.mubr.bf16.mxu0 %v4863_v45  ;;  %3828 = vmatpush3.bf16.msra.mxu1 %v4480_v41  ;;  %v4940_v41 = vpack.c.bf16 %v212_v34, %v211_v33  ;;  %v2296_v34 = vpack.c.bf16 %v3397_v32, %v3396_v31 }
  0x79   : > { %3829 = vmatprep.subr.bf16.mxu1 %v4482_v46 }
  0x7c   : > { %3830 = vmatpush3.bf16.msra.mxu1 %v4482_v46  ;;  %v4491_v46 = vld [vmem:[%s5212_s1 + $0x1e8] sm:$0xff]  }
  0x7d   : > { %3831 = vmatprep.subr.bf16.mxu1 %v4484_v57 }
  0x7e   : > { %3800 = vmatmul.mubr.bf16.gmra.mrb[12].mxu1 %v4881_v58 }
  0x7f   : > { %4008 = vmatmul.mubr.bf16.gmra.mrb[28].mxu0 %v1696_v60  ;;  %3803 = vmatprep.mubr.bf16.mxu1 %v4883_v61  ;;  %v4495_v60 = vld [vmem:[%s5212_s1 + $0x1f8] sm:$0xff]  }
  0x80   : > { %4027 = vmatprep.mubr.bf16.mxu0 %v4807_v4  ;;  %3832 = vmatpush3.bf16.msra.mxu1 %v4484_v57  ;;  %v762_v57 = vpack.c.bf16 %v731_v53, %v730_v50  ;;  %v4501_v50 = vld [vmem:[%s5212_s1 + $0x210] sm:$0xff]  }
  0x81   : > { %3833 = vmatprep.subr.bf16.mxu1 %v4486_v62 }
  0x84   : > { %3834 = vmatpush3.bf16.msra.mxu1 %v4486_v62  ;;  %v4497_v62 = vld [vmem:[%s5212_s1 + $0x200] sm:$0xff]  }
  0x85   : > { %3867 = vmatprep.subr.bf16.mxu1 %v4898_v13 }
  0x86   : > { %3804 = vmatmul.mubr.bf16.gmra.mrb[16].mxu1 %v4900_v14 }
  0x87   : > { %4028 = vmatmul.mubr.bf16.vlgmr.msra.gmra.mrb[0].mxu0 %v4831_v21  ;;  %3807 = vmatprep.mubr.bf16.mxu1 %v4902_v15 }
  0x88   : > { %4060 = vmatpush3.bf16.msra.mxu0 %v4801_v1  ;;  %4031 = vmatprep.mubr.bf16.mxu0 %v4835_v26  ;;  %v4487_v1 = vld [vmem:[%s5212_s1 + $0x1d8] sm:$0xff]  }
  0x89   : > { %4061 = vmatprep.subr.bf16.mxu0 %v4483_v16 }
  0x8c   : > { %4062 = vmatpush3.bf16.msra.mxu0 %v4483_v16  ;;  %v3367_v16 = vld [vmem:[%s4588_s10 + $0x1a0] sm:$0xff] }
  0x8d   : > { %4063 = vmatprep.subr.bf16.mxu0 %v4485_v28 }
  0x8e   : > { %3808 = vmatmul.mubr.bf16.gmra.mrb[20].mxu1 %v4920_v29 }
  0x8f   : > { %4032 = vmatmul.mubr.bf16.gmra.mrb[4].mxu0 %v4857_v42  ;;  %3811 = vmatprep.mubr.bf16.mxu1 %v4922_v30 }
  0x90   : > { %4035 = vmatprep.mubr.bf16.mxu0 %v4861_v44  ;;  %4064 = vmatpush3.bf16.msra.mxu0 %v4485_v28  ;;  %v3394_v28 = vld [vmem:[%s4588_s10 + $0x49] sm:$0xff] }
  0x91   : > { %4065 = vmatprep.subr.bf16.mxu0 %v4487_v1 }
  0x94   : > { %4066 = vmatpush3.bf16.msra.mxu0 %v4487_v1  ;;  %v3395_v1 = vld [vmem:[%s4588_s10 + $0x51] sm:$0xff] }
  0x95   : > { %4067 = vmatprep.subr.bf16.mxu0 %v4489_v35  ;;  %v2295_v33 = vpack.c.bf16 %v3395_v1, %v3394_v28  ;;  %v3464_v28 = vld [vmem:[%s4588_s10 + $0xf2] sm:$0xff]  ;;  %v3465_v1 = vld [vmem:[%s4588_s10 + $0xfa] sm:$0xff] }
  0x96   : > { %3812 = vmatmul.mubr.bf16.gmra.mrb[24].mxu1 %v4938_v40  ;;  %v2608_v32 = vpack.c.bf16 %v3465_v1, %v3464_v28 }
  0x97   : > { %4036 = vmatmul.mubr.bf16.gmra.mrb[8].mxu0 %v4881_v58  ;;  %3815 = vmatprep.mubr.bf16.mxu1 %v4940_v41 }
  0x98   : > { %4039 = vmatprep.mubr.bf16.mxu0 %v4883_v61  ;;  %4068 = vmatpush3.bf16.msra.mxu0 %v4489_v35  ;;  %v3398_v35 = vld [vmem:[%s4588_s10 + $0x79] sm:$0xff] }
  0x99   : > { %4069 = vmatprep.subr.bf16.mxu0 %v4491_v46 }
  0x9c   : > { %4070 = vmatpush3.bf16.msra.mxu0 %v4491_v46  ;;  %v3399_v46 = vld [vmem:[%s4588_s10 + $0x81] sm:$0xff] }
  0x9d   : > { %4071 = vmatprep.subr.bf16.mxu0 %v4493_v55  ;;  %v2297_v53 = vpack.c.bf16 %v3399_v46, %v3398_v35  ;;  %v3245_v35 = vld [vmem:[%s4588_s10 + $0x111] sm:$0xff]  ;;  %v3468_v46 = vld [vmem:[%s4588_s10 + $0x122] sm:$0xff] }
  0x9e   : > { %3816 = vmatmul.mubr.bf16.gmra.mrb[28].mxu1 %v4956_v56 }
  0x9f   : > { %4040 = vmatmul.mubr.bf16.gmra.mrb[12].mxu0 %v4900_v14  ;;  %3835 = vmatprep.mubr.bf16.mxu1 %v762_v57  ;;  %v3405_v57 = vld [vmem:[%s4588_s10 + $0xc9] sm:$0xff] }
  0xa0   : > { %4043 = vmatprep.mubr.bf16.mxu0 %v4902_v15  ;;  %4072 = vmatpush3.bf16.msra.mxu0 %v4493_v55  ;;  %v2298_v55 = vpack.c.bf16 %v3401_v48, %v3400_v47  ;;  %v3469_v47 = vld [vmem:[%s4588_s10 + $0x12a] sm:$0xff] }
  0xa1   : > { %4073 = vmatprep.subr.bf16.mxu0 %v4495_v60 }
  0xa4   : > { %4074 = vmatpush3.bf16.msra.mxu0 %v4495_v60  ;;  %v4504_v60 = vld [vmem:[%s5212_s1 + $0x220] sm:$0xff]  }
  0xa5   : > { %4107 = vmatprep.subr.bf16.mxu0 %v4497_v62 }
  0xa6   : > { %3836 = vmatmul.mubr.bf16.vlgmr.msra.gmra.mrb[0].mxu1 %v4673_v59  ;;  %v4494_v59 = vld [vmem:[%s5212_s1 + $0xd8] sm:$0xff]  }
  0xa7   : > { %4044 = vmatmul.mubr.bf16.gmra.mrb[16].mxu0 %v4920_v29  ;;  %3868 = vmatpush3.bf16.msra.mxu1 %v4898_v13 }
  0xa8   : > { %3839 = vmatprep.mubr.bf16.mxu1 %v4701_v9  ;;  %4047 = vmatprep.mubr.bf16.mxu0 %v4922_v30  ;;  %v3364_v9 = vld [vmem:[%s4588_s10 + $0x180] sm:$0xff] }
  0xa9   : > { %3869 = vmatprep.subr.bf16.mxu1 %v4490_v63  ;;  %v4990_v13 = vpack.c.bf16 %v3365_v6, %v3364_v9  ;;  %v3455_v6 = vld [vmem:[%s4588_s10 + $0x82] sm:$0xff] }
  0xab   : > { %3870 = vmatpush3.bf16.msra.mxu1 %v4490_v63  ;;  %v4505_v63 = vld [vmem:[%s5212_s1 + $0x228] sm:$0xff]  }
  0xac   : > { %3871 = vmatprep.subr.bf16.mxu1 %v4492_v0 }
  0xae   : > { %3840 = vmatmul.mubr.bf16.gmra.mrb[4].mxu1 %v4705_v11  ;;  %v4498_v11 = vld [vmem:[%s5212_s1 + $0xe8] sm:$0xff]  }
  0xaf   : > { %4048 = vmatmul.mubr.bf16.gmra.mrb[20].mxu0 %v4938_v40  ;;  %3843 = vmatprep.mubr.bf16.mxu1 %v4728_v23  ;;  %v3366_v23 = vld [vmem:[%s4588_s10 + $0x198] sm:$0xff] }
  0xb0   : > { %4051 = vmatprep.mubr.bf16.mxu0 %v4940_v41  ;;  %3872 = vmatpush3.bf16.msra.mxu1 %v4492_v0  ;;  %v2003_v19 = vpack.c.bf16 %v3367_v16, %v3366_v23  ;;  %v3453_v0 = vld [vmem:[%s4588_s10 + $0x6a] sm:$0xff] }
  0xb1   : > { %3873 = vmatprep.subr.bf16.mxu1 %v4494_v59 }
  0xb4   : > { %3874 = vmatpush3.bf16.msra.mxu1 %v4494_v59  ;;  %v4515_v59 = vld [vmem:[%s5212_s1 + $0x138] sm:$0xff]  }
  0xb5   : > { %3875 = vmatprep.subr.bf16.mxu1 %v4496_v12 }
  0xb6   : > { %3844 = vmatmul.mubr.bf16.gmra.mrb[8].mxu1 %v4732_v25  ;;  %v4500_v25 = vld [vmem:[%s5212_s1 + $0xf0] sm:$0xff]  }
  0xb7   : > { %4052 = vmatmul.mubr.bf16.gmra.mrb[24].mxu0 %v4956_v56  ;;  %3847 = vmatprep.mubr.bf16.mxu1 %v4754_v37  ;;  %v4502_v37 = vld [vmem:[%s5212_s1 + $0xf8] sm:$0xff]  }
  0xb8   : > { %4055 = vmatprep.mubr.bf16.mxu0 %v4990_v13  ;;  %3876 = vmatpush3.bf16.msra.mxu1 %v4496_v12  ;;  %v3456_v12 = vld [vmem:[%s4588_s10 + $0x92] sm:$0xff] }
  0xb9   : > { %3877 = vmatprep.subr.bf16.mxu1 %v4498_v11 }
  0xbc   : > { %3878 = vmatpush3.bf16.msra.mxu1 %v4498_v11  ;;  %v3457_v11 = vld [vmem:[%s4588_s10 + $0x9a] sm:$0xff] }
  0xbd   : > { %3879 = vmatprep.subr.bf16.mxu1 %v4500_v25  ;;  %v2604_v16 = vpack.c.bf16 %v3457_v11, %v3456_v12 }
  0xbe   : > { %3848 = vmatmul.mubr.bf16.gmra.mrb[12].mxu1 %v4758_v39  ;;  %v4499_v39 = vld [vmem:[%s5212_s1 + $0x208] sm:$0xff]  }
  0xbf   : > { %4056 = vmatmul.mubr.bf16.gmra.mrb[28].mxu0 %v2003_v19  ;;  %3851 = vmatprep.mubr.bf16.mxu1 %v4780_v52  ;;  %v4508_v52 = vld [vmem:[%s5212_s1 + $0x100] sm:$0xff]   ;;  %v2606_v19 = vpack.c.bf16 %v3461_v18, %v3460_v17 }
  0xc0   : > { %4075 = vmatprep.mubr.bf16.mxu0 %v2294_v20  ;;  %3880 = vmatpush3.bf16.msra.mxu1 %v4500_v25  ;;  %v3240_v20 = vld [vmem:[%s4588_s10 + $0xd9] sm:$0xff] }
  0xc1   : > { %3881 = vmatprep.subr.bf16.mxu1 %v4502_v37 }
  0xc4   : > { %3882 = vmatpush3.bf16.msra.mxu1 %v4502_v37  ;;  %v3241_v37 = vld [vmem:[%s4588_s10 + $0xe1] sm:$0xff] }
  0xc5   : > { %4155 = vmatprep.subr.bf16.mxu1 %v4508_v52 }
  0xc6   : > { %3852 = vmatmul.mubr.bf16.gmra.mrb[16].mxu1 %v4782_v54  ;;  %v4503_v54 = vld [vmem:[%s5212_s1 + $0x218] sm:$0xff]  }
  0xc7   : > { %4076 = vmatmul.mubr.bf16.vlgmr.msra.gmra.mrb[0].mxu0 %v2295_v33  ;;  %3855 = vmatprep.mubr.bf16.mxu1 %v4805_v3  ;;  %v3404_v3 = vld [vmem:[%s4588_s10 + $0xc1] sm:$0xff]  ;;  %v3243_v33 = vld [vmem:[%s4588_s10 + $0xf9] sm:$0xff] }
  0xc8   : > { %4108 = vmatpush3.bf16.msra.mxu0 %v4497_v62  ;;  %4079 = vmatprep.mubr.bf16.mxu0 %v2296_v34  ;;  %v2300_v62 = vpack.c.bf16 %v3405_v57, %v3404_v3  ;;  %v3466_v34 = vld [vmem:[%s4588_s10 + $0x10a] sm:$0xff]  ;;  %v3470_v3 = vld [vmem:[%s4588_s10 + $0x13a] sm:$0xff]  ;;  %v3471_v57 = vld [vmem:[%s4588_s10 + $0x142] sm:$0xff] }
  0xc9   : > { %4109 = vmatprep.subr.bf16.mxu0 %v4499_v39 }
  0xcc   : > { %4110 = vmatpush3.bf16.msra.mxu0 %v4499_v39  ;;  %v3467_v39 = vld [vmem:[%s4588_s10 + $0x112] sm:$0xff] }
  0xcd   : > { %4111 = vmatprep.subr.bf16.mxu0 %v4501_v50  ;;  %v2609_v48 = vpack.c.bf16 %v3467_v39, %v3466_v34 }
  0xce   : > { %3856 = vmatmul.mubr.bf16.gmra.mrb[20].mxu1 %v4809_v5  ;;  %v4506_v5 = vld [vmem:[%s5212_s1 + $0x230] sm:$0xff]  }
  0xcf   : > { %4080 = vmatmul.mubr.bf16.gmra.mrb[4].mxu0 %v2297_v53  ;;  %3859 = vmatprep.mubr.bf16.mxu1 %v4833_v8  ;;  %v4507_v8 = vld [vmem:[%s5212_s1 + $0x238] sm:$0xff]   ;;  %v2610_v53 = vpack.c.bf16 %v3469_v47, %v3468_v46 }
  0xd0   : > { %4083 = vmatprep.mubr.bf16.mxu0 %v2298_v55  ;;  %4112 = vmatpush3.bf16.msra.mxu0 %v4501_v50  ;;  %v3246_v55 = vld [vmem:[%s4588_s10 + $0x121] sm:$0xff] }
  0xd1   : > { %4113 = vmatprep.subr.bf16.mxu0 %v4503_v54 }
  0xd4   : > { %4114 = vmatpush3.bf16.msra.mxu0 %v4503_v54  ;;  %v3247_v54 = vld [vmem:[%s4588_s10 + $0x129] sm:$0xff] }
  0xd5   : > { %4115 = vmatprep.subr.bf16.mxu0 %v4504_v60 }
  0xd6   : > { %3860 = vmatmul.mubr.bf16.gmra.mrb[24].mxu1 %v4837_v27  ;;  %v4513_v27 = vld [vmem:[%s5212_s1 + $0x128] sm:$0xff]  }
  0xd7   : > { %4084 = vmatmul.mubr.bf16.gmra.mrb[8].mxu0 %v4654_v49  ;;  %3863 = vmatprep.mubr.bf16.mxu1 %v4859_v43  ;;  %v4509_v49 = vld [vmem:[%s5212_s1 + $0x108] sm:$0xff]   ;;  %v4514_v43 = vld [vmem:[%s5212_s1 + $0x130] sm:$0xff]  }
  0xd8   : > { %4087 = vmatprep.mubr.bf16.mxu0 %v2300_v62  ;;  %4116 = vmatpush3.bf16.msra.mxu0 %v4504_v60  ;;  %v3248_v60 = vld [vmem:[%s4588_s10 + $0x139] sm:$0xff]  ;;  %v3249_v62 = vld [vmem:[%s4588_s10 + $0x141] sm:$0xff] }
  0xd9   : > { %4117 = vmatprep.subr.bf16.mxu0 %v4505_v63 }
  0xdc   : > { %4118 = vmatpush3.bf16.msra.mxu0 %v4505_v63  ;;  %v3472_v63 = vld [vmem:[%s4588_s10 + $0x152] sm:$0xff] }
  0xdd   : > { %4119 = vmatprep.subr.bf16.mxu0 %v4506_v5 }
  0xde   : > { %3864 = vmatmul.mubr.bf16.gmra.mrb[28].mxu1 %v4863_v45  ;;  %v3451_v45 = vld [vmem:[%s4588_s10 + $0x52] sm:$0xff] }
  0xdf   : > { %4088 = vmatmul.mubr.bf16.gmra.mrb[12].mxu0 %v4694_v7  ;;  %3883 = vmatprep.mubr.bf16.mxu1 %v4803_v2  ;;  %v4510_v7 = vld [vmem:[%s5212_s1 + $0x110] sm:$0xff]  }
  0xe0   : > { %4091 = vmatprep.mubr.bf16.mxu0 %v4703_v10  ;;  %4120 = vmatpush3.bf16.msra.mxu0 %v4506_v5  ;;  %v3420_v10 = vld [vmem:[%s4588_s10 + $0x181] sm:$0xff] }
  0xe1   : > { %4121 = vmatprep.subr.bf16.mxu0 %v4507_v8  ;;  %v3473_v5 = vld [vmem:[%s4588_s10 + $0x15a] sm:$0xff] }
  0xe4   : > { %4122 = vmatpush3.bf16.msra.mxu0 %v4507_v8  ;;  %v1386_v8 = vpack.c.bf16 %v3247_v54, %v3246_v55 }
  0xe6   : > { %3884 = vmatmul.mubr.bf16.vlgmr.msra.gmra.mrb[0].mxu1 %v4807_v4  ;;  %v3423_v4 = vld [vmem:[%s4588_s10 + $0x1a1] sm:$0xff] }
  0xe7   : > { %4092 = vmatmul.mubr.bf16.gmra.mrb[16].mxu0 %v4726_v22  ;;  %4163 = vmatpush3.bf16.msra.mxu1 %v4508_v52  ;;  %v3421_v22 = vld [vmem:[%s4588_s10 + $0x189] sm:$0xff] }
  0xe8   : > { %3887 = vmatprep.mubr.bf16.mxu1 %v4831_v21  ;;  %4095 = vmatprep.mubr.bf16.mxu0 %v4730_v24  ;;  %v4511_v24 = vld [vmem:[%s5212_s1 + $0x118] sm:$0xff]   ;;  %v5075_v2 = vpack.c.bf16 %v3421_v22, %v3420_v10  ;;  %v3244_v52 = vld [vmem:[%s4588_s10 + $0x109] sm:$0xff]  ;;  %v2612_v10 = vpack.c.bf16 %v3473_v5, %v3472_v63 }
  0xe9   : > { %4156 = vmatprep.subr.bf16.mxu1 %v4509_v49  ;;  %v3448_v21 = vld [vmem:[%s4588_s10 + $0x32] sm:$0xff]  ;;  %v1385_v50 = vpack.c.bf16 %v3245_v35, %v3244_v52 }
  0xea   : > { %v3250_v22 = vld [vmem:[%s4588_s10 + $0x151] sm:$0xff] }
  0xeb   : > { %4164 = vmatpush3.bf16.msra.mxu1 %v4509_v49  ;;  %v2611_v49 = vpack.c.bf16 %v3471_v57, %v3470_v3 }
  0xec   : > { %4157 = vmatprep.subr.bf16.mxu1 %v4510_v7 }
  0xee   : > { %3888 = vmatmul.mubr.bf16.gmra.mrb[4].mxu1 %v4835_v26  ;;  %v3449_v26 = vld [vmem:[%s4588_s10 + $0x3a] sm:$0xff] }
  0xef   : > { %4096 = vmatmul.mubr.bf16.gmra.mrb[20].mxu0 %v4752_v36  ;;  %3891 = vmatprep.mubr.bf16.mxu1 %v4857_v42  ;;  %v4512_v36 = vld [vmem:[%s5212_s1 + $0x120] sm:$0xff]  }
  0xf0   : > { %4099 = vmatprep.mubr.bf16.mxu0 %v4756_v38  ;;  %4165 = vmatpush3.bf16.msra.mxu1 %v4510_v7  ;;  %v3422_v38 = vld [vmem:[%s4588_s10 + $0x199] sm:$0xff]  ;;  %v1387_v7 = vpack.c.bf16 %v3249_v62, %v3248_v60 }
  0xf1   : > { %4158 = vmatprep.subr.bf16.mxu1 %v4511_v24  ;;  %v2309_v42 = vpack.c.bf16 %v3423_v4, %v3422_v38  ;;  %v3475_v38 = vld [vmem:[%s4588_s10 + $0x172] sm:$0xff]  ;;  %v3252_v4 = vld [vmem:[%s4588_s10 + $0x169] sm:$0xff] }
  0xf4   : > { %4166 = vmatpush3.bf16.msra.mxu1 %v4511_v24  ;;  %v3251_v24 = vld [vmem:[%s4588_s10 + $0x159] sm:$0xff] }
  0xf5   : > { %4159 = vmatprep.subr.bf16.mxu1 %v4512_v36 }
  0xf6   : > { %3892 = vmatmul.mubr.bf16.gmra.mrb[8].mxu1 %v4861_v44  ;;  %v3450_v44 = vld [vmem:[%s4588_s10 + $0x4a] sm:$0xff] }
  0xf7   : > { %4100 = vmatmul.mubr.bf16.gmra.mrb[24].mxu0 %v4778_v51  ;;  %3895 = vmatprep.mubr.bf16.mxu1 %v4881_v58  ;;  %v2600_v51 = vpack.c.bf16 %v3449_v26, %v3448_v21  ;;  %v3452_v58 = vld [vmem:[%s4588_s10 + $0x62] sm:$0xff]  ;;  %v2601_v9 = vpack.c.bf16 %v3451_v45, %v3450_v44  ;;  %v3253_v21 = vld [vmem:[%s4588_s10 + $0x171] sm:$0xff]  ;;  %v3478_v45 = vld [vmem:[%s4588_s10 + $0x19a] sm:$0xff] }
  0xf8   : > { %4103 = vmatprep.mubr.bf16.mxu0 %v5075_v2  ;;  %4167 = vmatpush3.bf16.msra.mxu1 %v4512_v36  ;;  %v3474_v36 = vld [vmem:[%s4588_s10 + $0x16a] sm:$0xff]  ;;  %v3476_v26 = vld [vmem:[%s4588_s10 + $0x182] sm:$0xff] }
  0xf9   : > { %4160 = vmatprep.subr.bf16.mxu1 %v4513_v27 }
  0xfc   : > { %4168 = vmatpush3.bf16.msra.mxu1 %v4513_v27  ;;  %v3477_v27 = vld [vmem:[%s4588_s10 + $0x18a] sm:$0xff] }
  0xfd   : > { %4161 = vmatprep.subr.bf16.mxu1 %v4514_v43  ;;  %v2614_v44 = vpack.c.bf16 %v3477_v27, %v3476_v26 }
  0xfe   : > { %3896 = vmatmul.mubr.bf16.gmra.mrb[12].mxu1 %v4883_v61  ;;  %v2602_v61 = vpack.c.bf16 %v3453_v0, %v3452_v58  ;;  %v3479_v58 = vld [vmem:[%s4588_s10 + $0x1a2] sm:$0xff] }
  0xff   : > { %4104 = vmatmul.mubr.bf16.gmra.mrb[28].mxu0 %v2309_v42  ;;  %3899 = vmatprep.mubr.bf16.mxu1 %v4900_v14  ;;  %v3454_v14 = vld [vmem:[%s4588_s10 + $0x7a] sm:$0xff]  ;;  %v1388_v42 = vpack.c.bf16 %v3251_v24, %v3250_v22  ;;  %v2615_v0 = vpack.c.bf16 %v3479_v58, %v3478_v45 }
 0x100   : > { %4123 = vmatprep.mubr.bf16.mxu0 %v2600_v51  ;;  %4169 = vmatpush3.bf16.msra.mxu1 %v4514_v43  ;;  %v2603_v23 = vpack.c.bf16 %v3455_v6, %v3454_v14  ;;  %v2613_v51 = vpack.c.bf16 %v3475_v38, %v3474_v36  ;;  %v1389_v43 = vpack.c.bf16 %v3253_v21, %v3252_v4 }
 0x101   : > { %4162 = vmatprep.subr.bf16.mxu1 %v4515_v59 }
 0x104   : > { %4170 = vmatpush3.bf16.msra.mxu1 %v4515_v59 }
 0x106   : > { %3900 = vmatmul.mubr.bf16.gmra.mrb[16].mxu1 %v4902_v15  ;;  %v3458_v15 = vld [vmem:[%s4588_s10 + $0xaa] sm:$0xff] }
 0x107   : > { %4124 = vmatmul.mubr.bf16.vlgmr.msra.gmra.mrb[0].mxu0 %v2601_v9  ;;  %3903 = vmatprep.mubr.bf16.mxu1 %v4920_v29  ;;  %v3459_v29 = vld [vmem:[%s4588_s10 + $0xb2] sm:$0xff] }
 0x108   : > { %4127 = vmatprep.mubr.bf16.mxu0 %v2602_v61  ;;  %v2605_v25 = vpack.c.bf16 %v3459_v29, %v3458_v15 }
 0x10e   : > { %3904 = vmatmul.mubr.bf16.gmra.mrb[20].mxu1 %v4922_v30  ;;  %v3462_v30 = vld [vmem:[%s4588_s10 + $0xda] sm:$0xff] }
 0x10f   : > { %4128 = vmatmul.mubr.bf16.gmra.mrb[4].mxu0 %v2603_v23  ;;  %3907 = vmatprep.mubr.bf16.mxu1 %v4938_v40  ;;  %v3463_v40 = vld [vmem:[%s4588_s10 + $0xe2] sm:$0xff] }
 0x110   : > { %4131 = vmatprep.mubr.bf16.mxu0 %v2604_v16  ;;  %v2607_v31 = vpack.c.bf16 %v3463_v40, %v3462_v30 }
 0x116   : > { %3908 = vmatmul.mubr.bf16.gmra.mrb[24].mxu1 %v4940_v41  ;;  %v1383_v41 = vpack.c.bf16 %v3241_v37, %v3240_v20 }
 0x117   : > { %4132 = vmatmul.mubr.bf16.gmra.mrb[8].mxu0 %v2605_v25  ;;  %3911 = vmatprep.mubr.bf16.mxu1 %v4956_v56  ;;  %v3242_v56 = vld [vmem:[%s4588_s10 + $0xf1] sm:$0xff]  ;;  %s3506_s10 = sshll.u32 %s5216_s13, 8 }
 0x118   : > { %4135 = vmatprep.mubr.bf16.mxu0 %v2606_v19  ;;  %s5165_s8 = scalar_lea.vmem %s5213_s2, %s3506_s10 }
 0x11e   : > { %3912 = vmatmul.mubr.bf16.gmra.mrb[28].mxu1 %v4990_v13  ;;  %v1384_v13 = vpack.c.bf16 %v3243_v33, %v3242_v56 }
 0x11f   : > { %4136 = vmatmul.mubr.bf16.gmra.mrb[12].mxu0 %v2607_v31  ;;  %3947 = vmatprep.mubr.bf16.mxu1 %v1383_v41 }
 0x120   : > { %4139 = vmatprep.mubr.bf16.mxu0 %v2608_v32 }
 0x126   : > { %3948 = vmatmul.mubr.bf16.vlgmr.msra.gmra.mrb[16].mxu1 %v1384_v13 }
 0x127   : > { %4140 = vmatmul.mubr.bf16.gmra.mrb[16].mxu0 %v2609_v48  ;;  %3951 = vmatprep.mubr.bf16.mxu1 %v1385_v50 }
 0x128   : > { %4143 = vmatprep.mubr.bf16.mxu0 %v2610_v53 }
 0x12e   : > { %3952 = vmatmul.mubr.bf16.gmra.mrb[20].mxu1 %v1386_v8 }
 0x12f   : > { %4144 = vmatmul.mubr.bf16.gmra.mrb[20].mxu0 %v2611_v49  ;;  %3955 = vmatprep.mubr.bf16.mxu1 %v1387_v7 }
 0x130   : > { %4147 = vmatprep.mubr.bf16.mxu0 %v2612_v10 }
 0x136   : > { %3956 = vmatmul.mubr.bf16.gmra.mrb[24].mxu1 %v1388_v42 }
 0x137   : > { %4148 = vmatmul.mubr.bf16.gmra.mrb[24].mxu0 %v2613_v51  ;;  %3959 = vmatprep.mubr.bf16.mxu1 %v1389_v43 }
 0x138   : > { %4151 = vmatprep.mubr.bf16.mxu0 %v2614_v44 }
 0x13e   : > { %3960 = vmatmul.mubr.bf16.gmra.mrb[28].mxu1 %v5075_v2 }
 0x13f   : > { %4152 = vmatmul.mubr.bf16.gmra.mrb[28].mxu0 %v2615_v0 }
 0x1b9   : > { %v3885_v59 = vpop.f32.mrb[0].mxu1 }
 0x1ba   : > { %v1184_v9 = vpop.f32.mrb[1].mxu1 }
 0x1bb   : > { %v3886_v61 = vpop.f32.mrb[2].mxu1 }
 0x1bc   : > { %v1187_v14 = vpop.f32.mrb[3].mxu1 }
 0x1c1   : > { %v3889_v6 = vpop.f32.mrb[4].mxu1 }
 0x1c2   : > { %v1200_v12 = vpop.f32.mrb[5].mxu1 }
 0x1c3   : > { %v3890_v11 = vpop.f32.mrb[6].mxu1 }
 0x1c4   : > { %v1203_v23 = vpop.f32.mrb[7].mxu1 }
 0x1c9   : > { %v3893_v16 = vpop.f32.mrb[8].mxu1 }
 0x1ca   : > { %v1216_v15 = vpop.f32.mrb[9].mxu1 }
 0x1cb   : > { %v3894_v29 = vpop.f32.mrb[10].mxu1 }
 0x1cc   : > { %v5151_v17 = vpop.f32.mrb[11].mxu1 }
 0x1d1   : > { %v5153_v18 = vpop.f32.mrb[12].mxu1 }
 0x1d2   : > { %v5155_v25 = vpop.f32.mrb[13].mxu1 }
 0x1d3   : > { %v5157_v2 = vpop.f32.mrb[14].mxu1 }
 0x1d4   : > { %v5159_v19 = vpop.f32.mrb[15].mxu1 }
 0x1da   : > { %v4125_v30 = vpop.f32.mrb[0].mxu0 }
 0x1db   : > { %v4171_v40 = vadd.f32 %v4125_v30, %v3885_v59  ;;  %v2715_v20 = vpop.f32.mrb[1].mxu0 }
 0x1dc   : > { %v4172_v37 = vadd.f32 %v2715_v20, %v1184_v9  ;;  %v4126_v28 = vpop.f32.mrb[2].mxu0 }
 0x1dd   : > { %2876 = vst [vmem:[%s5165_s8 + $0x10] sm:$0xff] %v4171_v40  ;;  %v4173_v1 = vadd.f32 %v4126_v28, %v3886_v61  ;;  %v2718_v31 = vpop.f32.mrb[3].mxu0  ;;  %v2945_v34 = vmul.f32 %v4171_v40, %v4171_v40 }
 0x1de   : > { %2874 = vst [vmem:[%s5165_s8] sm:$0xff] %v4172_v37  ;;  %v4174_v41 = vadd.f32 %v2718_v31, %v1187_v14  ;;  %v2943_v32 = vmul.f32 %v4172_v37, %v4172_v37 }
 0x1df   : > { %2877 = vst [vmem:[%s5165_s8 + $0x18] sm:$0xff] %v4173_v1  ;;  %v2946_v13 = vmul.f32 %v4173_v1, %v4173_v1 }
 0x1e0   : > { %2875 = vst [vmem:[%s5165_s8 + $0x8] sm:$0xff] %v4174_v41  ;;  %v2906_v56 = vadd.f32 %v4174_v41, %v4172_v37  ;;  %v2944_v33 = vmul.f32 %v4174_v41, %v4174_v41 }
 0x1e2   : > { %v2907_v39 = vadd.f32 %v4171_v40, %v2906_v56  ;;  %v2975_v52 = vadd.f32 %v2944_v33, %v2943_v32  ;;  %v4129_v35 = vpop.f32.mrb[4].mxu0 }
 0x1e3   : > { %v4175_v46 = vadd.f32 %v4129_v35, %v3889_v6  ;;  %v2731_v47 = vpop.f32.mrb[5].mxu0 }
 0x1e4   : > { %v2976_v48 = vadd.f32 %v2975_v52, %v2945_v34  ;;  %v4176_v50 = vadd.f32 %v2731_v47, %v1200_v12  ;;  %v2908_v53 = vadd.f32 %v4173_v1, %v2907_v39  ;;  %v4130_v55 = vpop.f32.mrb[6].mxu0 }
 0x1e5   : > { %2880 = vst [vmem:[%s5165_s8 + $0x30] sm:$0xff] %v4175_v46  ;;  %v4177_v54 = vadd.f32 %v4130_v55, %v3890_v11  ;;  %v2734_v3 = vpop.f32.mrb[7].mxu0  ;;  %v2949_v7 = vmul.f32 %v4175_v46, %v4175_v46 }
 0x1e6   : > { %2878 = vst [vmem:[%s5165_s8 + $0x20] sm:$0xff] %v4176_v50  ;;  %v2909_v57 = vadd.f32 %v4176_v50, %v2908_v53  ;;  %v2947_v60 = vmul.f32 %v4176_v50, %v4176_v50  ;;  %v2977_v62 = vadd.f32 %v2976_v48, %v2946_v13  ;;  %v4178_v63 = vadd.f32 %v2734_v3, %v1203_v23 }
 0x1e7   : > { %2881 = vst [vmem:[%s5165_s8 + $0x38] sm:$0xff] %v4177_v54  ;;  %v2950_v4 = vmul.f32 %v4177_v54, %v4177_v54 }
 0x1e8   : > { %v2978_v5 = vadd.f32 %v2977_v62, %v2947_v60  ;;  %2879 = vst [vmem:[%s5165_s8 + $0x28] sm:$0xff] %v4178_v63  ;;  %v2910_v8 = vadd.f32 %v4178_v63, %v2909_v57  ;;  %v2948_v49 = vmul.f32 %v4178_v63, %v4178_v63 }
 0x1ea   : > { %v2911_v10 = vadd.f32 %v4175_v46, %v2910_v8  ;;  %v2979_v22 = vadd.f32 %v2978_v5, %v2948_v49  ;;  %v4133_v24 = vpop.f32.mrb[8].mxu0 }
 0x1eb   : > { %v4179_v36 = vadd.f32 %v4133_v24, %v3893_v16  ;;  %v2747_v38 = vpop.f32.mrb[9].mxu0 }
 0x1ec   : > { %v2980_v21 = vadd.f32 %v2979_v22, %v2949_v7  ;;  %v4180_v26 = vadd.f32 %v2747_v38, %v1216_v15  ;;  %v2912_v27 = vadd.f32 %v4177_v54, %v2911_v10  ;;  %v4134_v42 = vpop.f32.mrb[10].mxu0 }
 0x1ed   : > { %2884 = vst [vmem:[%s5165_s8 + $0x50] sm:$0xff] %v4179_v36  ;;  %v4181_v51 = vadd.f32 %v4134_v42, %v3894_v29  ;;  %v2750_v43 = vpop.f32.mrb[11].mxu0  ;;  %v2953_v14 = vmul.f32 %v4179_v36, %v4179_v36 }
 0x1ee   : > { %2882 = vst [vmem:[%s5165_s8 + $0x40] sm:$0xff] %v4180_v26  ;;  %v2913_v44 = vadd.f32 %v4180_v26, %v2912_v27  ;;  %v2951_v45 = vmul.f32 %v4180_v26, %v4180_v26  ;;  %v2981_v58 = vadd.f32 %v2980_v21, %v2950_v4  ;;  %v4182_v0 = vadd.f32 %v2750_v43, %v5151_v17 }
 0x1ef   : > { %2885 = vst [vmem:[%s5165_s8 + $0x58] sm:$0xff] %v4181_v51  ;;  %v2954_v15 = vmul.f32 %v4181_v51, %v4181_v51 }
 0x1f0   : > { %v2982_v59 = vadd.f32 %v2981_v58, %v2951_v45  ;;  %2883 = vst [vmem:[%s5165_s8 + $0x48] sm:$0xff] %v4182_v0  ;;  %v2914_v9 = vadd.f32 %v4182_v0, %v2913_v44  ;;  %v2952_v61 = vmul.f32 %v4182_v0, %v4182_v0 }
 0x1f2   : > { %v2915_v6 = vadd.f32 %v4179_v36, %v2914_v9  ;;  %v2983_v12 = vadd.f32 %v2982_v59, %v2952_v61  ;;  %v4137_v11 = vpop.f32.mrb[12].mxu0 }
 0x1f3   : > { %v4183_v23 = vadd.f32 %v4137_v11, %v5153_v18  ;;  %v2763_v16 = vpop.f32.mrb[13].mxu0 }
 0x1f4   : > { %v2984_v29 = vadd.f32 %v2983_v12, %v2953_v14  ;;  %v4184_v17 = vadd.f32 %v2763_v16, %v5155_v25  ;;  %v2916_v30 = vadd.f32 %v4181_v51, %v2915_v6  ;;  %v4138_v40 = vpop.f32.mrb[14].mxu0 }
 0x1f5   : > { %2888 = vst [vmem:[%s5165_s8 + $0x70] sm:$0xff] %v4183_v23  ;;  %v4185_v20 = vadd.f32 %v4138_v40, %v5157_v2  ;;  %v2766_v37 = vpop.f32.mrb[15].mxu0  ;;  %v2957_v25 = vmul.f32 %v4183_v23, %v4183_v23 }
 0x1f6   : > { %2886 = vst [vmem:[%s5165_s8 + $0x60] sm:$0xff] %v4184_v17  ;;  %v2917_v28 = vadd.f32 %v4184_v17, %v2916_v30  ;;  %v2955_v1 = vmul.f32 %v4184_v17, %v4184_v17  ;;  %v2985_v31 = vadd.f32 %v2984_v29, %v2954_v15  ;;  %v4186_v41 = vadd.f32 %v2766_v37, %v5159_v19 }
 0x1f7   : > { %2889 = vst [vmem:[%s5165_s8 + $0x78] sm:$0xff] %v4185_v20  ;;  %v2958_v13 = vmul.f32 %v4185_v20, %v4185_v20 }
 0x1f8   : > { %v2986_v18 = vadd.f32 %v2985_v31, %v2955_v1  ;;  %2887 = vst [vmem:[%s5165_s8 + $0x68] sm:$0xff] %v4186_v41  ;;  %v2918_v32 = vadd.f32 %v4186_v41, %v2917_v28  ;;  %v2956_v56 = vmul.f32 %v4186_v41, %v4186_v41 }
 0x1f9   : > { %v3949_v33 = vpop.f32.mrb[16].mxu1 }
 0x1fa   : > { %v2919_v34 = vadd.f32 %v4183_v23, %v2918_v32  ;;  %v2987_v39 = vadd.f32 %v2986_v18, %v2956_v56  ;;  %v4141_v52 = vpop.f32.mrb[16].mxu0  ;;  %v1554_v2 = vpop.f32.mrb[17].mxu1 }
 0x1fb   : > { %v4187_v35 = vadd.f32 %v4141_v52, %v3949_v33  ;;  %v2779_v46 = vpop.f32.mrb[17].mxu0  ;;  %v3950_v47 = vpop.f32.mrb[18].mxu1 }
 0x1fc   : > { %v2988_v19 = vadd.f32 %v2987_v39, %v2957_v25  ;;  %v4188_v48 = vadd.f32 %v2779_v46, %v1554_v2  ;;  %v2920_v50 = vadd.f32 %v4185_v20, %v2919_v34  ;;  %v4142_v53 = vpop.f32.mrb[18].mxu0  ;;  %v1557_v55 = vpop.f32.mrb[19].mxu1 }
 0x1fd   : > { %2892 = vst [vmem:[%s5165_s8 + $0x90] sm:$0xff] %v4187_v35  ;;  %v4189_v54 = vadd.f32 %v4142_v53, %v3950_v47  ;;  %v2782_v3 = vpop.f32.mrb[19].mxu0  ;;  %v2961_v10 = vmul.f32 %v4187_v35, %v4187_v35 }
 0x1fe   : > { %2890 = vst [vmem:[%s5165_s8 + $0x80] sm:$0xff] %v4188_v48  ;;  %v2921_v57 = vadd.f32 %v4188_v48, %v2920_v50  ;;  %v2959_v60 = vmul.f32 %v4188_v48, %v4188_v48  ;;  %v2989_v62 = vadd.f32 %v2988_v19, %v2958_v13  ;;  %v4190_v63 = vadd.f32 %v2782_v3, %v1557_v55 }
 0x1ff   : > { %2893 = vst [vmem:[%s5165_s8 + $0x98] sm:$0xff] %v4189_v54  ;;  %v2962_v27 = vmul.f32 %v4189_v54, %v4189_v54 }
 0x200   : > { %v2990_v5 = vadd.f32 %v2989_v62, %v2959_v60  ;;  %2891 = vst [vmem:[%s5165_s8 + $0x88] sm:$0xff] %v4190_v63  ;;  %v2922_v8 = vadd.f32 %v4190_v63, %v2921_v57  ;;  %v2960_v49 = vmul.f32 %v4190_v63, %v4190_v63 }
 0x201   : > { %v3953_v7 = vpop.f32.mrb[20].mxu1 }
 0x202   : > { %v2923_v22 = vadd.f32 %v4187_v35, %v2922_v8  ;;  %v2991_v24 = vadd.f32 %v2990_v5, %v2960_v49  ;;  %v4145_v36 = vpop.f32.mrb[20].mxu0  ;;  %v1570_v38 = vpop.f32.mrb[21].mxu1 }
 0x203   : > { %v4191_v4 = vadd.f32 %v4145_v36, %v3953_v7  ;;  %v2795_v21 = vpop.f32.mrb[21].mxu0  ;;  %v3954_v26 = vpop.f32.mrb[22].mxu1 }
 0x204   : > { %v2992_v42 = vadd.f32 %v2991_v24, %v2961_v10  ;;  %v4192_v51 = vadd.f32 %v2795_v21, %v1570_v38  ;;  %v2924_v43 = vadd.f32 %v4189_v54, %v2923_v22  ;;  %v4146_v44 = vpop.f32.mrb[22].mxu0  ;;  %v1573_v45 = vpop.f32.mrb[23].mxu1 }
 0x205   : > { %2896 = vst [vmem:[%s5165_s8 + $0xb0] sm:$0xff] %v4191_v4  ;;  %v4193_v58 = vadd.f32 %v4146_v44, %v3954_v26  ;;  %v2798_v0 = vpop.f32.mrb[23].mxu0  ;;  %v2965_v16 = vmul.f32 %v4191_v4, %v4191_v4 }
 0x206   : > { %2894 = vst [vmem:[%s5165_s8 + $0xa0] sm:$0xff] %v4192_v51  ;;  %v2925_v59 = vadd.f32 %v4192_v51, %v2924_v43  ;;  %v2963_v9 = vmul.f32 %v4192_v51, %v4192_v51  ;;  %v2993_v61 = vadd.f32 %v2992_v42, %v2962_v27  ;;  %v4194_v14 = vadd.f32 %v2798_v0, %v1573_v45 }
 0x207   : > { %2897 = vst [vmem:[%s5165_s8 + $0xb8] sm:$0xff] %v4193_v58  ;;  %v2966_v28 = vmul.f32 %v4193_v58, %v4193_v58 }
 0x208   : > { %v2994_v6 = vadd.f32 %v2993_v61, %v2963_v9  ;;  %2895 = vst [vmem:[%s5165_s8 + $0xa8] sm:$0xff] %v4194_v14  ;;  %v2926_v12 = vadd.f32 %v4194_v14, %v2925_v59  ;;  %v2964_v11 = vmul.f32 %v4194_v14, %v4194_v14 }
 0x209   : > { %v3957_v23 = vpop.f32.mrb[24].mxu1 }
 0x20a   : > { %v2927_v15 = vadd.f32 %v4191_v4, %v2926_v12  ;;  %v2995_v29 = vadd.f32 %v2994_v6, %v2964_v11  ;;  %v4149_v17 = vpop.f32.mrb[24].mxu0  ;;  %v1586_v30 = vpop.f32.mrb[25].mxu1 }
 0x20b   : > { %v4195_v40 = vadd.f32 %v4149_v17, %v3957_v23  ;;  %v2811_v20 = vpop.f32.mrb[25].mxu0  ;;  %v3958_v37 = vpop.f32.mrb[26].mxu1 }
 0x20c   : > { %v2996_v1 = vadd.f32 %v2995_v29, %v2965_v16  ;;  %v4196_v31 = vadd.f32 %v2811_v20, %v1586_v30  ;;  %v2928_v41 = vadd.f32 %v4193_v58, %v2927_v15  ;;  %v4150_v18 = vpop.f32.mrb[26].mxu0  ;;  %v1589_v32 = vpop.f32.mrb[27].mxu1 }
 0x20d   : > { %2900 = vst [vmem:[%s5165_s8 + $0xd0] sm:$0xff] %v4195_v40  ;;  %v4197_v56 = vadd.f32 %v4150_v18, %v3958_v37  ;;  %v2814_v33 = vpop.f32.mrb[27].mxu0  ;;  %v2969_v13 = vmul.f32 %v4195_v40, %v4195_v40 }
 0x20e   : > { %2898 = vst [vmem:[%s5165_s8 + $0xc0] sm:$0xff] %v4196_v31  ;;  %v2929_v25 = vadd.f32 %v4196_v31, %v2928_v41  ;;  %v2967_v34 = vmul.f32 %v4196_v31, %v4196_v31  ;;  %v2997_v39 = vadd.f32 %v2996_v1, %v2966_v28  ;;  %v4198_v52 = vadd.f32 %v2814_v33, %v1589_v32 }
 0x20f   : > { %2901 = vst [vmem:[%s5165_s8 + $0xd8] sm:$0xff] %v4197_v56  ;;  %v2970_v57 = vmul.f32 %v4197_v56, %v4197_v56 }
 0x210   : > { %v2998_v2 = vadd.f32 %v2997_v39, %v2967_v34  ;;  %2899 = vst [vmem:[%s5165_s8 + $0xc8] sm:$0xff] %v4198_v52  ;;  %v2930_v35 = vadd.f32 %v4198_v52, %v2929_v25  ;;  %v2968_v46 = vmul.f32 %v4198_v52, %v4198_v52 }
 0x211   : > { %v3961_v47 = vpop.f32.mrb[28].mxu1 }
 0x212   : > { %v2931_v19 = vadd.f32 %v4195_v40, %v2930_v35  ;;  %v2999_v48 = vadd.f32 %v2998_v2, %v2968_v46  ;;  %v4153_v50 = vpop.f32.mrb[28].mxu0  ;;  %v1602_v53 = vpop.f32.mrb[29].mxu1 }
 0x213   : > { %v4199_v55 = vadd.f32 %v4153_v50, %v3961_v47  ;;  %v2827_v54 = vpop.f32.mrb[29].mxu0  ;;  %v3962_v3 = vpop.f32.mrb[30].mxu1 }
 0x214   : > { %v3000_v60 = vadd.f32 %v2999_v48, %v2969_v13  ;;  %v4200_v62 = vadd.f32 %v2827_v54, %v1602_v53  ;;  %v2932_v63 = vadd.f32 %v4197_v56, %v2931_v19  ;;  %v4154_v5 = vpop.f32.mrb[30].mxu0  ;;  %v1605_v8 = vpop.f32.mrb[31].mxu1 }
 0x215   : > { %2904 = vst [vmem:[%s5165_s8 + $0xf0] sm:$0xff] %v4199_v55  ;;  %v4201_v49 = vadd.f32 %v4154_v5, %v3962_v3  ;;  %v2830_v7 = vpop.f32.mrb[31].mxu0  ;;  %v2973_v26 = vmul.f32 %v4199_v55, %v4199_v55 }
 0x216   : > { %2902 = vst [vmem:[%s5165_s8 + $0xe0] sm:$0xff] %v4200_v62  ;;  %v2933_v10 = vadd.f32 %v4200_v62, %v2932_v63  ;;  %v2971_v22 = vmul.f32 %v4200_v62, %v4200_v62  ;;  %v3001_v24 = vadd.f32 %v3000_v60, %v2970_v57  ;;  %v4202_v36 = vadd.f32 %v2830_v7, %v1605_v8 }
 0x217   : > { %2905 = vst [vmem:[%s5165_s8 + $0xf8] sm:$0xff] %v4201_v49  ;;  %v2974_v51 = vmul.f32 %v4201_v49, %v4201_v49 }
 0x218   : > { %v3002_v38 = vadd.f32 %v3001_v24, %v2971_v22  ;;  %2903 = vst [vmem:[%s5165_s8 + $0xe8] sm:$0xff] %v4202_v36  ;;  %v2934_v4 = vadd.f32 %v4202_v36, %v2933_v10  ;;  %v2972_v21 = vmul.f32 %v4202_v36, %v4202_v36 }
 0x21a   : > { %v2935_v27 = vadd.f32 %v4199_v55, %v2934_v4  ;;  %v3003_v42 = vadd.f32 %v3002_v38, %v2972_v21 }
 0x21c   : > { %v2936_v43 = vadd.f32 %v4201_v49, %v2935_v27  ;;  %v3004_v44 = vadd.f32 %v3003_v42, %v2973_v26 }
 0x21e   : > { %v2937_v45 = vrot.slane %v2936_v43, 4  ;;  %v3005_v58 = vadd.f32 %v3004_v44, %v2974_v51 }
 0x220   : > { %v2938_v0 = vadd.f32 %v2937_v45, %v2936_v43  ;;  %v3006_v59 = vrot.slane %v3005_v58, 4 }
 0x222   : > { %v2939_v9 = vrot.slane %v2938_v0, 2  ;;  %v3007_v61 = vadd.f32 %v3006_v59, %v3005_v58 }
 0x224   : > { %v2940_v14 = vadd.f32 %v2939_v9, %v2938_v0  ;;  %v3008_v6 = vrot.slane %v3007_v61, 2 }
 0x226   : > { %v2941_v12 = vrot.slane %v2940_v14, 1  ;;  %v3009_v11 = vadd.f32 %v3008_v6, %v3007_v61 }
 0x228   : > { %v3010_v23 = vrot.slane %v3009_v11, 1  ;;  %v2942_v16 = vadd.f32 %v2941_v12, %v2940_v14 }
 0x22a   : > { %v3011_v15 = vadd.f32 %v3010_v23, %v3009_v11 }
 0x22c   : > { %v3013_v29 = vsel %vm3012_vm0, %v2942_v16, %v3011_v15 }
 0x22d   : > { %v3015_v17 = vsel %vm3014_vm1, %v3013_v29, 0.0 }
 0x22e   : > { %3016 = vst [vmem:[%s181_s15] sm:$0xff] %v3015_v17 }
 0x22f PF: > { %s14_s12 = sadd.s32 1, %s4522_s12  }
 0x230   : > { %p11_p4 = scmp.ge.s32.totalorder %s14_s12, 4  }
 0x232   :  { %13 = sbr.rel (!%p11_p4) target bundleno = 1 (0x1), region = 80 }

// kernel: upsample_forward.4
= control target key start
LH: loop header
LB: loop body
LE: loop exit
PB: predicated region body
PF: predicated region fallthrough
CT: control target
= control target key end

     0   :  { %s4650_s18 = smov 0   ;;  %s5438_s0 = inlined_call_operand.vmem [shape: f32[2,16,16,128], index: 0, kind: input, shape index: {}]   ;;  %s5439_s1 = inlined_call_operand.vmem [shape: f32[1,128], index: 1, kind: input, shape index: {}]   ;;  %s5440_s2 = inlined_call_operand.vmem [shape: f32[1,128], index: 2, kind: input, shape index: {}]   ;;  %s5441_s3 = inlined_call_operand.vmem [shape: bf16[3,3,128,128], index: 3, kind: input, shape index: {}]   ;;  %s5442_s4 = inlined_call_operand.vmem [shape: f32[2,16,16,128], index: 4, kind: output, shape index: {0}]   ;;  %s5443_s5 = inlined_call_operand.vmem [shape: f32[2,8,128], index: 5, kind: output, shape index: {1}]  }
   0x1 LB: > { %s3385_s19 = sadd.s32 4294967295, %s4617_s18   ;;  %p3389_p0 = scmp.ge.s32.totalorder %s4617_s18, 1  ;;  %s4617_s18 = sphi %s4650_s18, %s16_s18  }
   0x2   : > { %p190_p1 = scmp.lt.s32.totalorder %s4617_s18, 3 }
   0x4   : > { %p191_p2 = pnand %p3389_p0, %p190_p1 }
   0x5   : > { %v4530_v0 = vld [vmem:[%s5441_s3 + $0x40] sm:$0xff] (!%p191_p2)   ;;  %v4619_v2 = vmov (!%p191_p2), 0.0   ;;  %v4532_v3 = vld [vmem:[%s5441_s3 + $0x48] sm:$0xff] (!%p191_p2)   ;;  %p222_p3 = scmp.lt.s32.totalorder (!%p191_p2), %s3385_s19, 1  ;;  %v4534_v5 = vld [vmem:[%s5441_s3 + $0x50] sm:$0xff] (!%p191_p2)   ;;  %vm3294_vm0 = vcmask (!%p191_p2), 1040384  }
   0x6   : > { %194 = sbr.rel (%p191_p2) target bundleno = 559 (0x22f), region = 36  ;;  %v4531_v1 = vld [vmem:[%s5441_s3 + $0x100] sm:$0xff] (!%p191_p2)   ;;  %379 = vst [vmem:[#allocation2] sm:$0xff] (!%p191_p2), %v4619_v2  ;;  %380 = vst [vmem:[#allocation2 + $0x8] sm:$0xff] (!%p191_p2), %v4619_v2  ;;  %3817 = vmatprep.subr.bf16.mxu1 (!%p191_p2), %v4530_v0  ;;  %v4533_v4 = vld [vmem:[%s5441_s3 + $0x108] sm:$0xff] (!%p191_p2)   ;;  %vm3296_vm1 = vcmask (!%p191_p2), 1041408  }
   0x7   : > { %381 = vst [vmem:[#allocation2 + $0x10] sm:$0xff] (!%p191_p2), %v4619_v2  ;;  %382 = vst [vmem:[#allocation2 + $0x18] sm:$0xff] (!%p191_p2), %v4619_v2  ;;  %4009 = vmatprep.subr.bf16.mxu0 (!%p191_p2), %v4531_v1  ;;  %3818 = vmatpush3.bf16.msra.mxu1 (!%p191_p2), %v4530_v0  ;;  %v4535_v6 = vld [vmem:[%s5441_s3 + $0x110] sm:$0xff] (!%p191_p2)   ;;  %v4536_v7 = vld [vmem:[%s5441_s3 + $0x58] sm:$0xff] (!%p191_p2)  }
   0x8   : > { %383 = vst [vmem:[#allocation2 + $0x20] sm:$0xff] (!%p191_p2), %v4619_v2  ;;  %384 = vst [vmem:[#allocation2 + $0x28] sm:$0xff] (!%p191_p2), %v4619_v2  ;;  %4010 = vmatpush3.bf16.msra.mxu0 (!%p191_p2), %v4531_v1  ;;  %3819 = vmatprep.subr.bf16.mxu1 (!%p191_p2), %v4532_v3  ;;  %v4537_v8 = vld [vmem:[%s5441_s3 + $0x118] sm:$0xff] (!%p191_p2)   ;;  %v4538_v9 = vld [vmem:[%s5441_s3 + $0x60] sm:$0xff] (!%p191_p2)  }
   0x9   : > { %385 = vst [vmem:[#allocation2 + $0x30] sm:$0xff] (!%p191_p2), %v4619_v2  ;;  %386 = vst [vmem:[#allocation2 + $0x38] sm:$0xff] (!%p191_p2), %v4619_v2  ;;  %4011 = vmatprep.subr.bf16.mxu0 (!%p191_p2), %v4533_v4  ;;  %v4539_v10 = vld [vmem:[%s5441_s3 + $0x120] sm:$0xff] (!%p191_p2)   ;;  %v4540_v11 = vld [vmem:[%s5441_s3 + $0x68] sm:$0xff] (!%p191_p2)  }
   0xa   : > { %387 = vst [vmem:[#allocation2 + $0x40] sm:$0xff] (!%p191_p2), %v4619_v2  ;;  %388 = vst [vmem:[#allocation2 + $0x48] sm:$0xff] (!%p191_p2), %v4619_v2  ;;  %v4541_v12 = vld [vmem:[%s5441_s3 + $0x128] sm:$0xff] (!%p191_p2)   ;;  %v4713_v18 = vld [vmem:[%s5439_s1] ss:$0 sm:$0xff] (!%p191_p2) }
   0xb   : > { %389 = vst [vmem:[#allocation2 + $0x50] sm:$0xff] (!%p191_p2), %v4619_v2  ;;  %390 = vst [vmem:[#allocation2 + $0x58] sm:$0xff] (!%p191_p2), %v4619_v2  ;;  %3820 = vmatpush3.bf16.msra.mxu1 (!%p191_p2), %v4532_v3  ;;  %v4718_v19 = vld [vmem:[%s5440_s2] ss:$0 sm:$0xff] (!%p191_p2)  ;;  %v4542_v24 = vld [vmem:[%s5441_s3 + $0x70] sm:$0xff] (!%p191_p2)  }
   0xc   : > { %391 = vst [vmem:[#allocation2 + $0x60] sm:$0xff] (!%p191_p2), %v4619_v2  ;;  %392 = vst [vmem:[#allocation2 + $0x68] sm:$0xff] (!%p191_p2), %v4619_v2  ;;  %4012 = vmatpush3.bf16.msra.mxu0 (!%p191_p2), %v4533_v4  ;;  %3821 = vmatprep.subr.bf16.mxu1 (!%p191_p2), %v4534_v5  ;;  %v4543_v28 = vld [vmem:[%s5441_s3 + $0x130] sm:$0xff] (!%p191_p2)   ;;  %v4544_v40 = vld [vmem:[%s5441_s3 + $0x78] sm:$0xff] (!%p191_p2)  }
   0xd   : > { %393 = vst [vmem:[#allocation2 + $0x70] sm:$0xff] %v4619_v2  ;;  %394 = vst [vmem:[#allocation2 + $0x78] sm:$0xff] %v4619_v2  ;;  %s5445_s19 = smov (!%p222_p3, %s3385_s19), 1  ;;  %4013 = vmatprep.subr.bf16.mxu0 %v4535_v6  ;;  %v530_v13 = vld [vmem:[#allocation2 + $0x1] sm:$0xff]  ;;  %v4545_v45 = vld [vmem:[%s5441_s3 + $0x138] sm:$0xff]  }
   0xe   : > { %395 = vst [vmem:[#allocation2 + $0x80] sm:$0xff] %v4619_v2  ;;  %396 = vst [vmem:[#allocation2 + $0x88] sm:$0xff] %v4619_v2  ;;  %s3599_s11 = sshll.u32 %s5445_s19, 8  ;;  %v531_v14 = vld [vmem:[#allocation2 + $0x9] sm:$0xff]  ;;  %v4546_v53 = vld [vmem:[%s5441_s3] sm:$0xff]  }
   0xf   : > { %397 = vst [vmem:[#allocation2 + $0x90] sm:$0xff] %v4619_v2  ;;  %398 = vst [vmem:[#allocation2 + $0x98] sm:$0xff] %v4619_v2  ;;  %3822 = vmatpush3.bf16.msra.mxu1 %v4534_v5  ;;  %s4700_s20 = scalar_lea.vmem %s5438_s0, %s3599_s11  ;;  %v562_v16 = vpack.c.bf16 %v531_v14, %v530_v13  ;;  %v4547_v62 = vld [vmem:[%s5441_s3 + $0x140] sm:$0xff]   ;;  %s5392_s12 = scalar_lea.vmem %s5442_s4, %s3599_s11 }
  0x10   : > { %399 = vst [vmem:[#allocation2 + $0xa0] sm:$0xff] %v4619_v2  ;;  %400 = vst [vmem:[#allocation2 + $0xa8] sm:$0xff] %v4619_v2  ;;  %4014 = vmatpush3.bf16.msra.mxu0 %v4535_v6  ;;  %3823 = vmatprep.subr.bf16.mxu1 %v4536_v7  ;;  %v237_v15 = vld [vmem:[%s4700_s20] sm:$0xff]  ;;  %v238_v17 = vld [vmem:[%s4700_s20 + $0x8] sm:$0xff]  ;;  %s3394_s11 = sshll.u32 %s5445_s19, 3 }
  0x11   : > { %401 = vst [vmem:[#allocation2 + $0xb0] sm:$0xff] %v4619_v2  ;;  %402 = vst [vmem:[#allocation2 + $0xb8] sm:$0xff] %v4619_v2  ;;  %4015 = vmatprep.subr.bf16.mxu0 %v4537_v8  ;;  %v276_v20 = vmul.f32 %v4713_v18, %v237_v15  ;;  %v277_v21 = vmul.f32 %v4713_v18, %v238_v17  ;;  %3833 = vmatprep.mubr.bf16.mxu1 %v562_v16  ;;  %v239_v22 = vld [vmem:[%s4700_s20 + $0x10] sm:$0xff]  ;;  %v240_v23 = vld [vmem:[%s4700_s20 + $0x18] sm:$0xff]  ;;  %s235_s15 = scalar_lea.vmem %s5443_s5, %s3394_s11 }
  0x12   : > { %403 = vst [vmem:[#allocation2 + $0xc0] sm:$0xff] %v4619_v2  ;;  %404 = vst [vmem:[#allocation2 + $0xc8] sm:$0xff] %v4619_v2  ;;  %v278_v27 = vmul.f32 %v4713_v18, %v239_v22  ;;  %v279_v29 = vmul.f32 %v4713_v18, %v240_v23  ;;  %v241_v30 = vld [vmem:[%s4700_s20 + $0x20] sm:$0xff]  ;;  %v242_v34 = vld [vmem:[%s4700_s20 + $0x28] sm:$0xff] }
  0x13   : > { %405 = vst [vmem:[#allocation2 + $0xd0] sm:$0xff] %v4619_v2  ;;  %406 = vst [vmem:[#allocation2 + $0xd8] sm:$0xff] %v4619_v2  ;;  %3824 = vmatpush3.bf16.msra.mxu1 %v4536_v7  ;;  %v315_v25 = vadd.f32 %v4718_v19, %v276_v20  ;;  %v316_v26 = vadd.f32 %v4718_v19, %v277_v21  ;;  %v280_v35 = vmul.f32 %v4713_v18, %v241_v30  ;;  %v243_v38 = vld [vmem:[%s4700_s20 + $0x30] sm:$0xff]  ;;  %v244_v39 = vld [vmem:[%s4700_s20 + $0x38] sm:$0xff] }
  0x14   : > { %407 = vst [vmem:[#allocation2 + $0xe0] sm:$0xff] %v4619_v2  ;;  %408 = vst [vmem:[#allocation2 + $0xe8] sm:$0xff] %v4619_v2  ;;  %4016 = vmatpush3.bf16.msra.mxu0 %v4537_v8  ;;  %3825 = vmatprep.subr.bf16.mxu1 %v4538_v9  ;;  %v317_v33 = vadd.f32 %v4718_v19, %v278_v27  ;;  %v318_v36 = vadd.f32 %v4718_v19, %v279_v29  ;;  %v245_v51 = vld [vmem:[%s4700_s20 + $0x40] sm:$0xff]  ;;  %v246_v52 = vld [vmem:[%s4700_s20 + $0x48] sm:$0xff] }
  0x15   : > { %409 = vst [vmem:[#allocation2 + $0xf0] sm:$0xff] %v4619_v2  ;;  %410 = vst [vmem:[#allocation2 + $0xf8] sm:$0xff] %v4619_v2  ;;  %4017 = vmatprep.subr.bf16.mxu0 %v4539_v10  ;;  %v347_v31 = vmax.f32 %v315_v25, 0.0  ;;  %v348_v32 = vmax.f32 %v316_v26, 0.0  ;;  %v281_v37 = vmul.f32 %v4713_v18, %v242_v34  ;;  %v319_v43 = vadd.f32 %v4718_v19, %v280_v35  ;;  %v247_v57 = vld [vmem:[%s4700_s20 + $0x50] sm:$0xff]  ;;  %v248_v60 = vld [vmem:[%s4700_s20 + $0x58] sm:$0xff] }
  0x16   : > { %411 = vst [vmem:[#allocation2 + $0x100] sm:$0xff] %v4619_v2  ;;  %412 = vst [vmem:[#allocation2 + $0x108] sm:$0xff] %v4619_v2  ;;  %v349_v42 = vmax.f32 %v317_v33, 0.0  ;;  %v282_v44 = vmul.f32 %v4713_v18, %v243_v38  ;;  %v350_v46 = vmax.f32 %v318_v36, 0.0  ;;  %v283_v48 = vmul.f32 %v4713_v18, %v244_v39  ;;  %v249_v4 = vld [vmem:[%s4700_s20 + $0x60] sm:$0xff]  ;;  %v250_v5 = vld [vmem:[%s4700_s20 + $0x68] sm:$0xff] }
  0x17   : > { %413 = vst [vmem:[#allocation2 + $0x110] sm:$0xff] %v4619_v2  ;;  %414 = vst [vmem:[#allocation2 + $0x118] sm:$0xff] %v4619_v2  ;;  %3826 = vmatpush3.bf16.msra.mxu1 %v4538_v9  ;;  %v1657_v41 = vpack.c.bf16 %v348_v32, %v347_v31  ;;  %v320_v47 = vadd.f32 %v4718_v19, %v281_v37  ;;  %v351_v49 = vmax.f32 %v319_v43, 0.0  ;;  %v251_v14 = vld [vmem:[%s4700_s20 + $0x70] sm:$0xff]  ;;  %v252_v15 = vld [vmem:[%s4700_s20 + $0x78] sm:$0xff] }
  0x18   : > { %415 = vst [vmem:[#allocation2 + $0x120] sm:$0xff] %v4619_v2  ;;  %416 = vst [vmem:[#allocation2 + $0x128] sm:$0xff] %v4619_v2  ;;  %4018 = vmatpush3.bf16.msra.mxu0 %v4539_v10  ;;  %3827 = vmatprep.subr.bf16.mxu1 %v4540_v11  ;;  %v4753_v50 = vadd.f32 %v4718_v19, %v282_v44  ;;  %v4761_v55 = vadd.f32 %v4718_v19, %v283_v48  ;;  %v4548_v16 = vld [vmem:[%s5441_s3 + $0x148] sm:$0xff]   ;;  %v4552_v30 = vld [vmem:[%s5441_s3 + $0x10] sm:$0xff]  }
  0x19   : > { %417 = vst [vmem:[#allocation2 + $0x130] sm:$0xff] %v4619_v2  ;;  %418 = vst [vmem:[#allocation2 + $0x138] sm:$0xff] %v4619_v2  ;;  %4019 = vmatprep.subr.bf16.mxu0 %v4541_v12  ;;  %4025 = vmatprep.mubr.bf16.mxu0 %v1657_v41  ;;  %v352_v54 = vmax.f32 %v320_v47, 0.0  ;;  %v284_v56 = vmul.f32 %v4713_v18, %v245_v51  ;;  %v285_v59 = vmul.f32 %v4713_v18, %v246_v52  ;;  %v4549_v23 = vld [vmem:[%s5441_s3 + $0x8] sm:$0xff]   ;;  %v4550_v34 = vld [vmem:[%s5441_s3 + $0x150] sm:$0xff]  }
  0x1a   : > { %419 = vst [vmem:[#allocation2 + $0x140] sm:$0xff] %v4619_v2  ;;  %420 = vst [vmem:[#allocation2 + $0x148] sm:$0xff] %v4619_v2  ;;  %v353_v58 = vmax.f32 %v4753_v50, 0.0  ;;  %v286_v61 = vmul.f32 %v4713_v18, %v247_v57  ;;  %v354_v63 = vmax.f32 %v4761_v55, 0.0  ;;  %v287_v1 = vmul.f32 %v4713_v18, %v248_v60  ;;  %v254_v29 = vld [vmem:[%s4700_s20 + $0x88] sm:$0xff]  ;;  %v255_v39 = vld [vmem:[%s4700_s20 + $0x90] sm:$0xff] }
  0x1b   : > { %421 = vst [vmem:[#allocation2 + $0x150] sm:$0xff] %v4619_v2  ;;  %422 = vst [vmem:[#allocation2 + $0x158] sm:$0xff] %v4619_v2  ;;  %3828 = vmatpush3.bf16.msra.mxu1 %v4540_v11  ;;  %v4774_v0 = vadd.f32 %v4718_v19, %v284_v56  ;;  %v1658_v6 = vpack.c.bf16 %v350_v46, %v349_v42  ;;  %v288_v9 = vmul.f32 %v4713_v18, %v249_v4  ;;  %v257_v47 = vld [vmem:[%s4700_s20 + $0xa0] sm:$0xff]  ;;  %v258_v48 = vld [vmem:[%s4700_s20 + $0xa8] sm:$0xff] }
  0x1c   : > { %423 = vst [vmem:[#allocation2 + $0x160] sm:$0xff] %v4619_v2  ;;  %424 = vst [vmem:[#allocation2 + $0x168] sm:$0xff] %v4619_v2  ;;  %4020 = vmatpush3.bf16.msra.mxu0 %v4541_v12  ;;  %3829 = vmatprep.subr.bf16.mxu1 %v4542_v24  ;;  %v4783_v3 = vadd.f32 %v4718_v19, %v286_v61  ;;  %v4789_v8 = vadd.f32 %v4718_v19, %v287_v1  ;;  %v262_v4 = vld [vmem:[%s4700_s20 + $0xc8] sm:$0xff] }
  0x1d   : > { %425 = vst [vmem:[#allocation2 + $0x170] sm:$0xff] %v4619_v2  ;;  %426 = vst [vmem:[#allocation2 + $0x178] sm:$0xff] %v4619_v2  ;;  %4021 = vmatprep.subr.bf16.mxu0 %v4543_v28  ;;  %v355_v7 = vmax.f32 %v4774_v0, 0.0  ;;  %v1659_v10 = vpack.c.bf16 %v352_v54, %v351_v49  ;;  %v289_v13 = vmul.f32 %v4713_v18, %v250_v5  ;;  %v4553_v0 = vld [vmem:[%s5441_s3 + $0x160] sm:$0xff]  }
  0x1e   : > { %427 = vst [vmem:[#allocation2 + $0x180] sm:$0xff] %v4619_v2  ;;  %428 = vst [vmem:[#allocation2 + $0x188] sm:$0xff] %v4619_v2  ;;  %v357_v12 = vmax.f32 %v4783_v3, 0.0  ;;  %v358_v17 = vmax.f32 %v4789_v8, 0.0  ;;  %v4802_v20 = vadd.f32 %v4718_v19, %v288_v9  ;;  %v290_v21 = vmul.f32 %v4713_v18, %v251_v14 }
  0x1f   : > { %429 = vst [vmem:[#allocation2 + $0x190] sm:$0xff] %v4619_v2  ;;  %430 = vst [vmem:[#allocation2 + $0x198] sm:$0xff] %v4619_v2  ;;  %3830 = vmatpush3.bf16.msra.mxu1 %v4542_v24  ;;  %v291_v22 = vmul.f32 %v4713_v18, %v252_v15  ;;  %v4812_v24 = vadd.f32 %v4718_v19, %v289_v13  ;;  %v293_v33 = vmul.f32 %v4713_v18, %v254_v29  ;;  %v263_v15 = vld [vmem:[%s4700_s20 + $0xd0] sm:$0xff] }
  0x20   : > { %431 = vst [vmem:[#allocation2 + $0x1a0] sm:$0xff] %v4619_v2  ;;  %432 = vst [vmem:[#allocation2 + $0x1a8] sm:$0xff] %v4619_v2  ;;  %4022 = vmatpush3.bf16.msra.mxu0 %v4543_v28  ;;  %3831 = vmatprep.subr.bf16.mxu1 %v4544_v40  ;;  %v4780_v2 = vadd.f32 %v4718_v19, %v285_v59  ;;  %v359_v25 = vmax.f32 %v4802_v20, 0.0  ;;  %v4818_v26 = vadd.f32 %v4718_v19, %v290_v21  ;;  %v253_v28 = vld [vmem:[%s4700_s20 + $0x80] sm:$0xff]  ;;  %v260_v59 = vld [vmem:[%s4700_s20 + $0xb8] sm:$0xff] }
  0x21   : > { %434 = vst [vmem:[#allocation2 + $0x19] sm:$0xff] %v347_v31  ;;  %435 = vst [vmem:[#allocation2 + $0x21] sm:$0xff] %v348_v32  ;;  %4023 = vmatprep.subr.bf16.mxu0 %v4545_v45  ;;  %v4821_v27 = vadd.f32 %v4718_v19, %v291_v22  ;;  %v360_v31 = vmax.f32 %v4812_v24, 0.0  ;;  %v292_v32 = vmul.f32 %v4713_v18, %v253_v28  ;;  %v266_v24 = vld [vmem:[%s4700_s20 + $0xe8] sm:$0xff] }
  0x22   : > { %436 = vst [vmem:[#allocation2 + $0x31] sm:$0xff] %v349_v42  ;;  %437 = vst [vmem:[#allocation2 + $0x39] sm:$0xff] %v350_v46  ;;  %v356_v11 = vmax.f32 %v4780_v2, 0.0  ;;  %v361_v35 = vmax.f32 %v4818_v26, 0.0  ;;  %v4844_v38 = vadd.f32 %v4718_v19, %v293_v33  ;;  %v294_v42 = vmul.f32 %v4713_v18, %v255_v39  ;;  %v4557_v26 = vld [vmem:[%s5441_s3 + $0x178] sm:$0xff]  }
  0x23   : > { %438 = vst [vmem:[#allocation2 + $0x49] sm:$0xff] %v351_v49  ;;  %439 = vst [vmem:[#allocation2 + $0x51] sm:$0xff] %v352_v54  ;;  %3832 = vmatpush3.bf16.msra.mxu1 %v4544_v40  ;;  %v362_v36 = vmax.f32 %v4821_v27, 0.0  ;;  %v4841_v37 = vadd.f32 %v4718_v19, %v292_v32  ;;  %v1660_v40 = vpack.c.bf16 %v354_v63, %v353_v58  ;;  %v4551_v49 = vld [vmem:[%s5441_s3 + $0x158] sm:$0xff]  }
  0x24   : > { %440 = vst [vmem:[#allocation2 + $0x61] sm:$0xff] %v353_v58  ;;  %441 = vst [vmem:[#allocation2 + $0x69] sm:$0xff] %v354_v63  ;;  %4024 = vmatpush3.bf16.msra.mxu0 %v4545_v45  ;;  %3865 = vmatprep.subr.bf16.mxu1 %v4546_v53  ;;  %v1661_v43 = vpack.c.bf16 %v356_v11, %v355_v7  ;;  %v364_v45 = vmax.f32 %v4844_v38, 0.0  ;;  %v4864_v50 = vadd.f32 %v4718_v19, %v294_v42  ;;  %v259_v58 = vld [vmem:[%s4700_s20 + $0xb0] sm:$0xff]  ;;  %v261_v63 = vld [vmem:[%s4700_s20 + $0xc0] sm:$0xff] }
  0x25   : > { %4057 = vmatprep.subr.bf16.mxu0 %v4547_v62  ;;  %442 = vst [vmem:[#allocation2 + $0x79] sm:$0xff] %v355_v7  ;;  %443 = vst [vmem:[#allocation2 + $0x81] sm:$0xff] %v356_v11  ;;  %v363_v44 = vmax.f32 %v4841_v37, 0.0  ;;  %v296_v51 = vmul.f32 %v4713_v18, %v257_v47  ;;  %v297_v52 = vmul.f32 %v4713_v18, %v258_v48  ;;  %v4564_v27 = vld [vmem:[%s5441_s3 + $0x38] sm:$0xff]   ;;  %v4561_v37 = vld [vmem:[%s5441_s3 + $0x188] sm:$0xff]  }
  0x26   : > { %3834 = vmatmul.mubr.bf16.vlgmr.msra.gmra.mrb[0].mxu1 %v1657_v41  ;;  %444 = vst [vmem:[#allocation2 + $0x91] sm:$0xff] %v357_v12  ;;  %445 = vst [vmem:[#allocation2 + $0x99] sm:$0xff] %v358_v17  ;;  %v256_v41 = vld [vmem:[%s4700_s20 + $0x98] sm:$0xff]  ;;  %v365_v55 = vmax.f32 %v4864_v50, 0.0  ;;  %v298_v61 = vmul.f32 %v4713_v18, %v259_v58  ;;  %v300_v5 = vmul.f32 %v4713_v18, %v261_v63 }
  0x27   : > { %4026 = vmatmul.mubr.bf16.vlgmr.msra.gmra.mrb[0].mxu0 %v1658_v6  ;;  %3866 = vmatpush3.bf16.msra.mxu1 %v4546_v53  ;;  %446 = vst [vmem:[#allocation2 + $0xa9] sm:$0xff] %v359_v25  ;;  %447 = vst [vmem:[#allocation2 + $0xb1] sm:$0xff] %v360_v31  ;;  %v295_v46 = vmul.f32 %v4713_v18, %v256_v41  ;;  %v4555_v53 = vld [vmem:[%s5441_s3 + $0x18] sm:$0xff]   ;;  %v4880_v56 = vadd.f32 %v4718_v19, %v296_v51 }
  0x28   : > { %4058 = vmatpush3.bf16.msra.mxu0 %v4547_v62  ;;  %3837 = vmatprep.mubr.bf16.mxu1 %v1658_v6  ;;  %448 = vst [vmem:[#allocation2 + $0xc1] sm:$0xff] %v361_v35  ;;  %449 = vst [vmem:[#allocation2 + $0xc9] sm:$0xff] %v362_v36  ;;  %v4883_v57 = vadd.f32 %v4718_v19, %v297_v52  ;;  %v299_v62 = vmul.f32 %v4713_v18, %v260_v59  ;;  %v4558_v6 = vld [vmem:[%s5441_s3 + $0x20] sm:$0xff]  }
  0x29   : > { %4059 = vmatprep.subr.bf16.mxu0 %v4548_v16  ;;  %4029 = vmatprep.mubr.bf16.mxu0 %v1659_v10  ;;  %450 = vst [vmem:[#allocation2 + $0xd9] sm:$0xff] %v363_v44  ;;  %451 = vst [vmem:[#allocation2 + $0xe1] sm:$0xff] %v364_v45  ;;  %v4876_v54 = vadd.f32 %v4718_v19, %v295_v46  ;;  %v367_v1 = vmax.f32 %v4880_v56, 0.0  ;;  %v4906_v7 = vadd.f32 %v4718_v19, %v298_v61  ;;  %v1931_v39 = vld [vmem:[#allocation2 + $0x1a] sm:$0xff]  ;;  %v4562_v46 = vld [vmem:[%s5441_s3 + $0x30] sm:$0xff]  }
  0x2a   : > { %3867 = vmatprep.subr.bf16.mxu1 %v4549_v23  ;;  %452 = vst [vmem:[#allocation2 + $0xf1] sm:$0xff] %v365_v55  ;;  %v368_v2 = vmax.f32 %v4883_v57, 0.0  ;;  %v4909_v9 = vadd.f32 %v4718_v19, %v299_v62  ;;  %v1662_v11 = vpack.c.bf16 %v358_v17, %v357_v12  ;;  %v4921_v13 = vadd.f32 %v4718_v19, %v300_v5  ;;  %v4554_v17 = vld [vmem:[%s5441_s3 + $0x168] sm:$0xff]   ;;  %v4559_v52 = vld [vmem:[%s5441_s3 + $0x180] sm:$0xff]   ;;  %v1936_v58 = vld [vmem:[#allocation2 + $0x52] sm:$0xff] }
  0x2b   : > { %3868 = vmatpush3.bf16.msra.mxu1 %v4549_v23  ;;  %v366_v60 = vmax.f32 %v4876_v54, 0.0  ;;  %454 = vst [vmem:[#allocation2 + $0x109] sm:$0xff] %v367_v1  ;;  %v1663_v3 = vpack.c.bf16 %v360_v31, %v359_v25  ;;  %v369_v8 = vmax.f32 %v4906_v7, 0.0  ;;  %v302_v21 = vmul.f32 %v4713_v18, %v263_v15  ;;  %v265_v23 = vld [vmem:[%s4700_s20 + $0xe0] sm:$0xff]  ;;  %v4560_v25 = vld [vmem:[%s5441_s3 + $0x28] sm:$0xff]   ;;  %v4563_v54 = vld [vmem:[%s5441_s3 + $0x190] sm:$0xff]  }
  0x2c   : > { %4060 = vmatpush3.bf16.msra.mxu0 %v4548_v16  ;;  %3869 = vmatprep.subr.bf16.mxu1 %v4552_v30  ;;  %455 = vst [vmem:[#allocation2 + $0x111] sm:$0xff] %v368_v2  ;;  %v370_v12 = vmax.f32 %v4909_v9, 0.0  ;;  %v264_v16 = vld [vmem:[%s4700_s20 + $0xd8] sm:$0xff]  ;;  %v371_v20 = vmax.f32 %v4921_v13, 0.0  ;;  %v304_v29 = vmul.f32 %v4713_v18, %v265_v23  ;;  %v305_v32 = vmul.f32 %v4713_v18, %v266_v24  ;;  %v5009_v61 = vld [vmem:[%s5441_s3 + $0x80] sm:$0xff]   ;;  %v4571_v24 = vld [vmem:[%s5441_s3 + $0x1b0] sm:$0xff]  }
  0x2d   : > { %4061 = vmatprep.subr.bf16.mxu0 %v4550_v34  ;;  %453 = vst [vmem:[#allocation2 + $0xf9] sm:$0xff] %v366_v60  ;;  %v303_v22 = vmul.f32 %v4713_v18, %v264_v16  ;;  %456 = vst [vmem:[#allocation2 + $0x121] sm:$0xff] %v369_v8  ;;  %v1664_v48 = vpack.c.bf16 %v362_v36, %v361_v35  ;;  %v1933_v35 = vld [vmem:[#allocation2 + $0x32] sm:$0xff]  ;;  %v1934_v36 = vld [vmem:[#allocation2 + $0x3a] sm:$0xff]  ;;  %v571_v59 = vpack.c.bf16 %v364_v45, %v363_v44 }
  0x2e   : > { %3838 = vmatmul.mubr.bf16.gmra.mrb[4].mxu1 %v1659_v10  ;;  %v301_v10 = vmul.f32 %v4713_v18, %v262_v4  ;;  %457 = vst [vmem:[#allocation2 + $0x129] sm:$0xff] %v370_v12  ;;  %458 = vst [vmem:[#allocation2 + $0x139] sm:$0xff] %v371_v20  ;;  %v4963_v33 = vadd.f32 %v4718_v19, %v304_v29  ;;  %v5011_v62 = vpack.c.bf16 %v1934_v36, %v1933_v35  ;;  %v1937_v38 = vld [vmem:[#allocation2 + $0x62] sm:$0xff]  ;;  %v1938_v44 = vld [vmem:[#allocation2 + $0x6a] sm:$0xff] }
  0x2f   : > { %4030 = vmatmul.mubr.bf16.gmra.mrb[4].mxu0 %v1660_v40  ;;  %3841 = vmatprep.mubr.bf16.mxu1 %v1660_v40  ;;  %v4957_v31 = vadd.f32 %v4718_v19, %v303_v22  ;;  %v1932_v40 = vld [vmem:[#allocation2 + $0x22] sm:$0xff]  ;;  %v572_v63 = vpack.c.bf16 %v366_v60, %v365_v55  ;;  %v1939_v45 = vld [vmem:[#allocation2 + $0x7a] sm:$0xff]  ;;  %v267_v55 = vld [vmem:[%s4700_s20 + $0xf0] sm:$0xff]  ;;  %v573_v4 = vpack.c.bf16 %v368_v2, %v367_v1 }
  0x30   : > { %4062 = vmatpush3.bf16.msra.mxu0 %v4550_v34  ;;  %4033 = vmatprep.mubr.bf16.mxu0 %v1661_v43  ;;  %v4930_v14 = vadd.f32 %v4718_v19, %v301_v10  ;;  %v4556_v34 = vld [vmem:[%s5441_s3 + $0x170] sm:$0xff]   ;;  %v375_v47 = vmax.f32 %v4963_v33, 0.0  ;;  %v4986_v51 = vpack.c.bf16 %v1932_v40, %v1931_v39  ;;  %v1940_v50 = vld [vmem:[#allocation2 + $0x82] sm:$0xff]  ;;  %v268_v60 = vld [vmem:[%s4700_s20 + $0xf8] sm:$0xff]  ;;  %v306_v5 = vmul.f32 %v4713_v18, %v267_v55 }
  0x31   : > { %4063 = vmatprep.subr.bf16.mxu0 %v4551_v49  ;;  %3870 = vmatpush3.bf16.msra.mxu1 %v4552_v30  ;;  %v4954_v30 = vadd.f32 %v4718_v19, %v302_v21  ;;  %v374_v42 = vmax.f32 %v4957_v31, 0.0  ;;  %v5036_v10 = vpack.c.bf16 %v1938_v44, %v1937_v38  ;;  %v1941_v2 = vld [vmem:[#allocation2 + $0x92] sm:$0xff]  ;;  %v1942_v7 = vld [vmem:[#allocation2 + $0x9a] sm:$0xff]  ;;  %v4569_v22 = vld [vmem:[%s5441_s3 + $0x1a8] sm:$0xff]  }
  0x32   : > { %3871 = vmatprep.subr.bf16.mxu1 %v4555_v53  ;;  %v372_v28 = vmax.f32 %v4930_v14, 0.0  ;;  %462 = vst [vmem:[#allocation2 + $0x169] sm:$0xff] %v375_v47  ;;  %v5045_v15 = vadd.f32 %v4718_v19, %v306_v5  ;;  %v1944_v9 = vld [vmem:[#allocation2 + $0xb2] sm:$0xff]  ;;  %v5068_v16 = vpack.c.bf16 %v1942_v7, %v1941_v2  ;;  %v1945_v13 = vld [vmem:[#allocation2 + $0xc2] sm:$0xff]  ;;  %v1946_v14 = vld [vmem:[#allocation2 + $0xca] sm:$0xff] }
  0x33   : > { %v373_v41 = vmax.f32 %v4954_v30, 0.0  ;;  %461 = vst [vmem:[#allocation2 + $0x159] sm:$0xff] %v374_v42  ;;  %v1948_v23 = vld [vmem:[#allocation2 + $0xe2] sm:$0xff]  ;;  %v4573_v39 = vld [vmem:[%s5441_s3 + $0x1b8] sm:$0xff]   ;;  %v473_v36 = vld [vmem:[#allocation2 + $0x50] sm:$0xff] }
  0x34   : > { %4064 = vmatpush3.bf16.msra.mxu0 %v4551_v49  ;;  %459 = vst [vmem:[#allocation2 + $0x141] sm:$0xff] %v372_v28  ;;  %v377_v57 = vmax.f32 %v5045_v15, 0.0  ;;  %v4602_v29 = vld [vmem:[#allocation2] sm:$0xff]  ;;  %v1949_v33 = vld [vmem:[#allocation2 + $0xf2] sm:$0xff]  ;;  %v472_v35 = vld [vmem:[#allocation2 + $0x48] sm:$0xff] }
  0x35   : > { %4065 = vmatprep.subr.bf16.mxu0 %v4553_v0  ;;  %3872 = vmatpush3.bf16.msra.mxu1 %v4555_v53  ;;  %460 = vst [vmem:[#allocation2 + $0x151] sm:$0xff] %v373_v41  ;;  %v1935_v53 = vld [vmem:[#allocation2 + $0x4a] sm:$0xff]  ;;  %v5092_v30 = vpack.c.bf16 %v4602_v29, %v4602_v29  ;;  %v1950_v40 = vld [vmem:[#allocation2 + $0xfa] sm:$0xff] }
  0x36   : > { %3842 = vmatmul.mubr.bf16.gmra.mrb[8].mxu1 %v1661_v43  ;;  %3873 = vmatprep.subr.bf16.mxu1 %v4558_v6  ;;  %v4971_v43 = vadd.f32 %v4718_v19, %v305_v32  ;;  %464 = vst [vmem:[#allocation2 + $0x181] sm:$0xff] %v377_v57  ;;  %v468_v32 = vld [vmem:[#allocation2 + $0x18] sm:$0xff]  ;;  %v4570_v38 = vld [vmem:[%s5441_s3 + $0x90] sm:$0xff]  }
  0x37   : > { %4034 = vmatmul.mubr.bf16.gmra.mrb[8].mxu0 %v1662_v11  ;;  %3845 = vmatprep.mubr.bf16.mxu1 %v1662_v11  ;;  %v574_v11 = vpack.c.bf16 %v370_v12, %v369_v8  ;;  %v4567_v8 = vld [vmem:[%s5441_s3 + $0x1a0] sm:$0xff]   ;;  %v575_v12 = vpack.c.bf16 %v372_v28, %v371_v20  ;;  %v5090_v28 = vpack.c.bf16 %v1946_v14, %v1945_v13  ;;  %v476_v55 = vld [vmem:[#allocation2 + $0x78] sm:$0xff]  ;;  %v480_v13 = vld [vmem:[#allocation2 + $0xa8] sm:$0xff] }
  0x38   : > { %4066 = vmatpush3.bf16.msra.mxu0 %v4553_v0  ;;  %4037 = vmatprep.mubr.bf16.mxu0 %v1663_v3  ;;  %v376_v49 = vmax.f32 %v4971_v43, 0.0  ;;  %v5017_v0 = vpack.c.bf16 %v1936_v58, %v1935_v53  ;;  %v1947_v20 = vld [vmem:[#allocation2 + $0xda] sm:$0xff]  ;;  %v1951_v43 = vld [vmem:[#allocation2 + $0x10a] sm:$0xff]  ;;  %v1953_v53 = vld [vmem:[#allocation2 + $0x122] sm:$0xff] }
  0x39   : > { %4067 = vmatprep.subr.bf16.mxu0 %v4554_v17  ;;  %3874 = vmatpush3.bf16.msra.mxu1 %v4558_v6  ;;  %v307_v6 = vmul.f32 %v4713_v18, %v268_v60  ;;  %v4565_v18 = vld [vmem:[%s5441_s3 + $0x198] sm:$0xff]   ;;  %v5094_v31 = vpack.c.bf16 %v1948_v23, %v1947_v20  ;;  %v1954_v58 = vld [vmem:[#allocation2 + $0x12a] sm:$0xff]  ;;  %v482_v20 = vld [vmem:[#allocation2 + $0xc0] sm:$0xff] }
  0x3a   : > { %3875 = vmatprep.subr.bf16.mxu1 %v4560_v25  ;;  %463 = vst [vmem:[#allocation2 + $0x171] sm:$0xff] %v376_v49  ;;  %v4572_v60 = vld [vmem:[%s5441_s3 + $0x98] sm:$0xff]   ;;  %v481_v14 = vld [vmem:[#allocation2 + $0xb0] sm:$0xff] }
  0x3b   : > { %v5048_v56 = vadd.f32 %v4718_v19, %v307_v6  ;;  %v1943_v19 = vld [vmem:[#allocation2 + $0xaa] sm:$0xff]  ;;  %v1956_v44 = vld [vmem:[#allocation2 + $0x142] sm:$0xff]  ;;  %v1958_v6 = vld [vmem:[#allocation2 + $0x15a] sm:$0xff] }
  0x3c   : > { %4068 = vmatpush3.bf16.msra.mxu0 %v4554_v17  ;;  %v576_v17 = vpack.c.bf16 %v374_v42, %v373_v41  ;;  %v5074_v21 = vpack.c.bf16 %v1944_v9, %v1943_v19  ;;  %v470_v41 = vld [vmem:[#allocation2 + $0x30] sm:$0xff]  ;;  %v471_v42 = vld [vmem:[#allocation2 + $0x38] sm:$0xff]  ;;  %v4574_v19 = vld [vmem:[%s5441_s3 + $0xa0] sm:$0xff]  }
  0x3d   : > { %4069 = vmatprep.subr.bf16.mxu0 %v4556_v34  ;;  %3876 = vmatpush3.bf16.msra.mxu1 %v4560_v25  ;;  %v378_v1 = vmax.f32 %v5048_v56, 0.0  ;;  %v5088_v25 = vpack.c.bf16 %v376_v49, %v375_v47  ;;  %v5106_v47 = vld [vmem:[%s5441_s3 + $0x1c0] sm:$0xff]   ;;  %v5110_v49 = vpack.c.bf16 %v1950_v40, %v1949_v33  ;;  %v1957_v5 = vld [vmem:[#allocation2 + $0x152] sm:$0xff] }
  0x3e   : > { %3846 = vmatmul.mubr.bf16.gmra.mrb[12].mxu1 %v1663_v3  ;;  %3877 = vmatprep.subr.bf16.mxu1 %v4562_v46  ;;  %v5042_v3 = vpack.c.bf16 %v1940_v50, %v1939_v45  ;;  %v5128_v45 = vpack.c.bf16 %v473_v36, %v472_v35  ;;  %v5130_v50 = vpack.c.bf16 %v1954_v58, %v1953_v53  ;;  %v4580_v15 = vld [vmem:[%s5441_s3 + $0xb8] sm:$0xff]   ;;  %v4577_v35 = vld [vmem:[%s5441_s3 + $0x1c8] sm:$0xff]   ;;  %v490_v53 = vld [vmem:[#allocation2 + $0x120] sm:$0xff] }
  0x3f   : > { %4038 = vmatmul.mubr.bf16.gmra.mrb[12].mxu0 %v1664_v48  ;;  %3849 = vmatprep.mubr.bf16.mxu1 %v1664_v48  ;;  %465 = vst [vmem:[#allocation2 + $0x189] sm:$0xff] %v378_v1  ;;  %v5164_v23 = vpack.c.bf16 %v378_v1, %v377_v57  ;;  %v484_v56 = vld [vmem:[#allocation2 + $0xd8] sm:$0xff]  ;;  %v485_v57 = vld [vmem:[#allocation2 + $0xe0] sm:$0xff]  ;;  %v486_v1 = vld [vmem:[#allocation2 + $0xf0] sm:$0xff] }
  0x40   : > { %4070 = vmatpush3.bf16.msra.mxu0 %v4556_v34  ;;  %4073 = vmatprep.mubr.bf16.mxu0 %v4986_v51  ;;  %v469_v34 = vld [vmem:[#allocation2 + $0x20] sm:$0xff]  ;;  %v488_v36 = vld [vmem:[#allocation2 + $0x108] sm:$0xff] }
  0x41   : > { %4071 = vmatprep.subr.bf16.mxu0 %v4557_v26  ;;  %3878 = vmatpush3.bf16.msra.mxu1 %v4562_v46  ;;  %v1952_v46 = vld [vmem:[#allocation2 + $0x112] sm:$0xff]  ;;  %v5108_v48 = vpack.c.bf16 %v469_v34, %v468_v32  ;;  %v1959_v2 = vld [vmem:[#allocation2 + $0x16a] sm:$0xff] }
  0x42   : > { %3879 = vmatprep.subr.bf16.mxu1 %v4564_v27  ;;  %v1960_v7 = vld [vmem:[#allocation2 + $0x172] sm:$0xff]  ;;  %v483_v32 = vld [vmem:[#allocation2 + $0xc8] sm:$0xff] }
  0x43   : > { %v4578_v34 = vld [vmem:[%s5441_s3 + $0xb0] sm:$0xff]   ;;  %v5172_v40 = vpack.c.bf16 %v483_v32, %v482_v20  ;;  %v491_v58 = vld [vmem:[#allocation2 + $0x128] sm:$0xff]  ;;  %v4589_v20 = vld [vmem:[%s5441_s3 + $0x1f8] sm:$0xff]  }
  0x44   : > { %4072 = vmatpush3.bf16.msra.mxu0 %v4557_v26  ;;  %v5112_v26 = vpack.c.bf16 %v471_v42, %v470_v41  ;;  %v487_v41 = vld [vmem:[#allocation2 + $0xf8] sm:$0xff]  ;;  %v5183_v42 = vld [vmem:[%s5441_s3 + $0xc0] sm:$0xff]   ;;  %v4586_v32 = vld [vmem:[%s5441_s3 + $0xd0] sm:$0xff]  }
  0x45   : > { %4105 = vmatprep.subr.bf16.mxu0 %v4559_v52  ;;  %3880 = vmatpush3.bf16.msra.mxu1 %v4564_v27  ;;  %v5114_v27 = vpack.c.bf16 %v1952_v46, %v1951_v43  ;;  %v5185_v43 = vpack.c.bf16 %v485_v57, %v484_v56  ;;  %v5187_v46 = vpack.c.bf16 %v487_v41, %v486_v1  ;;  %v2545_v56 = vld [vmem:[#allocation2 + $0x39] sm:$0xff]  ;;  %v4594_v57 = vld [vmem:[%s5441_s3 + $0xf0] sm:$0xff]  }
  0x46   : > { %3850 = vmatmul.mubr.bf16.gmra.mrb[16].mxu1 %v571_v59  ;;  %3913 = vmatprep.subr.bf16.mxu1 %v5009_v61  ;;  %v474_v59 = vld [vmem:[#allocation2 + $0x60] sm:$0xff]  ;;  %v1962_v29 = vld [vmem:[#allocation2 + $0x18a] sm:$0xff] }
  0x47   : > { %4074 = vmatmul.mubr.bf16.vlgmr.msra.gmra.mrb[0].mxu0 %v5011_v62  ;;  %3853 = vmatprep.mubr.bf16.mxu1 %v572_v63  ;;  %v475_v63 = vld [vmem:[#allocation2 + $0x68] sm:$0xff]  ;;  %v2547_v41 = vld [vmem:[#allocation2 + $0x51] sm:$0xff] }
  0x48   : > { %4106 = vmatpush3.bf16.msra.mxu0 %v4559_v52  ;;  %4077 = vmatprep.mubr.bf16.mxu0 %v5017_v0  ;;  %v4568_v52 = vld [vmem:[%s5441_s3 + $0x88] sm:$0xff]  }
  0x49   : > { %4107 = vmatprep.subr.bf16.mxu0 %v4561_v37 }
  0x4c   : > { %4108 = vmatpush3.bf16.msra.mxu0 %v4561_v37  ;;  %v1955_v37 = vld [vmem:[#allocation2 + $0x13a] sm:$0xff] }
  0x4d   : > { %4109 = vmatprep.subr.bf16.mxu0 %v4563_v54 }
  0x4e   : > { %3854 = vmatmul.mubr.bf16.gmra.mrb[20].mxu1 %v573_v4  ;;  %v477_v4 = vld [vmem:[#allocation2 + $0x80] sm:$0xff] }
  0x4f   : > { %4078 = vmatmul.mubr.bf16.gmra.mrb[4].mxu0 %v5036_v10  ;;  %3857 = vmatprep.mubr.bf16.mxu1 %v574_v11  ;;  %v478_v11 = vld [vmem:[#allocation2 + $0x90] sm:$0xff]  ;;  %v5146_v9 = vpack.c.bf16 %v477_v4, %v476_v55  ;;  %v4583_v4 = vld [vmem:[%s5441_s3 + $0x1e0] sm:$0xff]  }
  0x50   : > { %4081 = vmatprep.mubr.bf16.mxu0 %v5042_v3  ;;  %4110 = vmatpush3.bf16.msra.mxu0 %v4563_v54  ;;  %v5132_v54 = vpack.c.bf16 %v475_v63, %v474_v59  ;;  %v4579_v59 = vld [vmem:[%s5441_s3 + $0x1d0] sm:$0xff]  }
  0x51   : > { %4111 = vmatprep.subr.bf16.mxu0 %v4565_v18  ;;  %v494_v55 = vld [vmem:[#allocation2 + $0x150] sm:$0xff] }
  0x54   : > { %4112 = vmatpush3.bf16.msra.mxu0 %v4565_v18  ;;  %v479_v18 = vld [vmem:[#allocation2 + $0x98] sm:$0xff] }
  0x55   : > { %4113 = vmatprep.subr.bf16.mxu0 %v4567_v8 }
  0x56   : > { %3858 = vmatmul.mubr.bf16.gmra.mrb[24].mxu1 %v575_v12  ;;  %v5150_v12 = vpack.c.bf16 %v479_v18, %v478_v11  ;;  %v4585_v11 = vld [vmem:[%s5441_s3 + $0x1e8] sm:$0xff]  }
  0x57   : > { %4082 = vmatmul.mubr.bf16.gmra.mrb[8].mxu0 %v5068_v16  ;;  %3861 = vmatprep.mubr.bf16.mxu1 %v576_v17  ;;  %v5152_v17 = vpack.c.bf16 %v1960_v7, %v1959_v2  ;;  %v496_v18 = vld [vmem:[#allocation2 + $0x168] sm:$0xff]  ;;  %v497_v2 = vld [vmem:[#allocation2 + $0x170] sm:$0xff] }
  0x58   : > { %4085 = vmatprep.mubr.bf16.mxu0 %v5074_v21  ;;  %4114 = vmatpush3.bf16.msra.mxu0 %v4567_v8  ;;  %v5148_v8 = vpack.c.bf16 %v1958_v6, %v1957_v5  ;;  %v1013_v7 = vld [vmem:[#allocation2 + $0x2] sm:$0xff] }
  0x59   : > { %4115 = vmatprep.subr.bf16.mxu0 %v4569_v22 }
  0x5c   : > { %4116 = vmatpush3.bf16.msra.mxu0 %v4569_v22  ;;  %v4576_v22 = vld [vmem:[%s5441_s3 + $0xa8] sm:$0xff]  }
  0x5d   : > { %4117 = vmatprep.subr.bf16.mxu0 %v4571_v24 }
  0x5e   : > { %3862 = vmatmul.mubr.bf16.gmra.mrb[28].mxu1 %v5088_v25 }
  0x5f   : > { %4086 = vmatmul.mubr.bf16.gmra.mrb[12].mxu0 %v5090_v28  ;;  %3881 = vmatprep.mubr.bf16.mxu1 %v5092_v30 }
  0x60   : > { %4089 = vmatprep.mubr.bf16.mxu0 %v5094_v31  ;;  %4118 = vmatpush3.bf16.msra.mxu0 %v4571_v24  ;;  %v1961_v24 = vld [vmem:[#allocation2 + $0x182] sm:$0xff] }
  0x61   : > { %4119 = vmatprep.subr.bf16.mxu0 %v4573_v39  ;;  %v1978_v33 = vpack.c.bf16 %v1962_v29, %v1961_v24  ;;  %v4591_v24 = vld [vmem:[%s5441_s3 + $0x200] sm:$0xff]   ;;  %v4584_v29 = vld [vmem:[%s5441_s3 + $0xc8] sm:$0xff]  }
  0x64   : > { %4120 = vmatpush3.bf16.msra.mxu0 %v4573_v39  ;;  %v5170_v39 = vpack.c.bf16 %v481_v14, %v480_v13  ;;  %v5229_v13 = vpack.c.bf16 %v497_v2, %v496_v18 }
  0x65   : > { %4153 = vmatprep.subr.bf16.mxu0 %v5106_v47 }
  0x66   : > { %3882 = vmatmul.mubr.bf16.vlgmr.msra.gmra.mrb[0].mxu1 %v5108_v48 }
  0x67   : > { %4090 = vmatmul.mubr.bf16.gmra.mrb[16].mxu0 %v5110_v49  ;;  %3914 = vmatpush3.bf16.msra.mxu1 %v5009_v61  ;;  %v5134_v61 = vpack.c.bf16 %v1956_v44, %v1955_v37  ;;  %v5203_v37 = vpack.c.bf16 %v491_v58, %v490_v53  ;;  %v493_v44 = vld [vmem:[#allocation2 + $0x140] sm:$0xff]  ;;  %v4593_v53 = vld [vmem:[%s5441_s3 + $0x208] sm:$0xff]   ;;  %v2552_v58 = vld [vmem:[#allocation2 + $0x91] sm:$0xff] }
  0x68   : > { %3885 = vmatprep.mubr.bf16.mxu1 %v5112_v26  ;;  %4093 = vmatprep.mubr.bf16.mxu0 %v5114_v27 }
  0x69   : > { %3915 = vmatprep.subr.bf16.mxu1 %v4568_v52 }
  0x6b   : > { %3916 = vmatpush3.bf16.msra.mxu1 %v4568_v52  ;;  %v489_v52 = vld [vmem:[#allocation2 + $0x110] sm:$0xff] }
  0x6c   : > { %3917 = vmatprep.subr.bf16.mxu1 %v4570_v38  ;;  %v5201_v63 = vpack.c.bf16 %v489_v52, %v488_v36 }
  0x6e   : > { %3886 = vmatmul.mubr.bf16.gmra.mrb[4].mxu1 %v5128_v45 }
  0x6f   : > { %4094 = vmatmul.mubr.bf16.gmra.mrb[20].mxu0 %v5130_v50  ;;  %3889 = vmatprep.mubr.bf16.mxu1 %v5132_v54 }
  0x70   : > { %4097 = vmatprep.mubr.bf16.mxu0 %v5134_v61  ;;  %3918 = vmatpush3.bf16.msra.mxu1 %v4570_v38  ;;  %v4581_v38 = vld [vmem:[%s5441_s3 + $0x1d8] sm:$0xff]  }
  0x71   : > { %3919 = vmatprep.subr.bf16.mxu1 %v4572_v60 }
  0x74   : > { %3920 = vmatpush3.bf16.msra.mxu1 %v4572_v60  ;;  %v495_v60 = vld [vmem:[#allocation2 + $0x158] sm:$0xff] }
  0x75   : > { %3921 = vmatprep.subr.bf16.mxu1 %v4574_v19  ;;  %v5217_v6 = vpack.c.bf16 %v495_v60, %v494_v55  ;;  %v2555_v55 = vld [vmem:[#allocation2 + $0xb1] sm:$0xff]  ;;  %v2556_v60 = vld [vmem:[#allocation2 + $0xc1] sm:$0xff] }
  0x76   : > { %3890 = vmatmul.mubr.bf16.gmra.mrb[8].mxu1 %v5146_v9 }
  0x77   : > { %4098 = vmatmul.mubr.bf16.gmra.mrb[24].mxu0 %v5148_v8  ;;  %3893 = vmatprep.mubr.bf16.mxu1 %v5150_v12 }
  0x78   : > { %4101 = vmatprep.mubr.bf16.mxu0 %v5152_v17  ;;  %3922 = vmatpush3.bf16.msra.mxu1 %v4574_v19  ;;  %v1014_v19 = vld [vmem:[#allocation2 + $0xa] sm:$0xff] }
  0x79   : > { %3923 = vmatprep.subr.bf16.mxu1 %v4576_v22  ;;  %v1045_v14 = vpack.c.bf16 %v1014_v19, %v1013_v7  ;;  %v2559_v7 = vld [vmem:[#allocation2 + $0xe1] sm:$0xff]  ;;  %v2560_v19 = vld [vmem:[#allocation2 + $0xf1] sm:$0xff] }
  0x7c   : > { %3924 = vmatpush3.bf16.msra.mxu1 %v4576_v22  ;;  %v4587_v22 = vld [vmem:[%s5441_s3 + $0x1f0] sm:$0xff]  }
  0x7d   : > { %3925 = vmatprep.subr.bf16.mxu1 %v4578_v34 }
  0x7e   : > { %3894 = vmatmul.mubr.bf16.gmra.mrb[12].mxu1 %v5170_v39 }
  0x7f   : > { %4102 = vmatmul.mubr.bf16.gmra.mrb[28].mxu0 %v1978_v33  ;;  %3897 = vmatprep.mubr.bf16.mxu1 %v5172_v40  ;;  %v4590_v33 = vld [vmem:[%s5441_s3 + $0xe0] sm:$0xff]  }
  0x80   : > { %4121 = vmatprep.mubr.bf16.mxu0 %v5112_v26  ;;  %3926 = vmatpush3.bf16.msra.mxu1 %v4578_v34  ;;  %v4588_v34 = vld [vmem:[%s5441_s3 + $0xd8] sm:$0xff]  }
  0x81   : > { %3927 = vmatprep.subr.bf16.mxu1 %v4580_v15 }
  0x84   : > { %3928 = vmatpush3.bf16.msra.mxu1 %v4580_v15 }
  0x85   : > { %3961 = vmatprep.subr.bf16.mxu1 %v5183_v42 }
  0x86   : > { %3898 = vmatmul.mubr.bf16.gmra.mrb[16].mxu1 %v5185_v43 }
  0x87   : > { %4122 = vmatmul.mubr.bf16.vlgmr.msra.gmra.mrb[0].mxu0 %v5128_v45  ;;  %3901 = vmatprep.mubr.bf16.mxu1 %v5187_v46 }
  0x88   : > { %4154 = vmatpush3.bf16.msra.mxu0 %v5106_v47  ;;  %4125 = vmatprep.mubr.bf16.mxu0 %v5132_v54  ;;  %v492_v47 = vld [vmem:[#allocation2 + $0x138] sm:$0xff] }
  0x89   : > { %4155 = vmatprep.subr.bf16.mxu0 %v4577_v35  ;;  %v5215_v5 = vpack.c.bf16 %v493_v44, %v492_v47 }
  0x8c   : > { %4156 = vmatpush3.bf16.msra.mxu0 %v4577_v35  ;;  %v2549_v35 = vld [vmem:[#allocation2 + $0x69] sm:$0xff] }
  0x8d   : > { %4157 = vmatprep.subr.bf16.mxu0 %v4579_v59 }
  0x8e   : > { %3902 = vmatmul.mubr.bf16.gmra.mrb[20].mxu1 %v5201_v63 }
  0x8f   : > { %4126 = vmatmul.mubr.bf16.gmra.mrb[4].mxu0 %v5146_v9  ;;  %3905 = vmatprep.mubr.bf16.mxu1 %v5203_v37 }
  0x90   : > { %4129 = vmatprep.mubr.bf16.mxu0 %v5150_v12  ;;  %4158 = vmatpush3.bf16.msra.mxu0 %v4579_v59  ;;  %v2553_v59 = vld [vmem:[#allocation2 + $0x99] sm:$0xff] }
  0x91   : > { %4159 = vmatprep.subr.bf16.mxu0 %v4581_v38  ;;  %v2580_v44 = vpack.c.bf16 %v2553_v59, %v2552_v58 }
  0x94   : > { %4160 = vmatpush3.bf16.msra.mxu0 %v4581_v38  ;;  %v4595_v38 = vld [vmem:[%s5441_s3 + $0x210] sm:$0xff]  }
  0x95   : > { %4161 = vmatprep.subr.bf16.mxu0 %v4583_v4 }
  0x96   : > { %3906 = vmatmul.mubr.bf16.gmra.mrb[24].mxu1 %v5215_v5 }
  0x97   : > { %4130 = vmatmul.mubr.bf16.gmra.mrb[8].mxu0 %v5170_v39  ;;  %3909 = vmatprep.mubr.bf16.mxu1 %v5217_v6 }
  0x98   : > { %4133 = vmatprep.mubr.bf16.mxu0 %v5172_v40  ;;  %4162 = vmatpush3.bf16.msra.mxu0 %v4583_v4  ;;  %v2557_v4 = vld [vmem:[#allocation2 + $0xc9] sm:$0xff] }
  0x99   : > { %4163 = vmatprep.subr.bf16.mxu0 %v4585_v11  ;;  %v2582_v2 = vpack.c.bf16 %v2557_v4, %v2556_v60  ;;  %v2866_v60 = vld [vmem:[#allocation2 + $0xf2] sm:$0xff] }
  0x9c   : > { %4164 = vmatpush3.bf16.msra.mxu0 %v4585_v11  ;;  %v4598_v11 = vld [vmem:[%s5441_s3 + $0x220] sm:$0xff]  }
  0x9d   : > { %4165 = vmatprep.subr.bf16.mxu0 %v4587_v22 }
  0x9e   : > { %3910 = vmatmul.mubr.bf16.gmra.mrb[28].mxu1 %v5229_v13 }
  0x9f   : > { %4134 = vmatmul.mubr.bf16.gmra.mrb[12].mxu0 %v5185_v43  ;;  %3929 = vmatprep.mubr.bf16.mxu1 %v1045_v14  ;;  %v4600_v14 = vld [vmem:[%s5441_s3 + $0x230] sm:$0xff]  }
  0xa0   : > { %4137 = vmatprep.mubr.bf16.mxu0 %v5187_v46  ;;  %4166 = vmatpush3.bf16.msra.mxu0 %v4587_v22  ;;  %v2561_v22 = vld [vmem:[#allocation2 + $0xf9] sm:$0xff] }
  0xa1   : > { %4167 = vmatprep.subr.bf16.mxu0 %v4589_v20 }
  0xa4   : > { %4168 = vmatpush3.bf16.msra.mxu0 %v4589_v20 }
  0xa5   : > { %4201 = vmatprep.subr.bf16.mxu0 %v4591_v24 }
  0xa6   : > { %3930 = vmatmul.mubr.bf16.vlgmr.msra.gmra.mrb[0].mxu1 %v4986_v51  ;;  %v2266_v51 = vld [vmem:[#allocation2 + $0x180] sm:$0xff] }
  0xa7   : > { %4138 = vmatmul.mubr.bf16.gmra.mrb[16].mxu0 %v5201_v63  ;;  %3962 = vmatpush3.bf16.msra.mxu1 %v5183_v42  ;;  %v2548_v42 = vld [vmem:[#allocation2 + $0x61] sm:$0xff] }
  0xa8   : > { %3933 = vmatprep.mubr.bf16.mxu1 %v5011_v62  ;;  %4141 = vmatprep.mubr.bf16.mxu0 %v5203_v37  ;;  %v2267_v62 = vld [vmem:[#allocation2 + $0x188] sm:$0xff]  ;;  %v2578_v52 = vpack.c.bf16 %v2549_v35, %v2548_v42 }
  0xa9   : > { %3963 = vmatprep.subr.bf16.mxu1 %v4584_v29  ;;  %v5261_v15 = vpack.c.bf16 %v2267_v62, %v2266_v51 }
  0xab   : > { %3964 = vmatpush3.bf16.msra.mxu1 %v4584_v29  ;;  %v2563_v29 = vld [vmem:[#allocation2 + $0x111] sm:$0xff] }
  0xac   : > { %3965 = vmatprep.subr.bf16.mxu1 %v4586_v32 }
  0xae   : > { %3934 = vmatmul.mubr.bf16.gmra.mrb[4].mxu1 %v5017_v0  ;;  %v4592_v0 = vld [vmem:[%s5441_s3 + $0xe8] sm:$0xff]  }
  0xaf   : > { %4142 = vmatmul.mubr.bf16.gmra.mrb[20].mxu0 %v5215_v5  ;;  %3937 = vmatprep.mubr.bf16.mxu1 %v5036_v10  ;;  %v2544_v10 = vld [vmem:[#allocation2 + $0x31] sm:$0xff] }
  0xb0   : > { %4145 = vmatprep.mubr.bf16.mxu0 %v5217_v6  ;;  %3966 = vmatpush3.bf16.msra.mxu1 %v4586_v32  ;;  %v2576_v1 = vpack.c.bf16 %v2545_v56, %v2544_v10  ;;  %v2564_v32 = vld [vmem:[#allocation2 + $0x121] sm:$0xff]  ;;  %v2569_v10 = vld [vmem:[#allocation2 + $0x159] sm:$0xff] }
  0xb1   : > { %3967 = vmatprep.subr.bf16.mxu1 %v4588_v34 }
  0xb4   : > { %3968 = vmatpush3.bf16.msra.mxu1 %v4588_v34  ;;  %v2565_v34 = vld [vmem:[#allocation2 + $0x129] sm:$0xff] }
  0xb5   : > { %3969 = vmatprep.subr.bf16.mxu1 %v4590_v33  ;;  %v5322_v62 = vpack.c.bf16 %v2565_v34, %v2564_v32  ;;  %v2879_v32 = vld [vmem:[#allocation2 + $0x18a] sm:$0xff] }
  0xb6   : > { %3938 = vmatmul.mubr.bf16.gmra.mrb[8].mxu1 %v5042_v3  ;;  %v4596_v3 = vld [vmem:[%s5441_s3 + $0xf8] sm:$0xff]  }
  0xb7   : > { %4146 = vmatmul.mubr.bf16.gmra.mrb[24].mxu0 %v5229_v13  ;;  %3941 = vmatprep.mubr.bf16.mxu1 %v5068_v16  ;;  %v2546_v16 = vld [vmem:[#allocation2 + $0x49] sm:$0xff] }
  0xb8   : > { %4149 = vmatprep.mubr.bf16.mxu0 %v5261_v15  ;;  %3970 = vmatpush3.bf16.msra.mxu1 %v4590_v33  ;;  %v2577_v36 = vpack.c.bf16 %v2547_v41, %v2546_v16  ;;  %v4604_v33 = vld [vmem:[%s5441_s3 + $0x108] sm:$0xff]   ;;  %v2851_v16 = vld [vmem:[#allocation2 + $0x3a] sm:$0xff] }
  0xb9   : > { %3971 = vmatprep.subr.bf16.mxu1 %v4592_v0  ;;  %v4608_v41 = vld [vmem:[%s5441_s3 + $0x128] sm:$0xff]  }
  0xbc   : > { %3972 = vmatpush3.bf16.msra.mxu1 %v4592_v0  ;;  %v2568_v0 = vld [vmem:[#allocation2 + $0x151] sm:$0xff] }
  0xbd   : > { %3973 = vmatprep.subr.bf16.mxu1 %v4594_v57 }
  0xbe   : > { %3942 = vmatmul.mubr.bf16.gmra.mrb[12].mxu1 %v5074_v21  ;;  %v5285_v21 = vld [vmem:[%s5441_s3 + $0x100] sm:$0xff]  }
  0xbf   : > { %4150 = vmatmul.mubr.bf16.gmra.mrb[28].mxu0 %v5092_v30  ;;  %3945 = vmatprep.mubr.bf16.mxu1 %v5090_v28  ;;  %v2550_v28 = vld [vmem:[#allocation2 + $0x79] sm:$0xff]  ;;  %v2551_v30 = vld [vmem:[#allocation2 + $0x81] sm:$0xff] }
  0xc0   : > { %4169 = vmatprep.mubr.bf16.mxu0 %v2576_v1  ;;  %3974 = vmatpush3.bf16.msra.mxu1 %v4594_v57  ;;  %v2579_v47 = vpack.c.bf16 %v2551_v30, %v2550_v28  ;;  %v4606_v57 = vld [vmem:[%s5441_s3 + $0x118] sm:$0xff]   ;;  %v4607_v1 = vld [vmem:[%s5441_s3 + $0x120] sm:$0xff]  }
  0xc1   : > { %3975 = vmatprep.subr.bf16.mxu1 %v4596_v3  ;;  %v2858_v28 = vld [vmem:[#allocation2 + $0x92] sm:$0xff]  ;;  %v2859_v30 = vld [vmem:[#allocation2 + $0x9a] sm:$0xff] }
  0xc2   : > { %v2886_v59 = vpack.c.bf16 %v2859_v30, %v2858_v28 }
  0xc4   : > { %3976 = vmatpush3.bf16.msra.mxu1 %v4596_v3  ;;  %v2850_v3 = vld [vmem:[#allocation2 + $0x32] sm:$0xff] }
  0xc5   : > { %4249 = vmatprep.subr.bf16.mxu1 %v5285_v21  ;;  %v2882_v35 = vpack.c.bf16 %v2851_v16, %v2850_v3 }
  0xc6   : > { %3946 = vmatmul.mubr.bf16.gmra.mrb[16].mxu1 %v5094_v31  ;;  %v4597_v31 = vld [vmem:[%s5441_s3 + $0x218] sm:$0xff]  }
  0xc7   : > { %4170 = vmatmul.mubr.bf16.vlgmr.msra.gmra.mrb[0].mxu0 %v2577_v36  ;;  %3949 = vmatprep.mubr.bf16.mxu1 %v5110_v49  ;;  %v2554_v49 = vld [vmem:[#allocation2 + $0xa9] sm:$0xff] }
  0xc8   : > { %4202 = vmatpush3.bf16.msra.mxu0 %v4591_v24  ;;  %4173 = vmatprep.mubr.bf16.mxu0 %v2578_v52  ;;  %v2581_v18 = vpack.c.bf16 %v2555_v55, %v2554_v49  ;;  %v5311_v24 = vpack.c.bf16 %v2561_v22, %v2560_v19  ;;  %v2855_v36 = vld [vmem:[#allocation2 + $0x6a] sm:$0xff]  ;;  %v4610_v52 = vld [vmem:[%s5441_s3 + $0x138] sm:$0xff]   ;;  %v2865_v55 = vld [vmem:[#allocation2 + $0xe2] sm:$0xff] }
  0xc9   : > { %4203 = vmatprep.subr.bf16.mxu0 %v4593_v53  ;;  %v2874_v19 = vld [vmem:[#allocation2 + $0x152] sm:$0xff] }
  0xcc   : > { %4204 = vmatpush3.bf16.msra.mxu0 %v4593_v53 }
  0xcd   : > { %4205 = vmatprep.subr.bf16.mxu0 %v4595_v38 }
  0xce   : > { %3950 = vmatmul.mubr.bf16.gmra.mrb[20].mxu1 %v5114_v27  ;;  %v4599_v27 = vld [vmem:[%s5441_s3 + $0x228] sm:$0xff]  }
  0xcf   : > { %4174 = vmatmul.mubr.bf16.gmra.mrb[4].mxu0 %v2579_v47  ;;  %3953 = vmatprep.mubr.bf16.mxu1 %v5130_v50  ;;  %v2558_v50 = vld [vmem:[#allocation2 + $0xd9] sm:$0xff] }
  0xd0   : > { %4177 = vmatprep.mubr.bf16.mxu0 %v2580_v44  ;;  %4206 = vmatpush3.bf16.msra.mxu0 %v4595_v38  ;;  %v5309_v20 = vpack.c.bf16 %v2559_v7, %v2558_v50  ;;  %v2860_v38 = vld [vmem:[#allocation2 + $0xaa] sm:$0xff]  ;;  %v2861_v47 = vld [vmem:[#allocation2 + $0xb2] sm:$0xff]  ;;  %v2862_v44 = vld [vmem:[#allocation2 + $0xc2] sm:$0xff] }
  0xd1   : > { %4207 = vmatprep.subr.bf16.mxu0 %v4597_v31  ;;  %v2873_v7 = vld [vmem:[#allocation2 + $0x142] sm:$0xff] }
  0xd4   : > { %4208 = vmatpush3.bf16.msra.mxu0 %v4597_v31  ;;  %v2887_v31 = vpack.c.bf16 %v2861_v47, %v2860_v38 }
  0xd5   : > { %4209 = vmatprep.subr.bf16.mxu0 %v4598_v11 }
  0xd6   : > { %3954 = vmatmul.mubr.bf16.gmra.mrb[24].mxu1 %v5134_v61  ;;  %v4601_v61 = vld [vmem:[%s5441_s3 + $0x238] sm:$0xff]  }
  0xd7   : > { %4178 = vmatmul.mubr.bf16.gmra.mrb[8].mxu0 %v2581_v18  ;;  %3957 = vmatprep.mubr.bf16.mxu1 %v5148_v8  ;;  %v2562_v8 = vld [vmem:[#allocation2 + $0x109] sm:$0xff]  ;;  %v2869_v18 = vld [vmem:[#allocation2 + $0x112] sm:$0xff] }
  0xd8   : > { %4181 = vmatprep.mubr.bf16.mxu0 %v2582_v2  ;;  %4210 = vmatpush3.bf16.msra.mxu0 %v4598_v11  ;;  %v5320_v51 = vpack.c.bf16 %v2563_v29, %v2562_v8  ;;  %v2870_v2 = vld [vmem:[#allocation2 + $0x122] sm:$0xff] }
  0xd9   : > { %4211 = vmatprep.subr.bf16.mxu0 %v4599_v27  ;;  %v1653_v8 = vld [vmem:[#allocation2 + $0x169] sm:$0xff] }
  0xda   : > { %v2878_v29 = vld [vmem:[#allocation2 + $0x182] sm:$0xff] }
  0xdc   : > { %4212 = vmatpush3.bf16.msra.mxu0 %v4599_v27 }
  0xdd   : > { %4213 = vmatprep.subr.bf16.mxu0 %v4600_v14 }
  0xde   : > { %3958 = vmatmul.mubr.bf16.gmra.mrb[28].mxu1 %v5152_v17  ;;  %v2567_v17 = vld [vmem:[#allocation2 + $0x141] sm:$0xff] }
  0xdf   : > { %4182 = vmatmul.mubr.bf16.gmra.mrb[12].mxu0 %v5309_v20  ;;  %3977 = vmatprep.mubr.bf16.mxu1 %v5108_v48  ;;  %v2566_v48 = vld [vmem:[#allocation2 + $0x139] sm:$0xff] }
  0xe0   : > { %4185 = vmatprep.mubr.bf16.mxu0 %v5311_v24  ;;  %4214 = vmatpush3.bf16.msra.mxu0 %v4600_v14  ;;  %v5332_v56 = vpack.c.bf16 %v2567_v17, %v2566_v48  ;;  %v2896_v48 = vpack.c.bf16 %v2879_v32, %v2878_v29  ;;  %v1655_v17 = vld [vmem:[#allocation2 + $0x181] sm:$0xff] }
  0xe1   : > { %4215 = vmatprep.subr.bf16.mxu0 %v4601_v61 }
  0xe4   : > { %4216 = vmatpush3.bf16.msra.mxu0 %v4601_v61  ;;  %v2877_v61 = vld [vmem:[#allocation2 + $0x172] sm:$0xff] }
  0xe6   : > { %3978 = vmatmul.mubr.bf16.vlgmr.msra.gmra.mrb[0].mxu1 %v5112_v26  ;;  %v5334_v26 = vpack.c.bf16 %v2569_v10, %v2568_v0  ;;  %v2881_v0 = vld [vmem:[#allocation2 + $0x1a2] sm:$0xff] }
  0xe7   : > { %4186 = vmatmul.mubr.bf16.gmra.mrb[16].mxu0 %v5320_v51  ;;  %4257 = vmatpush3.bf16.msra.mxu1 %v5285_v21 }
  0xe8   : > { %3981 = vmatprep.mubr.bf16.mxu1 %v5128_v45  ;;  %4189 = vmatprep.mubr.bf16.mxu0 %v5322_v62  ;;  %v4605_v45 = vld [vmem:[%s5441_s3 + $0x110] sm:$0xff]  }
  0xe9   : > { %4250 = vmatprep.subr.bf16.mxu1 %v4604_v33 }
  0xeb   : > { %4258 = vmatpush3.bf16.msra.mxu1 %v4604_v33  ;;  %v1656_v33 = vld [vmem:[#allocation2 + $0x189] sm:$0xff] }
  0xec   : > { %4251 = vmatprep.subr.bf16.mxu1 %v4605_v45  ;;  %v1672_v10 = vpack.c.bf16 %v1656_v33, %v1655_v17 }
  0xee   : > { %3982 = vmatmul.mubr.bf16.gmra.mrb[4].mxu1 %v5132_v54  ;;  %v2574_v54 = vld [vmem:[#allocation2 + $0x199] sm:$0xff] }
  0xef   : > { %4190 = vmatmul.mubr.bf16.gmra.mrb[20].mxu0 %v5332_v56  ;;  %3985 = vmatprep.mubr.bf16.mxu1 %v5146_v9  ;;  %v2575_v9 = vld [vmem:[#allocation2 + $0x1a1] sm:$0xff] }
  0xf0   : > { %4193 = vmatprep.mubr.bf16.mxu0 %v5334_v26  ;;  %4259 = vmatpush3.bf16.msra.mxu1 %v4605_v45  ;;  %v2591_v42 = vpack.c.bf16 %v2575_v9, %v2574_v54 }
  0xf1   : > { %4252 = vmatprep.subr.bf16.mxu1 %v4606_v57 }
  0xf4   : > { %4260 = vmatpush3.bf16.msra.mxu1 %v4606_v57 }
  0xf5   : > { %4253 = vmatprep.subr.bf16.mxu1 %v4607_v1 }
  0xf6   : > { %3986 = vmatmul.mubr.bf16.gmra.mrb[8].mxu1 %v5150_v12  ;;  %v2852_v12 = vld [vmem:[#allocation2 + $0x4a] sm:$0xff] }
  0xf7   : > { %4194 = vmatmul.mubr.bf16.gmra.mrb[24].mxu0 %v5088_v25  ;;  %3989 = vmatprep.mubr.bf16.mxu1 %v5170_v39  ;;  %v4609_v25 = vld [vmem:[%s5441_s3 + $0x130] sm:$0xff]   ;;  %v2854_v39 = vld [vmem:[#allocation2 + $0x62] sm:$0xff] }
  0xf8   : > { %4197 = vmatprep.mubr.bf16.mxu0 %v5164_v23  ;;  %4261 = vmatpush3.bf16.msra.mxu1 %v4607_v1  ;;  %v2853_v23 = vld [vmem:[#allocation2 + $0x52] sm:$0xff]  ;;  %v2884_v21 = vpack.c.bf16 %v2855_v36, %v2854_v39 }
  0xf9   : > { %4254 = vmatprep.subr.bf16.mxu1 %v4608_v41  ;;  %v2883_v53 = vpack.c.bf16 %v2853_v23, %v2852_v12 }
  0xfc   : > { %4262 = vmatpush3.bf16.msra.mxu1 %v4608_v41 }
  0xfd   : > { %4255 = vmatprep.subr.bf16.mxu1 %v4609_v25 }
  0xfe   : > { %3990 = vmatmul.mubr.bf16.gmra.mrb[12].mxu1 %v5172_v40  ;;  %v2856_v40 = vld [vmem:[#allocation2 + $0x7a] sm:$0xff] }
  0xff   : > { %4198 = vmatmul.mubr.bf16.gmra.mrb[28].mxu0 %v2591_v42  ;;  %3993 = vmatprep.mubr.bf16.mxu1 %v5185_v43  ;;  %v2857_v43 = vld [vmem:[#allocation2 + $0x82] sm:$0xff] }
 0x100   : > { %4217 = vmatprep.mubr.bf16.mxu0 %v2882_v35  ;;  %4263 = vmatpush3.bf16.msra.mxu1 %v4609_v25  ;;  %v2885_v58 = vpack.c.bf16 %v2857_v43, %v2856_v40 }
 0x101   : > { %4256 = vmatprep.subr.bf16.mxu1 %v4610_v52 }
 0x104   : > { %4264 = vmatpush3.bf16.msra.mxu1 %v4610_v52 }
 0x106   : > { %3994 = vmatmul.mubr.bf16.gmra.mrb[16].mxu1 %v5187_v46  ;;  %v2863_v46 = vld [vmem:[#allocation2 + $0xca] sm:$0xff] }
 0x107   : > { %4218 = vmatmul.mubr.bf16.vlgmr.msra.gmra.mrb[0].mxu0 %v2883_v53  ;;  %3997 = vmatprep.mubr.bf16.mxu1 %v5201_v63  ;;  %v2888_v49 = vpack.c.bf16 %v2863_v46, %v2862_v44  ;;  %v2864_v63 = vld [vmem:[#allocation2 + $0xda] sm:$0xff] }
 0x108   : > { %4221 = vmatprep.mubr.bf16.mxu0 %v2884_v21  ;;  %v2889_v4 = vpack.c.bf16 %v2865_v55, %v2864_v63 }
 0x10e   : > { %3998 = vmatmul.mubr.bf16.gmra.mrb[20].mxu1 %v5203_v37  ;;  %v2867_v37 = vld [vmem:[#allocation2 + $0xfa] sm:$0xff] }
 0x10f   : > { %4222 = vmatmul.mubr.bf16.gmra.mrb[4].mxu0 %v2885_v58  ;;  %4001 = vmatprep.mubr.bf16.mxu1 %v5215_v5  ;;  %v2890_v11 = vpack.c.bf16 %v2867_v37, %v2866_v60  ;;  %v2868_v5 = vld [vmem:[#allocation2 + $0x10a] sm:$0xff] }
 0x110   : > { %4225 = vmatprep.mubr.bf16.mxu0 %v2886_v59  ;;  %v2891_v27 = vpack.c.bf16 %v2869_v18, %v2868_v5 }
 0x116   : > { %4002 = vmatmul.mubr.bf16.gmra.mrb[24].mxu1 %v5217_v6  ;;  %v2871_v6 = vld [vmem:[#allocation2 + $0x12a] sm:$0xff] }
 0x117   : > { %4226 = vmatmul.mubr.bf16.gmra.mrb[8].mxu0 %v2887_v31  ;;  %4005 = vmatprep.mubr.bf16.mxu1 %v5229_v13  ;;  %v2892_v50 = vpack.c.bf16 %v2871_v6, %v2870_v2  ;;  %v2872_v13 = vld [vmem:[#allocation2 + $0x13a] sm:$0xff] }
 0x118   : > { %4229 = vmatprep.mubr.bf16.mxu0 %v2888_v49  ;;  %v2893_v22 = vpack.c.bf16 %v2873_v7, %v2872_v13 }
 0x11e   : > { %4006 = vmatmul.mubr.bf16.gmra.mrb[28].mxu1 %v5261_v15  ;;  %v2875_v15 = vld [vmem:[#allocation2 + $0x15a] sm:$0xff] }
 0x11f   : > { %4230 = vmatmul.mubr.bf16.gmra.mrb[12].mxu0 %v2889_v4  ;;  %4041 = vmatprep.mubr.bf16.mxu1 %v5309_v20  ;;  %v2894_v14 = vpack.c.bf16 %v2875_v15, %v2874_v19  ;;  %v2876_v20 = vld [vmem:[#allocation2 + $0x16a] sm:$0xff] }
 0x120   : > { %4233 = vmatprep.mubr.bf16.mxu0 %v2890_v11  ;;  %v2895_v34 = vpack.c.bf16 %v2877_v61, %v2876_v20 }
 0x126   : > { %4042 = vmatmul.mubr.bf16.vlgmr.msra.gmra.mrb[16].mxu1 %v5311_v24  ;;  %v1654_v24 = vld [vmem:[#allocation2 + $0x171] sm:$0xff] }
 0x127   : > { %4234 = vmatmul.mubr.bf16.gmra.mrb[16].mxu0 %v2891_v27  ;;  %4045 = vmatprep.mubr.bf16.mxu1 %v5320_v51  ;;  %v1671_v51 = vpack.c.bf16 %v1654_v24, %v1653_v8 }
 0x128   : > { %4237 = vmatprep.mubr.bf16.mxu0 %v2892_v50 }
 0x12e   : > { %4046 = vmatmul.mubr.bf16.gmra.mrb[20].mxu1 %v5322_v62  ;;  %v2880_v62 = vld [vmem:[#allocation2 + $0x19a] sm:$0xff] }
 0x12f   : > { %4238 = vmatmul.mubr.bf16.gmra.mrb[20].mxu0 %v2893_v22  ;;  %4049 = vmatprep.mubr.bf16.mxu1 %v5332_v56  ;;  %v2897_v56 = vpack.c.bf16 %v2881_v0, %v2880_v62 }
 0x130   : > { %4241 = vmatprep.mubr.bf16.mxu0 %v2894_v14 }
 0x136   : > { %4050 = vmatmul.mubr.bf16.gmra.mrb[24].mxu1 %v5334_v26 }
 0x137   : > { %4242 = vmatmul.mubr.bf16.gmra.mrb[24].mxu0 %v2895_v34  ;;  %4053 = vmatprep.mubr.bf16.mxu1 %v1671_v51 }
 0x138   : > { %4245 = vmatprep.mubr.bf16.mxu0 %v2896_v48 }
 0x13e   : > { %4054 = vmatmul.mubr.bf16.gmra.mrb[28].mxu1 %v1672_v10 }
 0x13f   : > { %4246 = vmatmul.mubr.bf16.gmra.mrb[28].mxu0 %v2897_v56 }
 0x1b9   : > { %v3979_v45 = vpop.f32.mrb[0].mxu1 }
 0x1ba   : > { %v1466_v57 = vpop.f32.mrb[1].mxu1 }
 0x1bb   : > { %v3980_v1 = vpop.f32.mrb[2].mxu1 }
 0x1bc   : > { %v1469_v54 = vpop.f32.mrb[3].mxu1 }
 0x1c1   : > { %v3983_v9 = vpop.f32.mrb[4].mxu1 }
 0x1c2   : > { %v1482_v3 = vpop.f32.mrb[5].mxu1 }
 0x1c3   : > { %v3984_v16 = vpop.f32.mrb[6].mxu1 }
 0x1c4   : > { %v1485_v26 = vpop.f32.mrb[7].mxu1 }
 0x1c9   : > { %v3987_v41 = vpop.f32.mrb[8].mxu1 }
 0x1ca   : > { %v1498_v42 = vpop.f32.mrb[9].mxu1 }
 0x1cb   : > { %v3988_v35 = vpop.f32.mrb[10].mxu1 }
 0x1cc   : > { %v5377_v25 = vpop.f32.mrb[11].mxu1 }
 0x1d1   : > { %v5379_v12 = vpop.f32.mrb[12].mxu1 }
 0x1d2   : > { %v5381_v23 = vpop.f32.mrb[13].mxu1 }
 0x1d3   : > { %v5383_v39 = vpop.f32.mrb[14].mxu1 }
 0x1d4   : > { %v5385_v36 = vpop.f32.mrb[15].mxu1 }
 0x1da   : > { %v4219_v52 = vpop.f32.mrb[0].mxu0 }
 0x1db   : > { %v4265_v53 = vadd.f32 %v4219_v52, %v3979_v45  ;;  %v2997_v21 = vpop.f32.mrb[1].mxu0 }
 0x1dc   : > { %v4266_v40 = vadd.f32 %v2997_v21, %v1466_v57  ;;  %v4220_v43 = vpop.f32.mrb[2].mxu0 }
 0x1dd   : > { %3158 = vst [vmem:[%s5392_s12 + $0x10] sm:$0xff] %v4265_v53  ;;  %v4267_v28 = vadd.f32 %v4220_v43, %v3980_v1  ;;  %v3000_v30 = vpop.f32.mrb[3].mxu0  ;;  %v3227_v44 = vmul.f32 %v4265_v53, %v4265_v53 }
 0x1de   : > { %3156 = vst [vmem:[%s5392_s12] sm:$0xff] %v4266_v40  ;;  %v4268_v58 = vadd.f32 %v3000_v30, %v1469_v54  ;;  %v3225_v59 = vmul.f32 %v4266_v40, %v4266_v40 }
 0x1df   : > { %3159 = vst [vmem:[%s5392_s12 + $0x18] sm:$0xff] %v4267_v28  ;;  %v3228_v60 = vmul.f32 %v4267_v28, %v4267_v28 }
 0x1e0   : > { %3157 = vst [vmem:[%s5392_s12 + $0x8] sm:$0xff] %v4268_v58  ;;  %v3188_v38 = vadd.f32 %v4268_v58, %v4266_v40  ;;  %v3226_v47 = vmul.f32 %v4268_v58, %v4268_v58 }
 0x1e2   : > { %v3189_v46 = vadd.f32 %v4265_v53, %v3188_v38  ;;  %v3257_v31 = vadd.f32 %v3226_v47, %v3225_v59  ;;  %v4223_v49 = vpop.f32.mrb[4].mxu0 }
 0x1e3   : > { %v4269_v63 = vadd.f32 %v4223_v49, %v3983_v9  ;;  %v3013_v55 = vpop.f32.mrb[5].mxu0 }
 0x1e4   : > { %v3258_v37 = vadd.f32 %v3257_v31, %v3227_v44  ;;  %v4270_v4 = vadd.f32 %v3013_v55, %v1482_v3  ;;  %v3190_v11 = vadd.f32 %v4267_v28, %v3189_v46  ;;  %v4224_v5 = vpop.f32.mrb[6].mxu0 }
 0x1e5   : > { %3162 = vst [vmem:[%s5392_s12 + $0x30] sm:$0xff] %v4269_v63  ;;  %v4271_v18 = vadd.f32 %v4224_v5, %v3984_v16  ;;  %v3016_v2 = vpop.f32.mrb[7].mxu0  ;;  %v3231_v22 = vmul.f32 %v4269_v63, %v4269_v63 }
 0x1e6   : > { %3160 = vst [vmem:[%s5392_s12 + $0x20] sm:$0xff] %v4270_v4  ;;  %v3191_v6 = vadd.f32 %v4270_v4, %v3190_v11  ;;  %v3229_v27 = vmul.f32 %v4270_v4, %v4270_v4  ;;  %v3259_v50 = vadd.f32 %v3258_v37, %v3228_v60  ;;  %v4272_v13 = vadd.f32 %v3016_v2, %v1485_v26 }
 0x1e7   : > { %3163 = vst [vmem:[%s5392_s12 + $0x38] sm:$0xff] %v4271_v18  ;;  %v3232_v29 = vmul.f32 %v4271_v18, %v4271_v18 }
 0x1e8   : > { %v3260_v7 = vadd.f32 %v3259_v50, %v3229_v27  ;;  %3161 = vst [vmem:[%s5392_s12 + $0x28] sm:$0xff] %v4272_v13  ;;  %v3192_v19 = vadd.f32 %v4272_v13, %v3191_v6  ;;  %v3230_v15 = vmul.f32 %v4272_v13, %v4272_v13 }
 0x1ea   : > { %v3193_v14 = vadd.f32 %v4269_v63, %v3192_v19  ;;  %v3261_v20 = vadd.f32 %v3260_v7, %v3230_v15  ;;  %v4227_v61 = vpop.f32.mrb[8].mxu0 }
 0x1eb   : > { %v4273_v8 = vadd.f32 %v4227_v61, %v3987_v41  ;;  %v3029_v24 = vpop.f32.mrb[9].mxu0 }
 0x1ec   : > { %v3262_v32 = vadd.f32 %v3261_v20, %v3231_v22  ;;  %v4274_v34 = vadd.f32 %v3029_v24, %v1498_v42  ;;  %v3194_v51 = vadd.f32 %v4271_v18, %v3193_v14  ;;  %v4228_v48 = vpop.f32.mrb[10].mxu0 }
 0x1ed   : > { %3166 = vst [vmem:[%s5392_s12 + $0x50] sm:$0xff] %v4273_v8  ;;  %v4275_v17 = vadd.f32 %v4228_v48, %v3988_v35  ;;  %v3032_v33 = vpop.f32.mrb[11].mxu0  ;;  %v3235_v54 = vmul.f32 %v4273_v8, %v4273_v8 }
 0x1ee   : > { %3164 = vst [vmem:[%s5392_s12 + $0x40] sm:$0xff] %v4274_v34  ;;  %v3195_v62 = vadd.f32 %v4274_v34, %v3194_v51  ;;  %v3233_v0 = vmul.f32 %v4274_v34, %v4274_v34  ;;  %v3263_v10 = vadd.f32 %v3262_v32, %v3232_v29  ;;  %v4276_v56 = vadd.f32 %v3032_v33, %v5377_v25 }
 0x1ef   : > { %3167 = vst [vmem:[%s5392_s12 + $0x58] sm:$0xff] %v4275_v17  ;;  %v3236_v42 = vmul.f32 %v4275_v17, %v4275_v17 }
 0x1f0   : > { %v3264_v45 = vadd.f32 %v3263_v10, %v3233_v0  ;;  %3165 = vst [vmem:[%s5392_s12 + $0x48] sm:$0xff] %v4276_v56  ;;  %v3196_v57 = vadd.f32 %v4276_v56, %v3195_v62  ;;  %v3234_v1 = vmul.f32 %v4276_v56, %v4276_v56 }
 0x1f2   : > { %v3197_v9 = vadd.f32 %v4273_v8, %v3196_v57  ;;  %v3265_v3 = vadd.f32 %v3264_v45, %v3234_v1  ;;  %v4231_v16 = vpop.f32.mrb[12].mxu0 }
 0x1f3   : > { %v4277_v26 = vadd.f32 %v4231_v16, %v5379_v12  ;;  %v3045_v41 = vpop.f32.mrb[13].mxu0 }
 0x1f4   : > { %v3266_v35 = vadd.f32 %v3265_v3, %v3235_v54  ;;  %v4278_v25 = vadd.f32 %v3045_v41, %v5381_v23  ;;  %v3198_v52 = vadd.f32 %v4275_v17, %v3197_v9  ;;  %v4232_v53 = vpop.f32.mrb[14].mxu0 }
 0x1f5   : > { %3170 = vst [vmem:[%s5392_s12 + $0x70] sm:$0xff] %v4277_v26  ;;  %v4279_v21 = vadd.f32 %v4232_v53, %v5383_v39  ;;  %v3048_v40 = vpop.f32.mrb[15].mxu0  ;;  %v3239_v23 = vmul.f32 %v4277_v26, %v4277_v26 }
 0x1f6   : > { %3168 = vst [vmem:[%s5392_s12 + $0x60] sm:$0xff] %v4278_v25  ;;  %v3199_v43 = vadd.f32 %v4278_v25, %v3198_v52  ;;  %v3237_v28 = vmul.f32 %v4278_v25, %v4278_v25  ;;  %v3267_v30 = vadd.f32 %v3266_v35, %v3236_v42  ;;  %v4280_v58 = vadd.f32 %v3048_v40, %v5385_v36 }
 0x1f7   : > { %3171 = vst [vmem:[%s5392_s12 + $0x78] sm:$0xff] %v4279_v21  ;;  %v3240_v60 = vmul.f32 %v4279_v21, %v4279_v21 }
 0x1f8   : > { %v3268_v12 = vadd.f32 %v3267_v30, %v3237_v28  ;;  %3169 = vst [vmem:[%s5392_s12 + $0x68] sm:$0xff] %v4280_v58  ;;  %v3200_v59 = vadd.f32 %v4280_v58, %v3199_v43  ;;  %v3238_v38 = vmul.f32 %v4280_v58, %v4280_v58 }
 0x1f9   : > { %v4043_v47 = vpop.f32.mrb[16].mxu1 }
 0x1fa   : > { %v3201_v44 = vadd.f32 %v4277_v26, %v3200_v59  ;;  %v3269_v46 = vadd.f32 %v3268_v12, %v3238_v38  ;;  %v4235_v31 = vpop.f32.mrb[16].mxu0  ;;  %v1836_v39 = vpop.f32.mrb[17].mxu1 }
 0x1fb   : > { %v4281_v49 = vadd.f32 %v4235_v31, %v4043_v47  ;;  %v3061_v63 = vpop.f32.mrb[17].mxu0  ;;  %v4044_v55 = vpop.f32.mrb[18].mxu1 }
 0x1fc   : > { %v3270_v36 = vadd.f32 %v3269_v46, %v3239_v23  ;;  %v4282_v37 = vadd.f32 %v3061_v63, %v1836_v39  ;;  %v3202_v4 = vadd.f32 %v4279_v21, %v3201_v44  ;;  %v4236_v11 = vpop.f32.mrb[18].mxu0  ;;  %v1839_v5 = vpop.f32.mrb[19].mxu1 }
 0x1fd   : > { %3174 = vst [vmem:[%s5392_s12 + $0x90] sm:$0xff] %v4281_v49  ;;  %v4283_v18 = vadd.f32 %v4236_v11, %v4044_v55  ;;  %v3064_v2 = vpop.f32.mrb[19].mxu0  ;;  %v3243_v14 = vmul.f32 %v4281_v49, %v4281_v49 }
 0x1fe   : > { %3172 = vst [vmem:[%s5392_s12 + $0x80] sm:$0xff] %v4282_v37  ;;  %v3203_v6 = vadd.f32 %v4282_v37, %v3202_v4  ;;  %v3241_v27 = vmul.f32 %v4282_v37, %v4282_v37  ;;  %v3271_v50 = vadd.f32 %v3270_v36, %v3240_v60  ;;  %v4284_v13 = vadd.f32 %v3064_v2, %v1839_v5 }
 0x1ff   : > { %3175 = vst [vmem:[%s5392_s12 + $0x98] sm:$0xff] %v4283_v18  ;;  %v3244_v51 = vmul.f32 %v4283_v18, %v4283_v18 }
 0x200   : > { %v3272_v7 = vadd.f32 %v3271_v50, %v3241_v27  ;;  %3173 = vst [vmem:[%s5392_s12 + $0x88] sm:$0xff] %v4284_v13  ;;  %v3204_v19 = vadd.f32 %v4284_v13, %v3203_v6  ;;  %v3242_v15 = vmul.f32 %v4284_v13, %v4284_v13 }
 0x201   : > { %v4047_v22 = vpop.f32.mrb[20].mxu1 }
 0x202   : > { %v3205_v20 = vadd.f32 %v4281_v49, %v3204_v19  ;;  %v3273_v61 = vadd.f32 %v3272_v7, %v3242_v15  ;;  %v4239_v8 = vpop.f32.mrb[20].mxu0  ;;  %v1852_v24 = vpop.f32.mrb[21].mxu1 }
 0x203   : > { %v4285_v29 = vadd.f32 %v4239_v8, %v4047_v22  ;;  %v3077_v32 = vpop.f32.mrb[21].mxu0  ;;  %v4048_v34 = vpop.f32.mrb[22].mxu1 }
 0x204   : > { %v3274_v48 = vadd.f32 %v3273_v61, %v3243_v14  ;;  %v4286_v17 = vadd.f32 %v3077_v32, %v1852_v24  ;;  %v3206_v33 = vadd.f32 %v4283_v18, %v3205_v20  ;;  %v4240_v62 = vpop.f32.mrb[22].mxu0  ;;  %v1855_v0 = vpop.f32.mrb[23].mxu1 }
 0x205   : > { %3178 = vst [vmem:[%s5392_s12 + $0xb0] sm:$0xff] %v4285_v29  ;;  %v4287_v10 = vadd.f32 %v4240_v62, %v4048_v34  ;;  %v3080_v56 = vpop.f32.mrb[23].mxu0  ;;  %v3247_v41 = vmul.f32 %v4285_v29, %v4285_v29 }
 0x206   : > { %3176 = vst [vmem:[%s5392_s12 + $0xa0] sm:$0xff] %v4286_v17  ;;  %v3207_v45 = vadd.f32 %v4286_v17, %v3206_v33  ;;  %v3245_v57 = vmul.f32 %v4286_v17, %v4286_v17  ;;  %v3275_v1 = vadd.f32 %v3274_v48, %v3244_v51  ;;  %v4288_v54 = vadd.f32 %v3080_v56, %v1855_v0 }
 0x207   : > { %3179 = vst [vmem:[%s5392_s12 + $0xb8] sm:$0xff] %v4287_v10  ;;  %v3248_v43 = vmul.f32 %v4287_v10, %v4287_v10 }
 0x208   : > { %v3276_v9 = vadd.f32 %v3275_v1, %v3245_v57  ;;  %3177 = vst [vmem:[%s5392_s12 + $0xa8] sm:$0xff] %v4288_v54  ;;  %v3208_v3 = vadd.f32 %v4288_v54, %v3207_v45  ;;  %v3246_v16 = vmul.f32 %v4288_v54, %v4288_v54 }
 0x209   : > { %v4051_v26 = vpop.f32.mrb[24].mxu1 }
 0x20a   : > { %v3209_v42 = vadd.f32 %v4285_v29, %v3208_v3  ;;  %v3277_v35 = vadd.f32 %v3276_v9, %v3246_v16  ;;  %v4243_v25 = vpop.f32.mrb[24].mxu0  ;;  %v1868_v52 = vpop.f32.mrb[25].mxu1 }
 0x20b   : > { %v4289_v53 = vadd.f32 %v4243_v25, %v4051_v26  ;;  %v3093_v21 = vpop.f32.mrb[25].mxu0  ;;  %v4052_v40 = vpop.f32.mrb[26].mxu1 }
 0x20c   : > { %v3278_v28 = vadd.f32 %v3277_v35, %v3247_v41  ;;  %v4290_v30 = vadd.f32 %v3093_v21, %v1868_v52  ;;  %v3210_v58 = vadd.f32 %v4287_v10, %v3209_v42  ;;  %v4244_v12 = vpop.f32.mrb[26].mxu0  ;;  %v1871_v59 = vpop.f32.mrb[27].mxu1 }
 0x20d   : > { %3182 = vst [vmem:[%s5392_s12 + $0xd0] sm:$0xff] %v4289_v53  ;;  %v4291_v38 = vadd.f32 %v4244_v12, %v4052_v40  ;;  %v3096_v47 = vpop.f32.mrb[27].mxu0  ;;  %v3251_v60 = vmul.f32 %v4289_v53, %v4289_v53 }
 0x20e   : > { %3180 = vst [vmem:[%s5392_s12 + $0xc0] sm:$0xff] %v4290_v30  ;;  %v3211_v23 = vadd.f32 %v4290_v30, %v3210_v58  ;;  %v3249_v44 = vmul.f32 %v4290_v30, %v4290_v30  ;;  %v3279_v46 = vadd.f32 %v3278_v28, %v3248_v43  ;;  %v4292_v31 = vadd.f32 %v3096_v47, %v1871_v59 }
 0x20f   : > { %3183 = vst [vmem:[%s5392_s12 + $0xd8] sm:$0xff] %v4291_v38  ;;  %v3252_v6 = vmul.f32 %v4291_v38, %v4291_v38 }
 0x210   : > { %v3280_v39 = vadd.f32 %v3279_v46, %v3249_v44  ;;  %3181 = vst [vmem:[%s5392_s12 + $0xc8] sm:$0xff] %v4292_v31  ;;  %v3212_v49 = vadd.f32 %v4292_v31, %v3211_v23  ;;  %v3250_v63 = vmul.f32 %v4292_v31, %v4292_v31 }
 0x211   : > { %v4055_v55 = vpop.f32.mrb[28].mxu1 }
 0x212   : > { %v3213_v36 = vadd.f32 %v4289_v53, %v3212_v49  ;;  %v3281_v37 = vadd.f32 %v3280_v39, %v3250_v63  ;;  %v4247_v4 = vpop.f32.mrb[28].mxu0  ;;  %v1884_v11 = vpop.f32.mrb[29].mxu1 }
 0x213   : > { %v4293_v5 = vadd.f32 %v4247_v4, %v4055_v55  ;;  %v3109_v18 = vpop.f32.mrb[29].mxu0  ;;  %v4056_v2 = vpop.f32.mrb[30].mxu1 }
 0x214   : > { %v3282_v27 = vadd.f32 %v3281_v37, %v3251_v60  ;;  %v4294_v50 = vadd.f32 %v3109_v18, %v1884_v11  ;;  %v3214_v13 = vadd.f32 %v4291_v38, %v3213_v36  ;;  %v4248_v7 = vpop.f32.mrb[30].mxu0  ;;  %v1887_v19 = vpop.f32.mrb[31].mxu1 }
 0x215   : > { %3186 = vst [vmem:[%s5392_s12 + $0xf0] sm:$0xff] %v4293_v5  ;;  %v4295_v15 = vadd.f32 %v4248_v7, %v4056_v2  ;;  %v3112_v22 = vpop.f32.mrb[31].mxu0  ;;  %v3255_v34 = vmul.f32 %v4293_v5, %v4293_v5 }
 0x216   : > { %3184 = vst [vmem:[%s5392_s12 + $0xe0] sm:$0xff] %v4294_v50  ;;  %v3215_v14 = vadd.f32 %v4294_v50, %v3214_v13  ;;  %v3253_v20 = vmul.f32 %v4294_v50, %v4294_v50  ;;  %v3283_v61 = vadd.f32 %v3282_v27, %v3252_v6  ;;  %v4296_v8 = vadd.f32 %v3112_v22, %v1887_v19 }
 0x217   : > { %3187 = vst [vmem:[%s5392_s12 + $0xf8] sm:$0xff] %v4295_v15  ;;  %v3256_v17 = vmul.f32 %v4295_v15, %v4295_v15 }
 0x218   : > { %v3284_v24 = vadd.f32 %v3283_v61, %v3253_v20  ;;  %3185 = vst [vmem:[%s5392_s12 + $0xe8] sm:$0xff] %v4296_v8  ;;  %v3216_v29 = vadd.f32 %v4296_v8, %v3215_v14  ;;  %v3254_v32 = vmul.f32 %v4296_v8, %v4296_v8 }
 0x21a   : > { %v3217_v51 = vadd.f32 %v4293_v5, %v3216_v29  ;;  %v3285_v48 = vadd.f32 %v3284_v24, %v3254_v32 }
 0x21c   : > { %v3218_v33 = vadd.f32 %v4295_v15, %v3217_v51  ;;  %v3286_v62 = vadd.f32 %v3285_v48, %v3255_v34 }
 0x21e   : > { %v3219_v0 = vrot.slane %v3218_v33, 4  ;;  %v3287_v10 = vadd.f32 %v3286_v62, %v3256_v17 }
 0x220   : > { %v3220_v56 = vadd.f32 %v3219_v0, %v3218_v33  ;;  %v3288_v45 = vrot.slane %v3287_v10, 4 }
 0x222   : > { %v3221_v57 = vrot.slane %v3220_v56, 2  ;;  %v3289_v1 = vadd.f32 %v3288_v45, %v3287_v10 }
 0x224   : > { %v3222_v54 = vadd.f32 %v3221_v57, %v3220_v56  ;;  %v3290_v9 = vrot.slane %v3289_v1, 2 }
 0x226   : > { %v3223_v3 = vrot.slane %v3222_v54, 1  ;;  %v3291_v16 = vadd.f32 %v3290_v9, %v3289_v1 }
 0x228   : > { %v3292_v26 = vrot.slane %v3291_v16, 1  ;;  %v3224_v41 = vadd.f32 %v3223_v3, %v3222_v54 }
 0x22a   : > { %v3293_v42 = vadd.f32 %v3292_v26, %v3291_v16 }
 0x22c   : > { %v3295_v35 = vsel %vm3294_vm0, %v3224_v41, %v3293_v42 }
 0x22d   : > { %v3297_v25 = vsel %vm3296_vm1, %v3295_v35, 0.0 }
 0x22e   : > { %3298 = vst [vmem:[%s235_s15] sm:$0xff] %v3297_v25 }
 0x22f PF: > { %s16_s18 = sadd.s32 1, %s4617_s18  }
 0x230   : > { %p13_p4 = scmp.ge.s32.totalorder %s16_s18, 4  }
 0x232   :  { %15 = sbr.rel (!%p13_p4) target bundleno = 1 (0x1), region = 88 }

</bundles_post_ra>
